<compile_context>
chip_gen: v6e
topology: v6e:2x2x1
jax: 0.10.0
libtpu: 0.0.40
codegen_flags: <defaults>
</compile_context>

<pallas_src>
import jax
import jax.numpy as jnp
from jax.experimental import pallas as pl
from jax.experimental.pallas import tpu as pltpu

N_EMBED = 30
N_LAYER = 3
N_HEAD = 4
HEAD_SIZE = N_EMBED          # preserved module quirk (see header comment)
HS_PAD = 128                 # head size zero-padded to one lane tile
FF = 4 * N_EMBED
VOCAB_SIZE = 32              # `vocab` comes from undefined `text`; deterministic stand-in
BLOCK_SIZE = 256
LN_EPS = 1e-5

# Ordered weight keys passed to the kernel after `x`.
KERNEL_WEIGHT_KEYS = ("wqkv", "wp", "bp", "ln1g", "ln1b", "ln2g", "ln2b",
                      "w1", "b1", "w2", "b2", "lnfg", "lnfb", "wo", "bo")


def _layernorm(x, g, b):
    mu = jnp.mean(x, axis=-1, keepdims=True)
    var = jnp.mean((x - mu) ** 2, axis=-1, keepdims=True)
    return (x - mu) * jax.lax.rsqrt(var + LN_EPS) * g + b


def _decoder_math(x, wqkv, wp, bp, ln1g, ln1b, ln2g, ln2b,
                  w1, b1, w2, b2, lnfg, lnfb, wo, bo, *, batch, seqlen, recip):
    """Decoder stack on a flattened (batch*seqlen, C) slab.

    The weight arguments are Refs (or arrays); per-layer slices are loaded inside
    the unrolled layer loop so weights never all sit live in vregs at once.
    Returns (batch*seqlen, Vpad) f32 logits.
    """
    T = seqlen
    N = batch * T
    bf16 = jnp.bfloat16

    row = jax.lax.broadcasted_iota(jnp.int32, (T, T), 0)
    col = jax.lax.broadcasted_iota(jnp.int32, (T, T), 1)
    causal = (row >= col)[None, :, :]            # (1, T, T) broadcast over batch
    neg_big = jnp.float32(-1e30)                 # exp() underflows to exactly 0

    for l in range(N_LAYER):
        # ---- per-layer weight loads (short live ranges) -------------------
        wqkv_l = wqkv[l]                         # (C, 3*H*HS_PAD) bf16, Q pre-scaled
        wp_l = wp[l]                             # (H*HS_PAD, C)   bf16
        bp_l = bp[l]                             # (1, C)          f32
        w1_l, b1_l = w1[l], b1[l]                # (C, FF) bf16 / (1, FF) f32
        w2_l, b2_l = w2[l], b2[l]                # (FF, C) bf16 / (1, C)  f32

        # ---- multi-head self-attention ------------------------------------
        xn = _layernorm(x, ln1g[l], ln1b[l])                       # (N, C) f32
        qkv = jnp.dot(xn.astype(bf16), wqkv_l,
                      preferred_element_type=jnp.float32)          # (N, 3*H*128)

        head_outs = []
        for h in range(N_HEAD):
            q_off = h * HS_PAD
            k_off = (N_HEAD + h) * HS_PAD
            v_off = (2 * N_HEAD + h) * HS_PAD
            # 128-lane-aligned slices: no cross-lane relayout.
            q = qkv[:, q_off:q_off + HS_PAD].reshape(batch, T, HS_PAD)
            k = qkv[:, k_off:k_off + HS_PAD].reshape(batch, T, HS_PAD)
            v = qkv[:, v_off:v_off + HS_PAD].reshape(batch, T, HS_PAD)

            # scale already folded into Q weights (wei = q @ k.T * C**0.5 as in source)
            wei = jnp.einsum("btd,bsd->bts", q.astype(bf16), k.astype(bf16),
                             preferred_element_type=jnp.float32)   # (B, T, T)
            wei = jnp.where(causal, wei, neg_big)
            wei = wei - jnp.max(wei, axis=-1, keepdims=True)
            p = jnp.exp(wei)
            p = p * recip(jnp.sum(p, axis=-1, keepdims=True))
            # dropout on attention weights: identity at inference
            o = jnp.einsum("bts,bsd->btd", p.astype(bf16), v.astype(bf16),
                           preferred_element_type=jnp.float32)     # (B, T, 128)
            head_outs.append(o.reshape(N, HS_PAD))

        # Single fused output projection over all heads (K = H*128, zero-padded rows).
        head_cat = jnp.concatenate(head_outs, axis=-1)             # (N, H*128)
        sa = jnp.dot(head_cat.astype(bf16), wp_l,
                     preferred_element_type=jnp.float32) + bp_l    # (N, C)
        x = x + sa                                                 # residual 1

        # ---- feed-forward --------------------------------------------------
        xn2 = _layernorm(x, ln2g[l], ln2b[l])
        hdn = jnp.dot(xn2.astype(bf16), w1_l,
                      preferred_element_type=jnp.float32) + b1_l
        hdn = jnp.maximum(hdn, 0.0)                                # ReLU
        x = x + jnp.dot(hdn.astype(bf16), w2_l,
                        preferred_element_type=jnp.float32) + b2_l # residual 2

    xf = _layernorm(x, lnfg[...], lnfb[...])
    return jnp.dot(xf.astype(bf16), wo[...],
                   preferred_element_type=jnp.float32) + bo[...]


def decoder_kernel(x_ref, wqkv, wp, bp, ln1g, ln1b, ln2g, ln2b,
                   w1, b1, w2, b2, lnfg, lnfb, wo, bo, out_ref):
    Bb, T, C = x_ref.shape
    x2d = x_ref[...].reshape(Bb * T, C)
    logits2d = _decoder_math(
        x2d, wqkv, wp, bp, ln1g, ln1b, ln2g, ln2b,
        w1, b1, w2, b2, lnfg, lnfb, wo, bo,
        batch=Bb, seqlen=T,
        recip=lambda s: pl.reciprocal(s, approx=True))
    out_ref[...] = logits2d.reshape(Bb, T, logits2d.shape[-1])


def decoder_forward(idx, prep):
    """idx: (B, T) int32 -> lane-padded logits (B, T, Vpad) f32 (targets=None path).

    Consumers slice [..., :VOCAB_SIZE]; the padded store keeps the kernel's
    output writes lane-dense (unmasked vst).
    """
    B, T = idx.shape
    # Embedding gathers (glue, plain JAX): token emb + positional emb.
    x = prep["tok"][idx] + prep["pos"][:T][None, :, :]             # (B, T, C) f32

    vpad = prep["wo"].shape[-1]
    # >=2 grid steps when possible so both v7x TensorCores get a batch shard.
    n_steps = 2 if (B >= 2 and B % 2 == 0) else 1
    Bb = B // n_steps

    weight_args = [prep[k] for k in KERNEL_WEIGHT_KEYS]

    def full_spec(a):
        nd = a.ndim
        return pl.BlockSpec(a.shape, lambda b, _nd=nd: (0,) * _nd)

    out = pl.pallas_call(
        decoder_kernel,
        out_shape=jax.ShapeDtypeStruct((B, T, vpad), jnp.float32),
        grid=(n_steps,),
        in_specs=[pl.BlockSpec((Bb, T, N_EMBED), lambda b: (b, 0, 0))]
                 + [full_spec(a) for a in weight_args],
        out_specs=pl.BlockSpec((Bb, T, vpad), lambda b: (b, 0, 0)),
        compiler_params=pltpu.CompilerParams(
            dimension_semantics=("parallel",),
            vmem_limit_bytes=16 << 20,
        ),
    )(x, *weight_args)
    return out


# --------------------------------------------------------------------------
# Parameters: raw (PyTorch-layout) params + kernel-friendly prepared weights.
# --------------------------------------------------------------------------
def init_params(key):
    C, H, HS, L, V = N_EMBED, N_HEAD, HEAD_SIZE, N_LAYER, VOCAB_SIZE
    ks = jax.random.split(key, 16)

    def nrm(k, shape, scale=0.02):
        return jax.random.normal(k, shape, jnp.float32) * scale

    return {
        "tok": nrm(ks[0], (V, C), 1.0),
        "pos": nrm(ks[1], (BLOCK_SIZE, C), 1.0),
        "wq": nrm(ks[2], (L, H, C, HS)),
        "wk": nrm(ks[3], (L, H, C, HS)),
        "wv": nrm(ks[4], (L, H, C, HS)),
        "wproj": nrm(ks[5], (L, H * HS, C)),
        "bproj": nrm(ks[6], (L, C)),
        "ln1g": 1.0 + nrm(ks[7], (L, C), 0.1),
        "ln1b": nrm(ks[8], (L, C), 0.1),
        "ln2g": 1.0 + nrm(ks[9], (L, C), 0.1),
        "ln2b": nrm(ks[10], (L, C), 0.1),
        "w1": nrm(ks[11], (L, C, FF)),
        "b1": nrm(ks[12], (L, FF)),
        "w2": nrm(ks[13], (L, FF, C)),
        "b2": nrm(ks[14], (L, C)),
        "lnfg": jnp.ones((C,), jnp.float32),
        "lnfb": jnp.zeros((C,), jnp.float32),
        "wo": nrm(ks[15], (C, V)),
        "bo": jnp.zeros((V,), jnp.float32),
    }


def prepare_weights(raw):
    """Fuse / pad / pre-scale the raw params into kernel-friendly layouts."""
    L, C, H, HS, V = N_LAYER, N_EMBED, N_HEAD, HEAD_SIZE, VOCAB_SIZE
    scale = jnp.float32(C) ** 0.5            # wei = q @ k.T * C**0.5 (source quirk)

    def pad_heads(w):                         # (L, H, C, HS) -> (L, C, H*HS_PAD)
        w = jnp.pad(w, ((0, 0), (0, 0), (0, 0), (0, HS_PAD - HS)))
        w = jnp.transpose(w, (0, 2, 1, 3))    # (L, C, H, HS_PAD)
        return w.reshape(L, C, H * HS_PAD)

    q = pad_heads(raw["wq"]) * scale          # scale folded into Q columns
    k = pad_heads(raw["wk"])
    v = pad_heads(raw["wv"])
    wqkv = jnp.concatenate([q, k, v], axis=-1).astype(jnp.bfloat16)   # (L,C,3*H*128)

    wproj = raw["wproj"].reshape(L, H, HS, C)
    wproj = jnp.pad(wproj, ((0, 0), (0, 0), (0, HS_PAD - HS), (0, 0)))
    wp = wproj.reshape(L, H * HS_PAD, C).astype(jnp.bfloat16)          # (L, H*128, C)

    vpad = ((V + 127) // 128) * 128
    wo = jnp.pad(raw["wo"], ((0, 0), (0, vpad - V))).astype(jnp.bfloat16)
    bo = jnp.pad(raw["bo"], (0, vpad - V)).reshape(1, vpad)

    return {
        "tok": raw["tok"], "pos": raw["pos"],
        "wqkv": wqkv, "wp": wp,
        "bp": raw["bproj"].reshape(L, 1, C),
        "ln1g": raw["ln1g"].reshape(L, 1, C), "ln1b": raw["ln1b"].reshape(L, 1, C),
        "ln2g": raw["ln2g"].reshape(L, 1, C), "ln2b": raw["ln2b"].reshape(L, 1, C),
        "w1": raw["w1"].astype(jnp.bfloat16), "b1": raw["b1"].reshape(L, 1, FF),
        "w2": raw["w2"].astype(jnp.bfloat16), "b2": raw["b2"].reshape(L, 1, C),
        "lnfg": raw["lnfg"].reshape(1, C), "lnfb": raw["lnfb"].reshape(1, C),
        "wo": wo, "bo": bo,
    }


# --------------------------------------------------------------------------
# Pure-JAX f32 reference, written directly from the PyTorch module (raw params).
# --------------------------------------------------------------------------
def reference_forward(idx, raw):
    B, T = idx.shape
    x = raw["tok"][idx] + raw["pos"][:T][None, :, :]
    tril = jnp.tril(jnp.ones((T, T), jnp.float32))
    for l in range(N_LAYER):
        xn = _layernorm(x, raw["ln1g"][l], raw["ln1b"][l])
        outs = []
        for h in range(N_HEAD):
            q = xn @ raw["wq"][l, h]
            k = xn @ raw["wk"][l, h]
            v = xn @ raw["wv"][l, h]
            wei = jnp.einsum("btd,bsd->bts", q, k) * (jnp.float32(N_EMBED) ** 0.5)
            wei = jnp.where(tril == 0, -jnp.inf, wei)
            wei = jax.nn.softmax(wei, axis=-1)
            outs.append(jnp.einsum("bts,bsd->btd", wei, v))
        cat = jnp.concatenate(outs, axis=-1)                       # (B, T, H*HS)
        x = x + cat @ raw["wproj"][l] + raw["bproj"][l]
        xn2 = _layernorm(x, raw["ln2g"][l], raw["ln2b"][l])
        hdn = jax.nn.relu(xn2 @ raw["w1"][l] + raw["b1"][l])
        x = x + hdn @ raw["w2"][l] + raw["b2"][l]
    xf = _layernorm(x, raw["lnfg"], raw["lnfb"])
    return xf @ raw["wo"] + raw["bo"]


if __name__ == "__main__":
    key = jax.random.PRNGKey(0)
    pkey, ikey = jax.random.split(key)
    raw = init_params(pkey)
    prep = prepare_weights(raw)

    B, T = 2, 8
    idx = jax.random.randint(ikey, (B, T), 0, VOCAB_SIZE, dtype=jnp.int32)

    logits_pad = jax.jit(decoder_forward)(idx, prep)
    logits_pad = jax.block_until_ready(logits_pad)
    # Slice at the consumer (padded store keeps the kernel output lane-dense).
    logits = logits_pad[..., :VOCAB_SIZE]
    assert logits.shape == (B, T, VOCAB_SIZE), logits.shape

    ref = jax.block_until_ready(reference_forward(idx, raw))
    err = float(jnp.max(jnp.abs(logits - ref)))
    # bf16 matmul operands + approx reciprocal -> small, well under 2e-2.
    assert err < 2e-2, err

    # TODO(synk): dropout layers are treated as identity (eval mode); training-mode
    # stochastic dropout would need pltpu.prng_* inside the kernel.  The
    # targets-path cross-entropy loss and generate()'s multinomial sampling are
    # left to plain JAX consumers of the logits.
    print("KERNEL_OK")
</pallas_src>

<mosaic_0001>
module attributes {stable_mosaic.version = 11 : i64} {
  func.func @decoder_kernel(%arg0: i32, %arg1: memref<1x8x30xf32, #tpu.memory_space<vmem>>, %arg2: memref<3x30x1536xbf16, #tpu.memory_space<vmem>>, %arg3: memref<3x512x30xbf16, #tpu.memory_space<vmem>>, %arg4: memref<3x1x30xf32, #tpu.memory_space<vmem>>, %arg5: memref<3x1x30xf32, #tpu.memory_space<vmem>>, %arg6: memref<3x1x30xf32, #tpu.memory_space<vmem>>, %arg7: memref<3x1x30xf32, #tpu.memory_space<vmem>>, %arg8: memref<3x1x30xf32, #tpu.memory_space<vmem>>, %arg9: memref<3x30x120xbf16, #tpu.memory_space<vmem>>, %arg10: memref<3x1x120xf32, #tpu.memory_space<vmem>>, %arg11: memref<3x120x30xbf16, #tpu.memory_space<vmem>>, %arg12: memref<3x1x30xf32, #tpu.memory_space<vmem>>, %arg13: memref<1x30xf32, #tpu.memory_space<vmem>>, %arg14: memref<1x30xf32, #tpu.memory_space<vmem>>, %arg15: memref<30x128xbf16, #tpu.memory_space<vmem>>, %arg16: memref<1x128xf32, #tpu.memory_space<vmem>>, %arg17: memref<1x8x128xf32, #tpu.memory_space<vmem>>) attributes {dimension_semantics = [#tpu.dimension_semantics<parallel>], iteration_bounds = array<i64: 2>, scalar_prefetch = 0 : i64, scratch_operands = 0 : i64, tpu.core_type = #tpu.core_type<tc>, window_params = [{transform_indices = @transform_0, window_bounds = array<i64: 1, 8, 30>}, {pipeline_mode = #tpu.pipeline_mode<synchronous>, transform_indices = @transform_1, window_bounds = array<i64: 3, 30, 1536>}, {pipeline_mode = #tpu.pipeline_mode<synchronous>, transform_indices = @transform_2, window_bounds = array<i64: 3, 512, 30>}, {pipeline_mode = #tpu.pipeline_mode<synchronous>, transform_indices = @transform_3, window_bounds = array<i64: 3, 1, 30>}, {pipeline_mode = #tpu.pipeline_mode<synchronous>, transform_indices = @transform_4, window_bounds = array<i64: 3, 1, 30>}, {pipeline_mode = #tpu.pipeline_mode<synchronous>, transform_indices = @transform_5, window_bounds = array<i64: 3, 1, 30>}, {pipeline_mode = #tpu.pipeline_mode<synchronous>, transform_indices = @transform_6, window_bounds = array<i64: 3, 1, 30>}, {pipeline_mode = #tpu.pipeline_mode<synchronous>, transform_indices = @transform_7, window_bounds = array<i64: 3, 1, 30>}, {pipeline_mode = #tpu.pipeline_mode<synchronous>, transform_indices = @transform_8, window_bounds = array<i64: 3, 30, 120>}, {pipeline_mode = #tpu.pipeline_mode<synchronous>, transform_indices = @transform_9, window_bounds = array<i64: 3, 1, 120>}, {pipeline_mode = #tpu.pipeline_mode<synchronous>, transform_indices = @transform_10, window_bounds = array<i64: 3, 120, 30>}, {pipeline_mode = #tpu.pipeline_mode<synchronous>, transform_indices = @transform_11, window_bounds = array<i64: 3, 1, 30>}, {pipeline_mode = #tpu.pipeline_mode<synchronous>, transform_indices = @transform_12, window_bounds = array<i64: 1, 30>}, {pipeline_mode = #tpu.pipeline_mode<synchronous>, transform_indices = @transform_13, window_bounds = array<i64: 1, 30>}, {pipeline_mode = #tpu.pipeline_mode<synchronous>, transform_indices = @transform_14, window_bounds = array<i64: 30, 128>}, {pipeline_mode = #tpu.pipeline_mode<synchronous>, transform_indices = @transform_15, window_bounds = array<i64: 1, 128>}, {transform_indices = @transform_16, window_bounds = array<i64: 1, 8, 128>}]} {
    %c0 = arith.constant 0 : index
    %c0_0 = arith.constant 0 : index
    %c0_1 = arith.constant 0 : index
    %0 = vector.load %arg1[%c0, %c0_0, %c0_1] : memref<1x8x30xf32, #tpu.memory_space<vmem>>, vector<1x8x30xf32>
    %1 = vector.shape_cast %0 : vector<1x8x30xf32> to vector<8x30xf32>
    %2 = tpu.iota {dimensions = array<i32: 0>} : vector<8x8xi32>
    %3 = tpu.iota {dimensions = array<i32: 1>} : vector<8x8xi32>
    %4 = arith.cmpi sge, %2, %3 : vector<8x8xi32>
    %5 = vector.shape_cast %4 : vector<8x8xi1> to vector<1x8x8xi1>
    %c0_2 = arith.constant 0 : index
    %c0_3 = arith.constant 0 : index
    %c0_4 = arith.constant 0 : index
    %6 = vector.load %arg2[%c0_2, %c0_3, %c0_4] : memref<3x30x1536xbf16, #tpu.memory_space<vmem>>, vector<1x30x1536xbf16>
    %7 = vector.shape_cast %6 : vector<1x30x1536xbf16> to vector<30x1536xbf16>
    %c0_5 = arith.constant 0 : index
    %c0_6 = arith.constant 0 : index
    %c0_7 = arith.constant 0 : index
    %8 = vector.load %arg3[%c0_5, %c0_6, %c0_7] : memref<3x512x30xbf16, #tpu.memory_space<vmem>>, vector<1x512x30xbf16>
    %9 = vector.shape_cast %8 : vector<1x512x30xbf16> to vector<512x30xbf16>
    %c0_8 = arith.constant 0 : index
    %c0_9 = arith.constant 0 : index
    %c0_10 = arith.constant 0 : index
    %10 = vector.load %arg4[%c0_8, %c0_9, %c0_10] : memref<3x1x30xf32, #tpu.memory_space<vmem>>, vector<1x1x30xf32>
    %11 = vector.shape_cast %10 : vector<1x1x30xf32> to vector<1x30xf32>
    %c0_11 = arith.constant 0 : index
    %c0_12 = arith.constant 0 : index
    %c0_13 = arith.constant 0 : index
    %12 = vector.load %arg9[%c0_11, %c0_12, %c0_13] : memref<3x30x120xbf16, #tpu.memory_space<vmem>>, vector<1x30x120xbf16>
    %13 = vector.shape_cast %12 : vector<1x30x120xbf16> to vector<30x120xbf16>
    %c0_14 = arith.constant 0 : index
    %c0_15 = arith.constant 0 : index
    %c0_16 = arith.constant 0 : index
    %14 = vector.load %arg10[%c0_14, %c0_15, %c0_16] : memref<3x1x120xf32, #tpu.memory_space<vmem>>, vector<1x1x120xf32>
    %15 = vector.shape_cast %14 : vector<1x1x120xf32> to vector<1x120xf32>
    %c0_17 = arith.constant 0 : index
    %c0_18 = arith.constant 0 : index
    %c0_19 = arith.constant 0 : index
    %16 = vector.load %arg11[%c0_17, %c0_18, %c0_19] : memref<3x120x30xbf16, #tpu.memory_space<vmem>>, vector<1x120x30xbf16>
    %17 = vector.shape_cast %16 : vector<1x120x30xbf16> to vector<120x30xbf16>
    %c0_20 = arith.constant 0 : index
    %c0_21 = arith.constant 0 : index
    %c0_22 = arith.constant 0 : index
    %18 = vector.load %arg12[%c0_20, %c0_21, %c0_22] : memref<3x1x30xf32, #tpu.memory_space<vmem>>, vector<1x1x30xf32>
    %19 = vector.shape_cast %18 : vector<1x1x30xf32> to vector<1x30xf32>
    %c0_23 = arith.constant 0 : index
    %c0_24 = arith.constant 0 : index
    %c0_25 = arith.constant 0 : index
    %20 = vector.load %arg5[%c0_23, %c0_24, %c0_25] : memref<3x1x30xf32, #tpu.memory_space<vmem>>, vector<1x1x30xf32>
    %21 = vector.shape_cast %20 : vector<1x1x30xf32> to vector<1x30xf32>
    %c0_26 = arith.constant 0 : index
    %c0_27 = arith.constant 0 : index
    %c0_28 = arith.constant 0 : index
    %22 = vector.load %arg6[%c0_26, %c0_27, %c0_28] : memref<3x1x30xf32, #tpu.memory_space<vmem>>, vector<1x1x30xf32>
    %23 = vector.shape_cast %22 : vector<1x1x30xf32> to vector<1x30xf32>
    %cst = arith.constant dense<0.000000e+00> : vector<8xf32>
    %24 = vector.multi_reduction <add>, %1, %cst [1] : vector<8x30xf32> to vector<8xf32>
    %25 = vector.shape_cast %24 : vector<8xf32> to vector<8x1xf32>
    %cst_29 = arith.constant 3.000000e+01 : f32
    %26 = vector.broadcast %cst_29 : f32 to vector<8x1xf32>
    %27 = arith.divf %25, %26 : vector<8x1xf32>
    %28 = vector.broadcast %27 : vector<8x1xf32> to vector<8x30xf32>
    %29 = arith.subf %1, %28 : vector<8x30xf32>
    %30 = arith.mulf %29, %29 : vector<8x30xf32>
    %cst_30 = arith.constant dense<0.000000e+00> : vector<8xf32>
    %31 = vector.multi_reduction <add>, %30, %cst_30 [1] : vector<8x30xf32> to vector<8xf32>
    %32 = vector.shape_cast %31 : vector<8xf32> to vector<8x1xf32>
    %cst_31 = arith.constant 3.000000e+01 : f32
    %33 = vector.broadcast %cst_31 : f32 to vector<8x1xf32>
    %34 = arith.divf %32, %33 : vector<8x1xf32>
    %35 = vector.broadcast %27 : vector<8x1xf32> to vector<8x30xf32>
    %36 = arith.subf %1, %35 : vector<8x30xf32>
    %cst_32 = arith.constant 9.99999974E-6 : f32
    %37 = vector.broadcast %cst_32 : f32 to vector<8x1xf32>
    %38 = arith.addf %34, %37 : vector<8x1xf32>
    %39 = math.rsqrt %38 : vector<8x1xf32>
    %40 = vector.broadcast %39 : vector<8x1xf32> to vector<8x30xf32>
    %41 = arith.mulf %36, %40 : vector<8x30xf32>
    %42 = vector.broadcast %21 : vector<1x30xf32> to vector<8x30xf32>
    %43 = arith.mulf %41, %42 : vector<8x30xf32>
    %44 = vector.broadcast %23 : vector<1x30xf32> to vector<8x30xf32>
    %45 = arith.addf %43, %44 : vector<8x30xf32>
    %46 = arith.truncf %45 : vector<8x30xf32> to vector<8x30xbf16>
    %cst_33 = arith.constant dense<0.000000e+00> : vector<8x1536xf32>
    %47 = tpu.matmul %46, %7, %cst_33 {dimension_numbers = #tpu.dot_dimension_numbers<[1], [0], [0], [1], [0, 0, 1, 1], [], []>} : vector<8x30xbf16>, vector<30x1536xbf16>, vector<8x1536xf32> -> vector<8x1536xf32>
    %48 = vector.extract_strided_slice %47 {offsets = [0, 0], sizes = [8, 128], strides = [1, 1]} : vector<8x1536xf32> to vector<8x128xf32>
    %49 = vector.shape_cast %48 : vector<8x128xf32> to vector<1x8x128xf32>
    %50 = vector.extract_strided_slice %47 {offsets = [0, 512], sizes = [8, 128], strides = [1, 1]} : vector<8x1536xf32> to vector<8x128xf32>
    %51 = vector.shape_cast %50 : vector<8x128xf32> to vector<1x8x128xf32>
    %52 = vector.extract_strided_slice %47 {offsets = [0, 1024], sizes = [8, 128], strides = [1, 1]} : vector<8x1536xf32> to vector<8x128xf32>
    %53 = vector.shape_cast %52 : vector<8x128xf32> to vector<1x8x128xf32>
    %54 = arith.truncf %49 : vector<1x8x128xf32> to vector<1x8x128xbf16>
    %55 = arith.truncf %51 : vector<1x8x128xf32> to vector<1x8x128xbf16>
    "tpu.trace_start"() <{level = 10 : i32, message = "btd,bsd->bts"}> : () -> ()
    %cst_34 = arith.constant dense<0.000000e+00> : vector<1x8x8xf32>
    %56 = tpu.matmul %54, %55, %cst_34 {dimension_numbers = #tpu.dot_dimension_numbers<[2], [2], [1], [1], [0, 0, 0, 1, 1, 1], [0], [0]>} : vector<1x8x128xbf16>, vector<1x8x128xbf16>, vector<1x8x8xf32> -> vector<1x8x8xf32>
    %cst_35 = arith.constant -1.000000e+30 : f32
    "tpu.trace_stop"() : () -> ()
    %57 = vector.broadcast %cst_35 : f32 to vector<1x8x8xf32>
    %58 = arith.select %5, %56, %57 : vector<1x8x8xi1>, vector<1x8x8xf32>
    %cst_36 = arith.constant dense<0xFF800000> : vector<1x8xf32>
    %59 = vector.multi_reduction <maximumf>, %58, %cst_36 [2] : vector<1x8x8xf32> to vector<1x8xf32>
    %60 = vector.shape_cast %59 : vector<1x8xf32> to vector<1x8x1xf32>
    %61 = vector.broadcast %60 : vector<1x8x1xf32> to vector<1x8x8xf32>
    %62 = arith.subf %58, %61 : vector<1x8x8xf32>
    %63 = math.exp %62 : vector<1x8x8xf32>
    %cst_37 = arith.constant dense<0.000000e+00> : vector<1x8xf32>
    %64 = vector.multi_reduction <add>, %63, %cst_37 [2] : vector<1x8x8xf32> to vector<1x8xf32>
    %65 = vector.shape_cast %64 : vector<1x8xf32> to vector<1x8x1xf32>
    %66 = tpu.reciprocal %65 {approx = true} : vector<1x8x1xf32> -> vector<1x8x1xf32>
    %67 = vector.broadcast %66 : vector<1x8x1xf32> to vector<1x8x8xf32>
    %68 = arith.mulf %63, %67 : vector<1x8x8xf32>
    %69 = arith.truncf %68 : vector<1x8x8xf32> to vector<1x8x8xbf16>
    %70 = arith.truncf %53 : vector<1x8x128xf32> to vector<1x8x128xbf16>
    "tpu.trace_start"() <{level = 10 : i32, message = "bts,bsd->btd"}> : () -> ()
    %cst_38 = arith.constant dense<0.000000e+00> : vector<1x8x128xf32>
    %71 = tpu.matmul %69, %70, %cst_38 {dimension_numbers = #tpu.dot_dimension_numbers<[2], [1], [1], [2], [0, 0, 0, 1, 1, 2], [0], [0]>} : vector<1x8x8xbf16>, vector<1x8x128xbf16>, vector<1x8x128xf32> -> vector<1x8x128xf32>
    "tpu.trace_stop"() : () -> ()
    %72 = vector.shape_cast %71 : vector<1x8x128xf32> to vector<8x128xf32>
    %73 = vector.extract_strided_slice %47 {offsets = [0, 128], sizes = [8, 128], strides = [1, 1]} : vector<8x1536xf32> to vector<8x128xf32>
    %74 = vector.shape_cast %73 : vector<8x128xf32> to vector<1x8x128xf32>
    %75 = vector.extract_strided_slice %47 {offsets = [0, 640], sizes = [8, 128], strides = [1, 1]} : vector<8x1536xf32> to vector<8x128xf32>
    %76 = vector.shape_cast %75 : vector<8x128xf32> to vector<1x8x128xf32>
    %77 = vector.extract_strided_slice %47 {offsets = [0, 1152], sizes = [8, 128], strides = [1, 1]} : vector<8x1536xf32> to vector<8x128xf32>
    %78 = vector.shape_cast %77 : vector<8x128xf32> to vector<1x8x128xf32>
    %79 = arith.truncf %74 : vector<1x8x128xf32> to vector<1x8x128xbf16>
    %80 = arith.truncf %76 : vector<1x8x128xf32> to vector<1x8x128xbf16>
    "tpu.trace_start"() <{level = 10 : i32, message = "btd,bsd->bts"}> : () -> ()
    %cst_39 = arith.constant dense<0.000000e+00> : vector<1x8x8xf32>
    %81 = tpu.matmul %79, %80, %cst_39 {dimension_numbers = #tpu.dot_dimension_numbers<[2], [2], [1], [1], [0, 0, 0, 1, 1, 1], [0], [0]>} : vector<1x8x128xbf16>, vector<1x8x128xbf16>, vector<1x8x8xf32> -> vector<1x8x8xf32>
    %cst_40 = arith.constant -1.000000e+30 : f32
    "tpu.trace_stop"() : () -> ()
    %82 = vector.broadcast %cst_40 : f32 to vector<1x8x8xf32>
    %83 = arith.select %5, %81, %82 : vector<1x8x8xi1>, vector<1x8x8xf32>
    %cst_41 = arith.constant dense<0xFF800000> : vector<1x8xf32>
    %84 = vector.multi_reduction <maximumf>, %83, %cst_41 [2] : vector<1x8x8xf32> to vector<1x8xf32>
    %85 = vector.shape_cast %84 : vector<1x8xf32> to vector<1x8x1xf32>
    %86 = vector.broadcast %85 : vector<1x8x1xf32> to vector<1x8x8xf32>
    %87 = arith.subf %83, %86 : vector<1x8x8xf32>
    %88 = math.exp %87 : vector<1x8x8xf32>
    %cst_42 = arith.constant dense<0.000000e+00> : vector<1x8xf32>
    %89 = vector.multi_reduction <add>, %88, %cst_42 [2] : vector<1x8x8xf32> to vector<1x8xf32>
    %90 = vector.shape_cast %89 : vector<1x8xf32> to vector<1x8x1xf32>
    %91 = tpu.reciprocal %90 {approx = true} : vector<1x8x1xf32> -> vector<1x8x1xf32>
    %92 = vector.broadcast %91 : vector<1x8x1xf32> to vector<1x8x8xf32>
    %93 = arith.mulf %88, %92 : vector<1x8x8xf32>
    %94 = arith.truncf %93 : vector<1x8x8xf32> to vector<1x8x8xbf16>
    %95 = arith.truncf %78 : vector<1x8x128xf32> to vector<1x8x128xbf16>
    "tpu.trace_start"() <{level = 10 : i32, message = "bts,bsd->btd"}> : () -> ()
    %cst_43 = arith.constant dense<0.000000e+00> : vector<1x8x128xf32>
    %96 = tpu.matmul %94, %95, %cst_43 {dimension_numbers = #tpu.dot_dimension_numbers<[2], [1], [1], [2], [0, 0, 0, 1, 1, 2], [0], [0]>} : vector<1x8x8xbf16>, vector<1x8x128xbf16>, vector<1x8x128xf32> -> vector<1x8x128xf32>
    "tpu.trace_stop"() : () -> ()
    %97 = vector.shape_cast %96 : vector<1x8x128xf32> to vector<8x128xf32>
    %98 = vector.extract_strided_slice %47 {offsets = [0, 256], sizes = [8, 128], strides = [1, 1]} : vector<8x1536xf32> to vector<8x128xf32>
    %99 = vector.shape_cast %98 : vector<8x128xf32> to vector<1x8x128xf32>
    %100 = vector.extract_strided_slice %47 {offsets = [0, 768], sizes = [8, 128], strides = [1, 1]} : vector<8x1536xf32> to vector<8x128xf32>
    %101 = vector.shape_cast %100 : vector<8x128xf32> to vector<1x8x128xf32>
    %102 = vector.extract_strided_slice %47 {offsets = [0, 1280], sizes = [8, 128], strides = [1, 1]} : vector<8x1536xf32> to vector<8x128xf32>
    %103 = vector.shape_cast %102 : vector<8x128xf32> to vector<1x8x128xf32>
    %104 = arith.truncf %99 : vector<1x8x128xf32> to vector<1x8x128xbf16>
    %105 = arith.truncf %101 : vector<1x8x128xf32> to vector<1x8x128xbf16>
    "tpu.trace_start"() <{level = 10 : i32, message = "btd,bsd->bts"}> : () -> ()
    %cst_44 = arith.constant dense<0.000000e+00> : vector<1x8x8xf32>
    %106 = tpu.matmul %104, %105, %cst_44 {dimension_numbers = #tpu.dot_dimension_numbers<[2], [2], [1], [1], [0, 0, 0, 1, 1, 1], [0], [0]>} : vector<1x8x128xbf16>, vector<1x8x128xbf16>, vector<1x8x8xf32> -> vector<1x8x8xf32>
    %cst_45 = arith.constant -1.000000e+30 : f32
    "tpu.trace_stop"() : () -> ()
    %107 = vector.broadcast %cst_45 : f32 to vector<1x8x8xf32>
    %108 = arith.select %5, %106, %107 : vector<1x8x8xi1>, vector<1x8x8xf32>
    %cst_46 = arith.constant dense<0xFF800000> : vector<1x8xf32>
    %109 = vector.multi_reduction <maximumf>, %108, %cst_46 [2] : vector<1x8x8xf32> to vector<1x8xf32>
    %110 = vector.shape_cast %109 : vector<1x8xf32> to vector<1x8x1xf32>
    %111 = vector.broadcast %110 : vector<1x8x1xf32> to vector<1x8x8xf32>
    %112 = arith.subf %108, %111 : vector<1x8x8xf32>
    %113 = math.exp %112 : vector<1x8x8xf32>
    %cst_47 = arith.constant dense<0.000000e+00> : vector<1x8xf32>
    %114 = vector.multi_reduction <add>, %113, %cst_47 [2] : vector<1x8x8xf32> to vector<1x8xf32>
    %115 = vector.shape_cast %114 : vector<1x8xf32> to vector<1x8x1xf32>
    %116 = tpu.reciprocal %115 {approx = true} : vector<1x8x1xf32> -> vector<1x8x1xf32>
    %117 = vector.broadcast %116 : vector<1x8x1xf32> to vector<1x8x8xf32>
    %118 = arith.mulf %113, %117 : vector<1x8x8xf32>
    %119 = arith.truncf %118 : vector<1x8x8xf32> to vector<1x8x8xbf16>
    %120 = arith.truncf %103 : vector<1x8x128xf32> to vector<1x8x128xbf16>
    "tpu.trace_start"() <{level = 10 : i32, message = "bts,bsd->btd"}> : () -> ()
    %cst_48 = arith.constant dense<0.000000e+00> : vector<1x8x128xf32>
    %121 = tpu.matmul %119, %120, %cst_48 {dimension_numbers = #tpu.dot_dimension_numbers<[2], [1], [1], [2], [0, 0, 0, 1, 1, 2], [0], [0]>} : vector<1x8x8xbf16>, vector<1x8x128xbf16>, vector<1x8x128xf32> -> vector<1x8x128xf32>
    "tpu.trace_stop"() : () -> ()
    %122 = vector.shape_cast %121 : vector<1x8x128xf32> to vector<8x128xf32>
    %123 = vector.extract_strided_slice %47 {offsets = [0, 384], sizes = [8, 128], strides = [1, 1]} : vector<8x1536xf32> to vector<8x128xf32>
    %124 = vector.shape_cast %123 : vector<8x128xf32> to vector<1x8x128xf32>
    %125 = vector.extract_strided_slice %47 {offsets = [0, 896], sizes = [8, 128], strides = [1, 1]} : vector<8x1536xf32> to vector<8x128xf32>
    %126 = vector.shape_cast %125 : vector<8x128xf32> to vector<1x8x128xf32>
    %127 = vector.extract_strided_slice %47 {offsets = [0, 1408], sizes = [8, 128], strides = [1, 1]} : vector<8x1536xf32> to vector<8x128xf32>
    %128 = vector.shape_cast %127 : vector<8x128xf32> to vector<1x8x128xf32>
    %129 = arith.truncf %124 : vector<1x8x128xf32> to vector<1x8x128xbf16>
    %130 = arith.truncf %126 : vector<1x8x128xf32> to vector<1x8x128xbf16>
    "tpu.trace_start"() <{level = 10 : i32, message = "btd,bsd->bts"}> : () -> ()
    %cst_49 = arith.constant dense<0.000000e+00> : vector<1x8x8xf32>
    %131 = tpu.matmul %129, %130, %cst_49 {dimension_numbers = #tpu.dot_dimension_numbers<[2], [2], [1], [1], [0, 0, 0, 1, 1, 1], [0], [0]>} : vector<1x8x128xbf16>, vector<1x8x128xbf16>, vector<1x8x8xf32> -> vector<1x8x8xf32>
    %cst_50 = arith.constant -1.000000e+30 : f32
    "tpu.trace_stop"() : () -> ()
    %132 = vector.broadcast %cst_50 : f32 to vector<1x8x8xf32>
    %133 = arith.select %5, %131, %132 : vector<1x8x8xi1>, vector<1x8x8xf32>
    %cst_51 = arith.constant dense<0xFF800000> : vector<1x8xf32>
    %134 = vector.multi_reduction <maximumf>, %133, %cst_51 [2] : vector<1x8x8xf32> to vector<1x8xf32>
    %135 = vector.shape_cast %134 : vector<1x8xf32> to vector<1x8x1xf32>
    %136 = vector.broadcast %135 : vector<1x8x1xf32> to vector<1x8x8xf32>
    %137 = arith.subf %133, %136 : vector<1x8x8xf32>
    %138 = math.exp %137 : vector<1x8x8xf32>
    %cst_52 = arith.constant dense<0.000000e+00> : vector<1x8xf32>
    %139 = vector.multi_reduction <add>, %138, %cst_52 [2] : vector<1x8x8xf32> to vector<1x8xf32>
    %140 = vector.shape_cast %139 : vector<1x8xf32> to vector<1x8x1xf32>
    %141 = tpu.reciprocal %140 {approx = true} : vector<1x8x1xf32> -> vector<1x8x1xf32>
    %142 = vector.broadcast %141 : vector<1x8x1xf32> to vector<1x8x8xf32>
    %143 = arith.mulf %138, %142 : vector<1x8x8xf32>
    %144 = arith.truncf %143 : vector<1x8x8xf32> to vector<1x8x8xbf16>
    %145 = arith.truncf %128 : vector<1x8x128xf32> to vector<1x8x128xbf16>
    "tpu.trace_start"() <{level = 10 : i32, message = "bts,bsd->btd"}> : () -> ()
    %cst_53 = arith.constant dense<0.000000e+00> : vector<1x8x128xf32>
    %146 = tpu.matmul %144, %145, %cst_53 {dimension_numbers = #tpu.dot_dimension_numbers<[2], [1], [1], [2], [0, 0, 0, 1, 1, 2], [0], [0]>} : vector<1x8x8xbf16>, vector<1x8x128xbf16>, vector<1x8x128xf32> -> vector<1x8x128xf32>
    "tpu.trace_stop"() : () -> ()
    %147 = vector.shape_cast %146 : vector<1x8x128xf32> to vector<8x128xf32>
    %148 = tpu.concatenate %72, %97, %122, %147 in 1 : vector<8x128xf32>, vector<8x128xf32>, vector<8x128xf32>, vector<8x128xf32> -> vector<8x512xf32>
    %149 = arith.truncf %148 : vector<8x512xf32> to vector<8x512xbf16>
    %cst_54 = arith.constant dense<0.000000e+00> : vector<8x30xf32>
    %150 = tpu.matmul %149, %9, %cst_54 {dimension_numbers = #tpu.dot_dimension_numbers<[1], [0], [0], [1], [0, 0, 1, 1], [], []>} : vector<8x512xbf16>, vector<512x30xbf16>, vector<8x30xf32> -> vector<8x30xf32>
    %151 = vector.broadcast %11 : vector<1x30xf32> to vector<8x30xf32>
    %152 = arith.addf %150, %151 : vector<8x30xf32>
    %153 = arith.addf %1, %152 : vector<8x30xf32>
    %c0_55 = arith.constant 0 : index
    %c0_56 = arith.constant 0 : index
    %c0_57 = arith.constant 0 : index
    %154 = vector.load %arg7[%c0_55, %c0_56, %c0_57] : memref<3x1x30xf32, #tpu.memory_space<vmem>>, vector<1x1x30xf32>
    %155 = vector.shape_cast %154 : vector<1x1x30xf32> to vector<1x30xf32>
    %c0_58 = arith.constant 0 : index
    %c0_59 = arith.constant 0 : index
    %c0_60 = arith.constant 0 : index
    %156 = vector.load %arg8[%c0_58, %c0_59, %c0_60] : memref<3x1x30xf32, #tpu.memory_space<vmem>>, vector<1x1x30xf32>
    %157 = vector.shape_cast %156 : vector<1x1x30xf32> to vector<1x30xf32>
    %cst_61 = arith.constant dense<0.000000e+00> : vector<8xf32>
    %158 = vector.multi_reduction <add>, %153, %cst_61 [1] : vector<8x30xf32> to vector<8xf32>
    %159 = vector.shape_cast %158 : vector<8xf32> to vector<8x1xf32>
    %cst_62 = arith.constant 3.000000e+01 : f32
    %160 = vector.broadcast %cst_62 : f32 to vector<8x1xf32>
    %161 = arith.divf %159, %160 : vector<8x1xf32>
    %162 = vector.broadcast %161 : vector<8x1xf32> to vector<8x30xf32>
    %163 = arith.subf %153, %162 : vector<8x30xf32>
    %164 = arith.mulf %163, %163 : vector<8x30xf32>
    %cst_63 = arith.constant dense<0.000000e+00> : vector<8xf32>
    %165 = vector.multi_reduction <add>, %164, %cst_63 [1] : vector<8x30xf32> to vector<8xf32>
    %166 = vector.shape_cast %165 : vector<8xf32> to vector<8x1xf32>
    %cst_64 = arith.constant 3.000000e+01 : f32
    %167 = vector.broadcast %cst_64 : f32 to vector<8x1xf32>
    %168 = arith.divf %166, %167 : vector<8x1xf32>
    %169 = vector.broadcast %161 : vector<8x1xf32> to vector<8x30xf32>
    %170 = arith.subf %153, %169 : vector<8x30xf32>
    %cst_65 = arith.constant 9.99999974E-6 : f32
    %171 = vector.broadcast %cst_65 : f32 to vector<8x1xf32>
    %172 = arith.addf %168, %171 : vector<8x1xf32>
    %173 = math.rsqrt %172 : vector<8x1xf32>
    %174 = vector.broadcast %173 : vector<8x1xf32> to vector<8x30xf32>
    %175 = arith.mulf %170, %174 : vector<8x30xf32>
    %176 = vector.broadcast %155 : vector<1x30xf32> to vector<8x30xf32>
    %177 = arith.mulf %175, %176 : vector<8x30xf32>
    %178 = vector.broadcast %157 : vector<1x30xf32> to vector<8x30xf32>
    %179 = arith.addf %177, %178 : vector<8x30xf32>
    %180 = arith.truncf %179 : vector<8x30xf32> to vector<8x30xbf16>
    %cst_66 = arith.constant dense<0.000000e+00> : vector<8x120xf32>
    %181 = tpu.matmul %180, %13, %cst_66 {dimension_numbers = #tpu.dot_dimension_numbers<[1], [0], [0], [1], [0, 0, 1, 1], [], []>} : vector<8x30xbf16>, vector<30x120xbf16>, vector<8x120xf32> -> vector<8x120xf32>
    %182 = vector.broadcast %15 : vector<1x120xf32> to vector<8x120xf32>
    %183 = arith.addf %181, %182 : vector<8x120xf32>
    %cst_67 = arith.constant 0.000000e+00 : f32
    %184 = vector.broadcast %cst_67 : f32 to vector<8x120xf32>
    %185 = arith.maximumf %183, %184 : vector<8x120xf32>
    %186 = arith.truncf %185 : vector<8x120xf32> to vector<8x120xbf16>
    %cst_68 = arith.constant dense<0.000000e+00> : vector<8x30xf32>
    %187 = tpu.matmul %186, %17, %cst_68 {dimension_numbers = #tpu.dot_dimension_numbers<[1], [0], [0], [1], [0, 0, 1, 1], [], []>} : vector<8x120xbf16>, vector<120x30xbf16>, vector<8x30xf32> -> vector<8x30xf32>
    %188 = arith.addf %153, %187 : vector<8x30xf32>
    %189 = vector.broadcast %19 : vector<1x30xf32> to vector<8x30xf32>
    %190 = arith.addf %188, %189 : vector<8x30xf32>
    %c1 = arith.constant 1 : index
    %c0_69 = arith.constant 0 : index
    %c0_70 = arith.constant 0 : index
    %191 = vector.load %arg2[%c1, %c0_69, %c0_70] : memref<3x30x1536xbf16, #tpu.memory_space<vmem>>, vector<1x30x1536xbf16>
    %192 = vector.shape_cast %191 : vector<1x30x1536xbf16> to vector<30x1536xbf16>
    %c1_71 = arith.constant 1 : index
    %c0_72 = arith.constant 0 : index
    %c0_73 = arith.constant 0 : index
    %193 = vector.load %arg3[%c1_71, %c0_72, %c0_73] : memref<3x512x30xbf16, #tpu.memory_space<vmem>>, vector<1x512x30xbf16>
    %194 = vector.shape_cast %193 : vector<1x512x30xbf16> to vector<512x30xbf16>
    %c1_74 = arith.constant 1 : index
    %c0_75 = arith.constant 0 : index
    %c0_76 = arith.constant 0 : index
    %195 = vector.load %arg4[%c1_74, %c0_75, %c0_76] : memref<3x1x30xf32, #tpu.memory_space<vmem>>, vector<1x1x30xf32>
    %196 = vector.shape_cast %195 : vector<1x1x30xf32> to vector<1x30xf32>
    %c1_77 = arith.constant 1 : index
    %c0_78 = arith.constant 0 : index
    %c0_79 = arith.constant 0 : index
    %197 = vector.load %arg9[%c1_77, %c0_78, %c0_79] : memref<3x30x120xbf16, #tpu.memory_space<vmem>>, vector<1x30x120xbf16>
    %198 = vector.shape_cast %197 : vector<1x30x120xbf16> to vector<30x120xbf16>
    %c1_80 = arith.constant 1 : index
    %c0_81 = arith.constant 0 : index
    %c0_82 = arith.constant 0 : index
    %199 = vector.load %arg10[%c1_80, %c0_81, %c0_82] : memref<3x1x120xf32, #tpu.memory_space<vmem>>, vector<1x1x120xf32>
    %200 = vector.shape_cast %199 : vector<1x1x120xf32> to vector<1x120xf32>
    %c1_83 = arith.constant 1 : index
    %c0_84 = arith.constant 0 : index
    %c0_85 = arith.constant 0 : index
    %201 = vector.load %arg11[%c1_83, %c0_84, %c0_85] : memref<3x120x30xbf16, #tpu.memory_space<vmem>>, vector<1x120x30xbf16>
    %202 = vector.shape_cast %201 : vector<1x120x30xbf16> to vector<120x30xbf16>
    %c1_86 = arith.constant 1 : index
    %c0_87 = arith.constant 0 : index
    %c0_88 = arith.constant 0 : index
    %203 = vector.load %arg12[%c1_86, %c0_87, %c0_88] : memref<3x1x30xf32, #tpu.memory_space<vmem>>, vector<1x1x30xf32>
    %204 = vector.shape_cast %203 : vector<1x1x30xf32> to vector<1x30xf32>
    %c1_89 = arith.constant 1 : index
    %c0_90 = arith.constant 0 : index
    %c0_91 = arith.constant 0 : index
    %205 = vector.load %arg5[%c1_89, %c0_90, %c0_91] : memref<3x1x30xf32, #tpu.memory_space<vmem>>, vector<1x1x30xf32>
    %206 = vector.shape_cast %205 : vector<1x1x30xf32> to vector<1x30xf32>
    %c1_92 = arith.constant 1 : index
    %c0_93 = arith.constant 0 : index
    %c0_94 = arith.constant 0 : index
    %207 = vector.load %arg6[%c1_92, %c0_93, %c0_94] : memref<3x1x30xf32, #tpu.memory_space<vmem>>, vector<1x1x30xf32>
    %208 = vector.shape_cast %207 : vector<1x1x30xf32> to vector<1x30xf32>
    %cst_95 = arith.constant dense<0.000000e+00> : vector<8xf32>
    %209 = vector.multi_reduction <add>, %190, %cst_95 [1] : vector<8x30xf32> to vector<8xf32>
    %210 = vector.shape_cast %209 : vector<8xf32> to vector<8x1xf32>
    %cst_96 = arith.constant 3.000000e+01 : f32
    %211 = vector.broadcast %cst_96 : f32 to vector<8x1xf32>
    %212 = arith.divf %210, %211 : vector<8x1xf32>
    %213 = vector.broadcast %212 : vector<8x1xf32> to vector<8x30xf32>
    %214 = arith.subf %190, %213 : vector<8x30xf32>
    %215 = arith.mulf %214, %214 : vector<8x30xf32>
    %cst_97 = arith.constant dense<0.000000e+00> : vector<8xf32>
    %216 = vector.multi_reduction <add>, %215, %cst_97 [1] : vector<8x30xf32> to vector<8xf32>
    %217 = vector.shape_cast %216 : vector<8xf32> to vector<8x1xf32>
    %cst_98 = arith.constant 3.000000e+01 : f32
    %218 = vector.broadcast %cst_98 : f32 to vector<8x1xf32>
    %219 = arith.divf %217, %218 : vector<8x1xf32>
    %220 = vector.broadcast %212 : vector<8x1xf32> to vector<8x30xf32>
    %221 = arith.subf %190, %220 : vector<8x30xf32>
    %cst_99 = arith.constant 9.99999974E-6 : f32
    %222 = vector.broadcast %cst_99 : f32 to vector<8x1xf32>
    %223 = arith.addf %219, %222 : vector<8x1xf32>
    %224 = math.rsqrt %223 : vector<8x1xf32>
    %225 = vector.broadcast %224 : vector<8x1xf32> to vector<8x30xf32>
    %226 = arith.mulf %221, %225 : vector<8x30xf32>
    %227 = vector.broadcast %206 : vector<1x30xf32> to vector<8x30xf32>
    %228 = arith.mulf %226, %227 : vector<8x30xf32>
    %229 = vector.broadcast %208 : vector<1x30xf32> to vector<8x30xf32>
    %230 = arith.addf %228, %229 : vector<8x30xf32>
    %231 = arith.truncf %230 : vector<8x30xf32> to vector<8x30xbf16>
    %cst_100 = arith.constant dense<0.000000e+00> : vector<8x1536xf32>
    %232 = tpu.matmul %231, %192, %cst_100 {dimension_numbers = #tpu.dot_dimension_numbers<[1], [0], [0], [1], [0, 0, 1, 1], [], []>} : vector<8x30xbf16>, vector<30x1536xbf16>, vector<8x1536xf32> -> vector<8x1536xf32>
    %233 = vector.extract_strided_slice %232 {offsets = [0, 0], sizes = [8, 128], strides = [1, 1]} : vector<8x1536xf32> to vector<8x128xf32>
    %234 = vector.shape_cast %233 : vector<8x128xf32> to vector<1x8x128xf32>
    %235 = vector.extract_strided_slice %232 {offsets = [0, 512], sizes = [8, 128], strides = [1, 1]} : vector<8x1536xf32> to vector<8x128xf32>
    %236 = vector.shape_cast %235 : vector<8x128xf32> to vector<1x8x128xf32>
    %237 = vector.extract_strided_slice %232 {offsets = [0, 1024], sizes = [8, 128], strides = [1, 1]} : vector<8x1536xf32> to vector<8x128xf32>
    %238 = vector.shape_cast %237 : vector<8x128xf32> to vector<1x8x128xf32>
    %239 = arith.truncf %234 : vector<1x8x128xf32> to vector<1x8x128xbf16>
    %240 = arith.truncf %236 : vector<1x8x128xf32> to vector<1x8x128xbf16>
    "tpu.trace_start"() <{level = 10 : i32, message = "btd,bsd->bts"}> : () -> ()
    %cst_101 = arith.constant dense<0.000000e+00> : vector<1x8x8xf32>
    %241 = tpu.matmul %239, %240, %cst_101 {dimension_numbers = #tpu.dot_dimension_numbers<[2], [2], [1], [1], [0, 0, 0, 1, 1, 1], [0], [0]>} : vector<1x8x128xbf16>, vector<1x8x128xbf16>, vector<1x8x8xf32> -> vector<1x8x8xf32>
    %cst_102 = arith.constant -1.000000e+30 : f32
    "tpu.trace_stop"() : () -> ()
    %242 = vector.broadcast %cst_102 : f32 to vector<1x8x8xf32>
    %243 = arith.select %5, %241, %242 : vector<1x8x8xi1>, vector<1x8x8xf32>
    %cst_103 = arith.constant dense<0xFF800000> : vector<1x8xf32>
    %244 = vector.multi_reduction <maximumf>, %243, %cst_103 [2] : vector<1x8x8xf32> to vector<1x8xf32>
    %245 = vector.shape_cast %244 : vector<1x8xf32> to vector<1x8x1xf32>
    %246 = vector.broadcast %245 : vector<1x8x1xf32> to vector<1x8x8xf32>
    %247 = arith.subf %243, %246 : vector<1x8x8xf32>
    %248 = math.exp %247 : vector<1x8x8xf32>
    %cst_104 = arith.constant dense<0.000000e+00> : vector<1x8xf32>
    %249 = vector.multi_reduction <add>, %248, %cst_104 [2] : vector<1x8x8xf32> to vector<1x8xf32>
    %250 = vector.shape_cast %249 : vector<1x8xf32> to vector<1x8x1xf32>
    %251 = tpu.reciprocal %250 {approx = true} : vector<1x8x1xf32> -> vector<1x8x1xf32>
    %252 = vector.broadcast %251 : vector<1x8x1xf32> to vector<1x8x8xf32>
    %253 = arith.mulf %248, %252 : vector<1x8x8xf32>
    %254 = arith.truncf %253 : vector<1x8x8xf32> to vector<1x8x8xbf16>
    %255 = arith.truncf %238 : vector<1x8x128xf32> to vector<1x8x128xbf16>
    "tpu.trace_start"() <{level = 10 : i32, message = "bts,bsd->btd"}> : () -> ()
    %cst_105 = arith.constant dense<0.000000e+00> : vector<1x8x128xf32>
    %256 = tpu.matmul %254, %255, %cst_105 {dimension_numbers = #tpu.dot_dimension_numbers<[2], [1], [1], [2], [0, 0, 0, 1, 1, 2], [0], [0]>} : vector<1x8x8xbf16>, vector<1x8x128xbf16>, vector<1x8x128xf32> -> vector<1x8x128xf32>
    "tpu.trace_stop"() : () -> ()
    %257 = vector.shape_cast %256 : vector<1x8x128xf32> to vector<8x128xf32>
    %258 = vector.extract_strided_slice %232 {offsets = [0, 128], sizes = [8, 128], strides = [1, 1]} : vector<8x1536xf32> to vector<8x128xf32>
    %259 = vector.shape_cast %258 : vector<8x128xf32> to vector<1x8x128xf32>
    %260 = vector.extract_strided_slice %232 {offsets = [0, 640], sizes = [8, 128], strides = [1, 1]} : vector<8x1536xf32> to vector<8x128xf32>
    %261 = vector.shape_cast %260 : vector<8x128xf32> to vector<1x8x128xf32>
    %262 = vector.extract_strided_slice %232 {offsets = [0, 1152], sizes = [8, 128], strides = [1, 1]} : vector<8x1536xf32> to vector<8x128xf32>
    %263 = vector.shape_cast %262 : vector<8x128xf32> to vector<1x8x128xf32>
    %264 = arith.truncf %259 : vector<1x8x128xf32> to vector<1x8x128xbf16>
    %265 = arith.truncf %261 : vector<1x8x128xf32> to vector<1x8x128xbf16>
    "tpu.trace_start"() <{level = 10 : i32, message = "btd,bsd->bts"}> : () -> ()
    %cst_106 = arith.constant dense<0.000000e+00> : vector<1x8x8xf32>
    %266 = tpu.matmul %264, %265, %cst_106 {dimension_numbers = #tpu.dot_dimension_numbers<[2], [2], [1], [1], [0, 0, 0, 1, 1, 1], [0], [0]>} : vector<1x8x128xbf16>, vector<1x8x128xbf16>, vector<1x8x8xf32> -> vector<1x8x8xf32>
    %cst_107 = arith.constant -1.000000e+30 : f32
    "tpu.trace_stop"() : () -> ()
    %267 = vector.broadcast %cst_107 : f32 to vector<1x8x8xf32>
    %268 = arith.select %5, %266, %267 : vector<1x8x8xi1>, vector<1x8x8xf32>
    %cst_108 = arith.constant dense<0xFF800000> : vector<1x8xf32>
    %269 = vector.multi_reduction <maximumf>, %268, %cst_108 [2] : vector<1x8x8xf32> to vector<1x8xf32>
    %270 = vector.shape_cast %269 : vector<1x8xf32> to vector<1x8x1xf32>
    %271 = vector.broadcast %270 : vector<1x8x1xf32> to vector<1x8x8xf32>
    %272 = arith.subf %268, %271 : vector<1x8x8xf32>
    %273 = math.exp %272 : vector<1x8x8xf32>
    %cst_109 = arith.constant dense<0.000000e+00> : vector<1x8xf32>
    %274 = vector.multi_reduction <add>, %273, %cst_109 [2] : vector<1x8x8xf32> to vector<1x8xf32>
    %275 = vector.shape_cast %274 : vector<1x8xf32> to vector<1x8x1xf32>
    %276 = tpu.reciprocal %275 {approx = true} : vector<1x8x1xf32> -> vector<1x8x1xf32>
    %277 = vector.broadcast %276 : vector<1x8x1xf32> to vector<1x8x8xf32>
    %278 = arith.mulf %273, %277 : vector<1x8x8xf32>
    %279 = arith.truncf %278 : vector<1x8x8xf32> to vector<1x8x8xbf16>
    %280 = arith.truncf %263 : vector<1x8x128xf32> to vector<1x8x128xbf16>
    "tpu.trace_start"() <{level = 10 : i32, message = "bts,bsd->btd"}> : () -> ()
    %cst_110 = arith.constant dense<0.000000e+00> : vector<1x8x128xf32>
    %281 = tpu.matmul %279, %280, %cst_110 {dimension_numbers = #tpu.dot_dimension_numbers<[2], [1], [1], [2], [0, 0, 0, 1, 1, 2], [0], [0]>} : vector<1x8x8xbf16>, vector<1x8x128xbf16>, vector<1x8x128xf32> -> vector<1x8x128xf32>
    "tpu.trace_stop"() : () -> ()
    %282 = vector.shape_cast %281 : vector<1x8x128xf32> to vector<8x128xf32>
    %283 = vector.extract_strided_slice %232 {offsets = [0, 256], sizes = [8, 128], strides = [1, 1]} : vector<8x1536xf32> to vector<8x128xf32>
    %284 = vector.shape_cast %283 : vector<8x128xf32> to vector<1x8x128xf32>
    %285 = vector.extract_strided_slice %232 {offsets = [0, 768], sizes = [8, 128], strides = [1, 1]} : vector<8x1536xf32> to vector<8x128xf32>
    %286 = vector.shape_cast %285 : vector<8x128xf32> to vector<1x8x128xf32>
    %287 = vector.extract_strided_slice %232 {offsets = [0, 1280], sizes = [8, 128], strides = [1, 1]} : vector<8x1536xf32> to vector<8x128xf32>
    %288 = vector.shape_cast %287 : vector<8x128xf32> to vector<1x8x128xf32>
    %289 = arith.truncf %284 : vector<1x8x128xf32> to vector<1x8x128xbf16>
    %290 = arith.truncf %286 : vector<1x8x128xf32> to vector<1x8x128xbf16>
    "tpu.trace_start"() <{level = 10 : i32, message = "btd,bsd->bts"}> : () -> ()
    %cst_111 = arith.constant dense<0.000000e+00> : vector<1x8x8xf32>
    %291 = tpu.matmul %289, %290, %cst_111 {dimension_numbers = #tpu.dot_dimension_numbers<[2], [2], [1], [1], [0, 0, 0, 1, 1, 1], [0], [0]>} : vector<1x8x128xbf16>, vector<1x8x128xbf16>, vector<1x8x8xf32> -> vector<1x8x8xf32>
    %cst_112 = arith.constant -1.000000e+30 : f32
    "tpu.trace_stop"() : () -> ()
    %292 = vector.broadcast %cst_112 : f32 to vector<1x8x8xf32>
    %293 = arith.select %5, %291, %292 : vector<1x8x8xi1>, vector<1x8x8xf32>
    %cst_113 = arith.constant dense<0xFF800000> : vector<1x8xf32>
    %294 = vector.multi_reduction <maximumf>, %293, %cst_113 [2] : vector<1x8x8xf32> to vector<1x8xf32>
    %295 = vector.shape_cast %294 : vector<1x8xf32> to vector<1x8x1xf32>
    %296 = vector.broadcast %295 : vector<1x8x1xf32> to vector<1x8x8xf32>
    %297 = arith.subf %293, %296 : vector<1x8x8xf32>
    %298 = math.exp %297 : vector<1x8x8xf32>
    %cst_114 = arith.constant dense<0.000000e+00> : vector<1x8xf32>
    %299 = vector.multi_reduction <add>, %298, %cst_114 [2] : vector<1x8x8xf32> to vector<1x8xf32>
    %300 = vector.shape_cast %299 : vector<1x8xf32> to vector<1x8x1xf32>
    %301 = tpu.reciprocal %300 {approx = true} : vector<1x8x1xf32> -> vector<1x8x1xf32>
    %302 = vector.broadcast %301 : vector<1x8x1xf32> to vector<1x8x8xf32>
    %303 = arith.mulf %298, %302 : vector<1x8x8xf32>
    %304 = arith.truncf %303 : vector<1x8x8xf32> to vector<1x8x8xbf16>
    %305 = arith.truncf %288 : vector<1x8x128xf32> to vector<1x8x128xbf16>
    "tpu.trace_start"() <{level = 10 : i32, message = "bts,bsd->btd"}> : () -> ()
    %cst_115 = arith.constant dense<0.000000e+00> : vector<1x8x128xf32>
    %306 = tpu.matmul %304, %305, %cst_115 {dimension_numbers = #tpu.dot_dimension_numbers<[2], [1], [1], [2], [0, 0, 0, 1, 1, 2], [0], [0]>} : vector<1x8x8xbf16>, vector<1x8x128xbf16>, vector<1x8x128xf32> -> vector<1x8x128xf32>
    "tpu.trace_stop"() : () -> ()
    %307 = vector.shape_cast %306 : vector<1x8x128xf32> to vector<8x128xf32>
    %308 = vector.extract_strided_slice %232 {offsets = [0, 384], sizes = [8, 128], strides = [1, 1]} : vector<8x1536xf32> to vector<8x128xf32>
    %309 = vector.shape_cast %308 : vector<8x128xf32> to vector<1x8x128xf32>
    %310 = vector.extract_strided_slice %232 {offsets = [0, 896], sizes = [8, 128], strides = [1, 1]} : vector<8x1536xf32> to vector<8x128xf32>
    %311 = vector.shape_cast %310 : vector<8x128xf32> to vector<1x8x128xf32>
    %312 = vector.extract_strided_slice %232 {offsets = [0, 1408], sizes = [8, 128], strides = [1, 1]} : vector<8x1536xf32> to vector<8x128xf32>
    %313 = vector.shape_cast %312 : vector<8x128xf32> to vector<1x8x128xf32>
    %314 = arith.truncf %309 : vector<1x8x128xf32> to vector<1x8x128xbf16>
    %315 = arith.truncf %311 : vector<1x8x128xf32> to vector<1x8x128xbf16>
    "tpu.trace_start"() <{level = 10 : i32, message = "btd,bsd->bts"}> : () -> ()
    %cst_116 = arith.constant dense<0.000000e+00> : vector<1x8x8xf32>
    %316 = tpu.matmul %314, %315, %cst_116 {dimension_numbers = #tpu.dot_dimension_numbers<[2], [2], [1], [1], [0, 0, 0, 1, 1, 1], [0], [0]>} : vector<1x8x128xbf16>, vector<1x8x128xbf16>, vector<1x8x8xf32> -> vector<1x8x8xf32>
    %cst_117 = arith.constant -1.000000e+30 : f32
    "tpu.trace_stop"() : () -> ()
    %317 = vector.broadcast %cst_117 : f32 to vector<1x8x8xf32>
    %318 = arith.select %5, %316, %317 : vector<1x8x8xi1>, vector<1x8x8xf32>
    %cst_118 = arith.constant dense<0xFF800000> : vector<1x8xf32>
    %319 = vector.multi_reduction <maximumf>, %318, %cst_118 [2] : vector<1x8x8xf32> to vector<1x8xf32>
    %320 = vector.shape_cast %319 : vector<1x8xf32> to vector<1x8x1xf32>
    %321 = vector.broadcast %320 : vector<1x8x1xf32> to vector<1x8x8xf32>
    %322 = arith.subf %318, %321 : vector<1x8x8xf32>
    %323 = math.exp %322 : vector<1x8x8xf32>
    %cst_119 = arith.constant dense<0.000000e+00> : vector<1x8xf32>
    %324 = vector.multi_reduction <add>, %323, %cst_119 [2] : vector<1x8x8xf32> to vector<1x8xf32>
    %325 = vector.shape_cast %324 : vector<1x8xf32> to vector<1x8x1xf32>
    %326 = tpu.reciprocal %325 {approx = true} : vector<1x8x1xf32> -> vector<1x8x1xf32>
    %327 = vector.broadcast %326 : vector<1x8x1xf32> to vector<1x8x8xf32>
    %328 = arith.mulf %323, %327 : vector<1x8x8xf32>
    %329 = arith.truncf %328 : vector<1x8x8xf32> to vector<1x8x8xbf16>
    %330 = arith.truncf %313 : vector<1x8x128xf32> to vector<1x8x128xbf16>
    "tpu.trace_start"() <{level = 10 : i32, message = "bts,bsd->btd"}> : () -> ()
    %cst_120 = arith.constant dense<0.000000e+00> : vector<1x8x128xf32>
    %331 = tpu.matmul %329, %330, %cst_120 {dimension_numbers = #tpu.dot_dimension_numbers<[2], [1], [1], [2], [0, 0, 0, 1, 1, 2], [0], [0]>} : vector<1x8x8xbf16>, vector<1x8x128xbf16>, vector<1x8x128xf32> -> vector<1x8x128xf32>
    "tpu.trace_stop"() : () -> ()
    %332 = vector.shape_cast %331 : vector<1x8x128xf32> to vector<8x128xf32>
    %333 = tpu.concatenate %257, %282, %307, %332 in 1 : vector<8x128xf32>, vector<8x128xf32>, vector<8x128xf32>, vector<8x128xf32> -> vector<8x512xf32>
    %334 = arith.truncf %333 : vector<8x512xf32> to vector<8x512xbf16>
    %cst_121 = arith.constant dense<0.000000e+00> : vector<8x30xf32>
    %335 = tpu.matmul %334, %194, %cst_121 {dimension_numbers = #tpu.dot_dimension_numbers<[1], [0], [0], [1], [0, 0, 1, 1], [], []>} : vector<8x512xbf16>, vector<512x30xbf16>, vector<8x30xf32> -> vector<8x30xf32>
    %336 = vector.broadcast %196 : vector<1x30xf32> to vector<8x30xf32>
    %337 = arith.addf %335, %336 : vector<8x30xf32>
    %338 = arith.addf %190, %337 : vector<8x30xf32>
    %c1_122 = arith.constant 1 : index
    %c0_123 = arith.constant 0 : index
    %c0_124 = arith.constant 0 : index
    %339 = vector.load %arg7[%c1_122, %c0_123, %c0_124] : memref<3x1x30xf32, #tpu.memory_space<vmem>>, vector<1x1x30xf32>
    %340 = vector.shape_cast %339 : vector<1x1x30xf32> to vector<1x30xf32>
    %c1_125 = arith.constant 1 : index
    %c0_126 = arith.constant 0 : index
    %c0_127 = arith.constant 0 : index
    %341 = vector.load %arg8[%c1_125, %c0_126, %c0_127] : memref<3x1x30xf32, #tpu.memory_space<vmem>>, vector<1x1x30xf32>
    %342 = vector.shape_cast %341 : vector<1x1x30xf32> to vector<1x30xf32>
    %cst_128 = arith.constant dense<0.000000e+00> : vector<8xf32>
    %343 = vector.multi_reduction <add>, %338, %cst_128 [1] : vector<8x30xf32> to vector<8xf32>
    %344 = vector.shape_cast %343 : vector<8xf32> to vector<8x1xf32>
    %cst_129 = arith.constant 3.000000e+01 : f32
    %345 = vector.broadcast %cst_129 : f32 to vector<8x1xf32>
    %346 = arith.divf %344, %345 : vector<8x1xf32>
    %347 = vector.broadcast %346 : vector<8x1xf32> to vector<8x30xf32>
    %348 = arith.subf %338, %347 : vector<8x30xf32>
    %349 = arith.mulf %348, %348 : vector<8x30xf32>
    %cst_130 = arith.constant dense<0.000000e+00> : vector<8xf32>
    %350 = vector.multi_reduction <add>, %349, %cst_130 [1] : vector<8x30xf32> to vector<8xf32>
    %351 = vector.shape_cast %350 : vector<8xf32> to vector<8x1xf32>
    %cst_131 = arith.constant 3.000000e+01 : f32
    %352 = vector.broadcast %cst_131 : f32 to vector<8x1xf32>
    %353 = arith.divf %351, %352 : vector<8x1xf32>
    %354 = vector.broadcast %346 : vector<8x1xf32> to vector<8x30xf32>
    %355 = arith.subf %338, %354 : vector<8x30xf32>
    %cst_132 = arith.constant 9.99999974E-6 : f32
    %356 = vector.broadcast %cst_132 : f32 to vector<8x1xf32>
    %357 = arith.addf %353, %356 : vector<8x1xf32>
    %358 = math.rsqrt %357 : vector<8x1xf32>
    %359 = vector.broadcast %358 : vector<8x1xf32> to vector<8x30xf32>
    %360 = arith.mulf %355, %359 : vector<8x30xf32>
    %361 = vector.broadcast %340 : vector<1x30xf32> to vector<8x30xf32>
    %362 = arith.mulf %360, %361 : vector<8x30xf32>
    %363 = vector.broadcast %342 : vector<1x30xf32> to vector<8x30xf32>
    %364 = arith.addf %362, %363 : vector<8x30xf32>
    %365 = arith.truncf %364 : vector<8x30xf32> to vector<8x30xbf16>
    %cst_133 = arith.constant dense<0.000000e+00> : vector<8x120xf32>
    %366 = tpu.matmul %365, %198, %cst_133 {dimension_numbers = #tpu.dot_dimension_numbers<[1], [0], [0], [1], [0, 0, 1, 1], [], []>} : vector<8x30xbf16>, vector<30x120xbf16>, vector<8x120xf32> -> vector<8x120xf32>
    %367 = vector.broadcast %200 : vector<1x120xf32> to vector<8x120xf32>
    %368 = arith.addf %366, %367 : vector<8x120xf32>
    %cst_134 = arith.constant 0.000000e+00 : f32
    %369 = vector.broadcast %cst_134 : f32 to vector<8x120xf32>
    %370 = arith.maximumf %368, %369 : vector<8x120xf32>
    %371 = arith.truncf %370 : vector<8x120xf32> to vector<8x120xbf16>
    %cst_135 = arith.constant dense<0.000000e+00> : vector<8x30xf32>
    %372 = tpu.matmul %371, %202, %cst_135 {dimension_numbers = #tpu.dot_dimension_numbers<[1], [0], [0], [1], [0, 0, 1, 1], [], []>} : vector<8x120xbf16>, vector<120x30xbf16>, vector<8x30xf32> -> vector<8x30xf32>
    %373 = arith.addf %338, %372 : vector<8x30xf32>
    %374 = vector.broadcast %204 : vector<1x30xf32> to vector<8x30xf32>
    %375 = arith.addf %373, %374 : vector<8x30xf32>
    %c2 = arith.constant 2 : index
    %c0_136 = arith.constant 0 : index
    %c0_137 = arith.constant 0 : index
    %376 = vector.load %arg2[%c2, %c0_136, %c0_137] : memref<3x30x1536xbf16, #tpu.memory_space<vmem>>, vector<1x30x1536xbf16>
    %377 = vector.shape_cast %376 : vector<1x30x1536xbf16> to vector<30x1536xbf16>
    %c2_138 = arith.constant 2 : index
    %c0_139 = arith.constant 0 : index
    %c0_140 = arith.constant 0 : index
    %378 = vector.load %arg3[%c2_138, %c0_139, %c0_140] : memref<3x512x30xbf16, #tpu.memory_space<vmem>>, vector<1x512x30xbf16>
    %379 = vector.shape_cast %378 : vector<1x512x30xbf16> to vector<512x30xbf16>
    %c2_141 = arith.constant 2 : index
    %c0_142 = arith.constant 0 : index
    %c0_143 = arith.constant 0 : index
    %380 = vector.load %arg4[%c2_141, %c0_142, %c0_143] : memref<3x1x30xf32, #tpu.memory_space<vmem>>, vector<1x1x30xf32>
    %381 = vector.shape_cast %380 : vector<1x1x30xf32> to vector<1x30xf32>
    %c2_144 = arith.constant 2 : index
    %c0_145 = arith.constant 0 : index
    %c0_146 = arith.constant 0 : index
    %382 = vector.load %arg9[%c2_144, %c0_145, %c0_146] : memref<3x30x120xbf16, #tpu.memory_space<vmem>>, vector<1x30x120xbf16>
    %383 = vector.shape_cast %382 : vector<1x30x120xbf16> to vector<30x120xbf16>
    %c2_147 = arith.constant 2 : index
    %c0_148 = arith.constant 0 : index
    %c0_149 = arith.constant 0 : index
    %384 = vector.load %arg10[%c2_147, %c0_148, %c0_149] : memref<3x1x120xf32, #tpu.memory_space<vmem>>, vector<1x1x120xf32>
    %385 = vector.shape_cast %384 : vector<1x1x120xf32> to vector<1x120xf32>
    %c2_150 = arith.constant 2 : index
    %c0_151 = arith.constant 0 : index
    %c0_152 = arith.constant 0 : index
    %386 = vector.load %arg11[%c2_150, %c0_151, %c0_152] : memref<3x120x30xbf16, #tpu.memory_space<vmem>>, vector<1x120x30xbf16>
    %387 = vector.shape_cast %386 : vector<1x120x30xbf16> to vector<120x30xbf16>
    %c2_153 = arith.constant 2 : index
    %c0_154 = arith.constant 0 : index
    %c0_155 = arith.constant 0 : index
    %388 = vector.load %arg12[%c2_153, %c0_154, %c0_155] : memref<3x1x30xf32, #tpu.memory_space<vmem>>, vector<1x1x30xf32>
    %389 = vector.shape_cast %388 : vector<1x1x30xf32> to vector<1x30xf32>
    %c2_156 = arith.constant 2 : index
    %c0_157 = arith.constant 0 : index
    %c0_158 = arith.constant 0 : index
    %390 = vector.load %arg5[%c2_156, %c0_157, %c0_158] : memref<3x1x30xf32, #tpu.memory_space<vmem>>, vector<1x1x30xf32>
    %391 = vector.shape_cast %390 : vector<1x1x30xf32> to vector<1x30xf32>
    %c2_159 = arith.constant 2 : index
    %c0_160 = arith.constant 0 : index
    %c0_161 = arith.constant 0 : index
    %392 = vector.load %arg6[%c2_159, %c0_160, %c0_161] : memref<3x1x30xf32, #tpu.memory_space<vmem>>, vector<1x1x30xf32>
    %393 = vector.shape_cast %392 : vector<1x1x30xf32> to vector<1x30xf32>
    %cst_162 = arith.constant dense<0.000000e+00> : vector<8xf32>
    %394 = vector.multi_reduction <add>, %375, %cst_162 [1] : vector<8x30xf32> to vector<8xf32>
    %395 = vector.shape_cast %394 : vector<8xf32> to vector<8x1xf32>
    %cst_163 = arith.constant 3.000000e+01 : f32
    %396 = vector.broadcast %cst_163 : f32 to vector<8x1xf32>
    %397 = arith.divf %395, %396 : vector<8x1xf32>
    %398 = vector.broadcast %397 : vector<8x1xf32> to vector<8x30xf32>
    %399 = arith.subf %375, %398 : vector<8x30xf32>
    %400 = arith.mulf %399, %399 : vector<8x30xf32>
    %cst_164 = arith.constant dense<0.000000e+00> : vector<8xf32>
    %401 = vector.multi_reduction <add>, %400, %cst_164 [1] : vector<8x30xf32> to vector<8xf32>
    %402 = vector.shape_cast %401 : vector<8xf32> to vector<8x1xf32>
    %cst_165 = arith.constant 3.000000e+01 : f32
    %403 = vector.broadcast %cst_165 : f32 to vector<8x1xf32>
    %404 = arith.divf %402, %403 : vector<8x1xf32>
    %405 = vector.broadcast %397 : vector<8x1xf32> to vector<8x30xf32>
    %406 = arith.subf %375, %405 : vector<8x30xf32>
    %cst_166 = arith.constant 9.99999974E-6 : f32
    %407 = vector.broadcast %cst_166 : f32 to vector<8x1xf32>
    %408 = arith.addf %404, %407 : vector<8x1xf32>
    %409 = math.rsqrt %408 : vector<8x1xf32>
    %410 = vector.broadcast %409 : vector<8x1xf32> to vector<8x30xf32>
    %411 = arith.mulf %406, %410 : vector<8x30xf32>
    %412 = vector.broadcast %391 : vector<1x30xf32> to vector<8x30xf32>
    %413 = arith.mulf %411, %412 : vector<8x30xf32>
    %414 = vector.broadcast %393 : vector<1x30xf32> to vector<8x30xf32>
    %415 = arith.addf %413, %414 : vector<8x30xf32>
    %416 = arith.truncf %415 : vector<8x30xf32> to vector<8x30xbf16>
    %cst_167 = arith.constant dense<0.000000e+00> : vector<8x1536xf32>
    %417 = tpu.matmul %416, %377, %cst_167 {dimension_numbers = #tpu.dot_dimension_numbers<[1], [0], [0], [1], [0, 0, 1, 1], [], []>} : vector<8x30xbf16>, vector<30x1536xbf16>, vector<8x1536xf32> -> vector<8x1536xf32>
    %418 = vector.extract_strided_slice %417 {offsets = [0, 0], sizes = [8, 128], strides = [1, 1]} : vector<8x1536xf32> to vector<8x128xf32>
    %419 = vector.shape_cast %418 : vector<8x128xf32> to vector<1x8x128xf32>
    %420 = vector.extract_strided_slice %417 {offsets = [0, 512], sizes = [8, 128], strides = [1, 1]} : vector<8x1536xf32> to vector<8x128xf32>
    %421 = vector.shape_cast %420 : vector<8x128xf32> to vector<1x8x128xf32>
    %422 = vector.extract_strided_slice %417 {offsets = [0, 1024], sizes = [8, 128], strides = [1, 1]} : vector<8x1536xf32> to vector<8x128xf32>
    %423 = vector.shape_cast %422 : vector<8x128xf32> to vector<1x8x128xf32>
    %424 = arith.truncf %419 : vector<1x8x128xf32> to vector<1x8x128xbf16>
    %425 = arith.truncf %421 : vector<1x8x128xf32> to vector<1x8x128xbf16>
    "tpu.trace_start"() <{level = 10 : i32, message = "btd,bsd->bts"}> : () -> ()
    %cst_168 = arith.constant dense<0.000000e+00> : vector<1x8x8xf32>
    %426 = tpu.matmul %424, %425, %cst_168 {dimension_numbers = #tpu.dot_dimension_numbers<[2], [2], [1], [1], [0, 0, 0, 1, 1, 1], [0], [0]>} : vector<1x8x128xbf16>, vector<1x8x128xbf16>, vector<1x8x8xf32> -> vector<1x8x8xf32>
    %cst_169 = arith.constant -1.000000e+30 : f32
    "tpu.trace_stop"() : () -> ()
    %427 = vector.broadcast %cst_169 : f32 to vector<1x8x8xf32>
    %428 = arith.select %5, %426, %427 : vector<1x8x8xi1>, vector<1x8x8xf32>
    %cst_170 = arith.constant dense<0xFF800000> : vector<1x8xf32>
    %429 = vector.multi_reduction <maximumf>, %428, %cst_170 [2] : vector<1x8x8xf32> to vector<1x8xf32>
    %430 = vector.shape_cast %429 : vector<1x8xf32> to vector<1x8x1xf32>
    %431 = vector.broadcast %430 : vector<1x8x1xf32> to vector<1x8x8xf32>
    %432 = arith.subf %428, %431 : vector<1x8x8xf32>
    %433 = math.exp %432 : vector<1x8x8xf32>
    %cst_171 = arith.constant dense<0.000000e+00> : vector<1x8xf32>
    %434 = vector.multi_reduction <add>, %433, %cst_171 [2] : vector<1x8x8xf32> to vector<1x8xf32>
    %435 = vector.shape_cast %434 : vector<1x8xf32> to vector<1x8x1xf32>
    %436 = tpu.reciprocal %435 {approx = true} : vector<1x8x1xf32> -> vector<1x8x1xf32>
    %437 = vector.broadcast %436 : vector<1x8x1xf32> to vector<1x8x8xf32>
    %438 = arith.mulf %433, %437 : vector<1x8x8xf32>
    %439 = arith.truncf %438 : vector<1x8x8xf32> to vector<1x8x8xbf16>
    %440 = arith.truncf %423 : vector<1x8x128xf32> to vector<1x8x128xbf16>
    "tpu.trace_start"() <{level = 10 : i32, message = "bts,bsd->btd"}> : () -> ()
    %cst_172 = arith.constant dense<0.000000e+00> : vector<1x8x128xf32>
    %441 = tpu.matmul %439, %440, %cst_172 {dimension_numbers = #tpu.dot_dimension_numbers<[2], [1], [1], [2], [0, 0, 0, 1, 1, 2], [0], [0]>} : vector<1x8x8xbf16>, vector<1x8x128xbf16>, vector<1x8x128xf32> -> vector<1x8x128xf32>
    "tpu.trace_stop"() : () -> ()
    %442 = vector.shape_cast %441 : vector<1x8x128xf32> to vector<8x128xf32>
    %443 = vector.extract_strided_slice %417 {offsets = [0, 128], sizes = [8, 128], strides = [1, 1]} : vector<8x1536xf32> to vector<8x128xf32>
    %444 = vector.shape_cast %443 : vector<8x128xf32> to vector<1x8x128xf32>
    %445 = vector.extract_strided_slice %417 {offsets = [0, 640], sizes = [8, 128], strides = [1, 1]} : vector<8x1536xf32> to vector<8x128xf32>
    %446 = vector.shape_cast %445 : vector<8x128xf32> to vector<1x8x128xf32>
    %447 = vector.extract_strided_slice %417 {offsets = [0, 1152], sizes = [8, 128], strides = [1, 1]} : vector<8x1536xf32> to vector<8x128xf32>
    %448 = vector.shape_cast %447 : vector<8x128xf32> to vector<1x8x128xf32>
    %449 = arith.truncf %444 : vector<1x8x128xf32> to vector<1x8x128xbf16>
    %450 = arith.truncf %446 : vector<1x8x128xf32> to vector<1x8x128xbf16>
    "tpu.trace_start"() <{level = 10 : i32, message = "btd,bsd->bts"}> : () -> ()
    %cst_173 = arith.constant dense<0.000000e+00> : vector<1x8x8xf32>
    %451 = tpu.matmul %449, %450, %cst_173 {dimension_numbers = #tpu.dot_dimension_numbers<[2], [2], [1], [1], [0, 0, 0, 1, 1, 1], [0], [0]>} : vector<1x8x128xbf16>, vector<1x8x128xbf16>, vector<1x8x8xf32> -> vector<1x8x8xf32>
    %cst_174 = arith.constant -1.000000e+30 : f32
    "tpu.trace_stop"() : () -> ()
    %452 = vector.broadcast %cst_174 : f32 to vector<1x8x8xf32>
    %453 = arith.select %5, %451, %452 : vector<1x8x8xi1>, vector<1x8x8xf32>
    %cst_175 = arith.constant dense<0xFF800000> : vector<1x8xf32>
    %454 = vector.multi_reduction <maximumf>, %453, %cst_175 [2] : vector<1x8x8xf32> to vector<1x8xf32>
    %455 = vector.shape_cast %454 : vector<1x8xf32> to vector<1x8x1xf32>
    %456 = vector.broadcast %455 : vector<1x8x1xf32> to vector<1x8x8xf32>
    %457 = arith.subf %453, %456 : vector<1x8x8xf32>
    %458 = math.exp %457 : vector<1x8x8xf32>
    %cst_176 = arith.constant dense<0.000000e+00> : vector<1x8xf32>
    %459 = vector.multi_reduction <add>, %458, %cst_176 [2] : vector<1x8x8xf32> to vector<1x8xf32>
    %460 = vector.shape_cast %459 : vector<1x8xf32> to vector<1x8x1xf32>
    %461 = tpu.reciprocal %460 {approx = true} : vector<1x8x1xf32> -> vector<1x8x1xf32>
    %462 = vector.broadcast %461 : vector<1x8x1xf32> to vector<1x8x8xf32>
    %463 = arith.mulf %458, %462 : vector<1x8x8xf32>
    %464 = arith.truncf %463 : vector<1x8x8xf32> to vector<1x8x8xbf16>
    %465 = arith.truncf %448 : vector<1x8x128xf32> to vector<1x8x128xbf16>
    "tpu.trace_start"() <{level = 10 : i32, message = "bts,bsd->btd"}> : () -> ()
    %cst_177 = arith.constant dense<0.000000e+00> : vector<1x8x128xf32>
    %466 = tpu.matmul %464, %465, %cst_177 {dimension_numbers = #tpu.dot_dimension_numbers<[2], [1], [1], [2], [0, 0, 0, 1, 1, 2], [0], [0]>} : vector<1x8x8xbf16>, vector<1x8x128xbf16>, vector<1x8x128xf32> -> vector<1x8x128xf32>
    "tpu.trace_stop"() : () -> ()
    %467 = vector.shape_cast %466 : vector<1x8x128xf32> to vector<8x128xf32>
    %468 = vector.extract_strided_slice %417 {offsets = [0, 256], sizes = [8, 128], strides = [1, 1]} : vector<8x1536xf32> to vector<8x128xf32>
    %469 = vector.shape_cast %468 : vector<8x128xf32> to vector<1x8x128xf32>
    %470 = vector.extract_strided_slice %417 {offsets = [0, 768], sizes = [8, 128], strides = [1, 1]} : vector<8x1536xf32> to vector<8x128xf32>
    %471 = vector.shape_cast %470 : vector<8x128xf32> to vector<1x8x128xf32>
    %472 = vector.extract_strided_slice %417 {offsets = [0, 1280], sizes = [8, 128], strides = [1, 1]} : vector<8x1536xf32> to vector<8x128xf32>
    %473 = vector.shape_cast %472 : vector<8x128xf32> to vector<1x8x128xf32>
    %474 = arith.truncf %469 : vector<1x8x128xf32> to vector<1x8x128xbf16>
    %475 = arith.truncf %471 : vector<1x8x128xf32> to vector<1x8x128xbf16>
    "tpu.trace_start"() <{level = 10 : i32, message = "btd,bsd->bts"}> : () -> ()
    %cst_178 = arith.constant dense<0.000000e+00> : vector<1x8x8xf32>
    %476 = tpu.matmul %474, %475, %cst_178 {dimension_numbers = #tpu.dot_dimension_numbers<[2], [2], [1], [1], [0, 0, 0, 1, 1, 1], [0], [0]>} : vector<1x8x128xbf16>, vector<1x8x128xbf16>, vector<1x8x8xf32> -> vector<1x8x8xf32>
    %cst_179 = arith.constant -1.000000e+30 : f32
    "tpu.trace_stop"() : () -> ()
    %477 = vector.broadcast %cst_179 : f32 to vector<1x8x8xf32>
    %478 = arith.select %5, %476, %477 : vector<1x8x8xi1>, vector<1x8x8xf32>
    %cst_180 = arith.constant dense<0xFF800000> : vector<1x8xf32>
    %479 = vector.multi_reduction <maximumf>, %478, %cst_180 [2] : vector<1x8x8xf32> to vector<1x8xf32>
    %480 = vector.shape_cast %479 : vector<1x8xf32> to vector<1x8x1xf32>
    %481 = vector.broadcast %480 : vector<1x8x1xf32> to vector<1x8x8xf32>
    %482 = arith.subf %478, %481 : vector<1x8x8xf32>
    %483 = math.exp %482 : vector<1x8x8xf32>
    %cst_181 = arith.constant dense<0.000000e+00> : vector<1x8xf32>
    %484 = vector.multi_reduction <add>, %483, %cst_181 [2] : vector<1x8x8xf32> to vector<1x8xf32>
    %485 = vector.shape_cast %484 : vector<1x8xf32> to vector<1x8x1xf32>
    %486 = tpu.reciprocal %485 {approx = true} : vector<1x8x1xf32> -> vector<1x8x1xf32>
    %487 = vector.broadcast %486 : vector<1x8x1xf32> to vector<1x8x8xf32>
    %488 = arith.mulf %483, %487 : vector<1x8x8xf32>
    %489 = arith.truncf %488 : vector<1x8x8xf32> to vector<1x8x8xbf16>
    %490 = arith.truncf %473 : vector<1x8x128xf32> to vector<1x8x128xbf16>
    "tpu.trace_start"() <{level = 10 : i32, message = "bts,bsd->btd"}> : () -> ()
    %cst_182 = arith.constant dense<0.000000e+00> : vector<1x8x128xf32>
    %491 = tpu.matmul %489, %490, %cst_182 {dimension_numbers = #tpu.dot_dimension_numbers<[2], [1], [1], [2], [0, 0, 0, 1, 1, 2], [0], [0]>} : vector<1x8x8xbf16>, vector<1x8x128xbf16>, vector<1x8x128xf32> -> vector<1x8x128xf32>
    "tpu.trace_stop"() : () -> ()
    %492 = vector.shape_cast %491 : vector<1x8x128xf32> to vector<8x128xf32>
    %493 = vector.extract_strided_slice %417 {offsets = [0, 384], sizes = [8, 128], strides = [1, 1]} : vector<8x1536xf32> to vector<8x128xf32>
    %494 = vector.shape_cast %493 : vector<8x128xf32> to vector<1x8x128xf32>
    %495 = vector.extract_strided_slice %417 {offsets = [0, 896], sizes = [8, 128], strides = [1, 1]} : vector<8x1536xf32> to vector<8x128xf32>
    %496 = vector.shape_cast %495 : vector<8x128xf32> to vector<1x8x128xf32>
    %497 = vector.extract_strided_slice %417 {offsets = [0, 1408], sizes = [8, 128], strides = [1, 1]} : vector<8x1536xf32> to vector<8x128xf32>
    %498 = vector.shape_cast %497 : vector<8x128xf32> to vector<1x8x128xf32>
    %499 = arith.truncf %494 : vector<1x8x128xf32> to vector<1x8x128xbf16>
    %500 = arith.truncf %496 : vector<1x8x128xf32> to vector<1x8x128xbf16>
    "tpu.trace_start"() <{level = 10 : i32, message = "btd,bsd->bts"}> : () -> ()
    %cst_183 = arith.constant dense<0.000000e+00> : vector<1x8x8xf32>
    %501 = tpu.matmul %499, %500, %cst_183 {dimension_numbers = #tpu.dot_dimension_numbers<[2], [2], [1], [1], [0, 0, 0, 1, 1, 1], [0], [0]>} : vector<1x8x128xbf16>, vector<1x8x128xbf16>, vector<1x8x8xf32> -> vector<1x8x8xf32>
    %cst_184 = arith.constant -1.000000e+30 : f32
    "tpu.trace_stop"() : () -> ()
    %502 = vector.broadcast %cst_184 : f32 to vector<1x8x8xf32>
    %503 = arith.select %5, %501, %502 : vector<1x8x8xi1>, vector<1x8x8xf32>
    %cst_185 = arith.constant dense<0xFF800000> : vector<1x8xf32>
    %504 = vector.multi_reduction <maximumf>, %503, %cst_185 [2] : vector<1x8x8xf32> to vector<1x8xf32>
    %505 = vector.shape_cast %504 : vector<1x8xf32> to vector<1x8x1xf32>
    %506 = vector.broadcast %505 : vector<1x8x1xf32> to vector<1x8x8xf32>
    %507 = arith.subf %503, %506 : vector<1x8x8xf32>
    %508 = math.exp %507 : vector<1x8x8xf32>
    %cst_186 = arith.constant dense<0.000000e+00> : vector<1x8xf32>
    %509 = vector.multi_reduction <add>, %508, %cst_186 [2] : vector<1x8x8xf32> to vector<1x8xf32>
    %510 = vector.shape_cast %509 : vector<1x8xf32> to vector<1x8x1xf32>
    %511 = tpu.reciprocal %510 {approx = true} : vector<1x8x1xf32> -> vector<1x8x1xf32>
    %512 = vector.broadcast %511 : vector<1x8x1xf32> to vector<1x8x8xf32>
    %513 = arith.mulf %508, %512 : vector<1x8x8xf32>
    %514 = arith.truncf %513 : vector<1x8x8xf32> to vector<1x8x8xbf16>
    %515 = arith.truncf %498 : vector<1x8x128xf32> to vector<1x8x128xbf16>
    "tpu.trace_start"() <{level = 10 : i32, message = "bts,bsd->btd"}> : () -> ()
    %cst_187 = arith.constant dense<0.000000e+00> : vector<1x8x128xf32>
    %516 = tpu.matmul %514, %515, %cst_187 {dimension_numbers = #tpu.dot_dimension_numbers<[2], [1], [1], [2], [0, 0, 0, 1, 1, 2], [0], [0]>} : vector<1x8x8xbf16>, vector<1x8x128xbf16>, vector<1x8x128xf32> -> vector<1x8x128xf32>
    "tpu.trace_stop"() : () -> ()
    %517 = vector.shape_cast %516 : vector<1x8x128xf32> to vector<8x128xf32>
    %518 = tpu.concatenate %442, %467, %492, %517 in 1 : vector<8x128xf32>, vector<8x128xf32>, vector<8x128xf32>, vector<8x128xf32> -> vector<8x512xf32>
    %519 = arith.truncf %518 : vector<8x512xf32> to vector<8x512xbf16>
    %cst_188 = arith.constant dense<0.000000e+00> : vector<8x30xf32>
    %520 = tpu.matmul %519, %379, %cst_188 {dimension_numbers = #tpu.dot_dimension_numbers<[1], [0], [0], [1], [0, 0, 1, 1], [], []>} : vector<8x512xbf16>, vector<512x30xbf16>, vector<8x30xf32> -> vector<8x30xf32>
    %521 = vector.broadcast %381 : vector<1x30xf32> to vector<8x30xf32>
    %522 = arith.addf %520, %521 : vector<8x30xf32>
    %523 = arith.addf %375, %522 : vector<8x30xf32>
    %c2_189 = arith.constant 2 : index
    %c0_190 = arith.constant 0 : index
    %c0_191 = arith.constant 0 : index
    %524 = vector.load %arg7[%c2_189, %c0_190, %c0_191] : memref<3x1x30xf32, #tpu.memory_space<vmem>>, vector<1x1x30xf32>
    %525 = vector.shape_cast %524 : vector<1x1x30xf32> to vector<1x30xf32>
    %c2_192 = arith.constant 2 : index
    %c0_193 = arith.constant 0 : index
    %c0_194 = arith.constant 0 : index
    %526 = vector.load %arg8[%c2_192, %c0_193, %c0_194] : memref<3x1x30xf32, #tpu.memory_space<vmem>>, vector<1x1x30xf32>
    %527 = vector.shape_cast %526 : vector<1x1x30xf32> to vector<1x30xf32>
    %cst_195 = arith.constant dense<0.000000e+00> : vector<8xf32>
    %528 = vector.multi_reduction <add>, %523, %cst_195 [1] : vector<8x30xf32> to vector<8xf32>
    %529 = vector.shape_cast %528 : vector<8xf32> to vector<8x1xf32>
    %cst_196 = arith.constant 3.000000e+01 : f32
    %530 = vector.broadcast %cst_196 : f32 to vector<8x1xf32>
    %531 = arith.divf %529, %530 : vector<8x1xf32>
    %532 = vector.broadcast %531 : vector<8x1xf32> to vector<8x30xf32>
    %533 = arith.subf %523, %532 : vector<8x30xf32>
    %534 = arith.mulf %533, %533 : vector<8x30xf32>
    %cst_197 = arith.constant dense<0.000000e+00> : vector<8xf32>
    %535 = vector.multi_reduction <add>, %534, %cst_197 [1] : vector<8x30xf32> to vector<8xf32>
    %536 = vector.shape_cast %535 : vector<8xf32> to vector<8x1xf32>
    %cst_198 = arith.constant 3.000000e+01 : f32
    %537 = vector.broadcast %cst_198 : f32 to vector<8x1xf32>
    %538 = arith.divf %536, %537 : vector<8x1xf32>
    %539 = vector.broadcast %531 : vector<8x1xf32> to vector<8x30xf32>
    %540 = arith.subf %523, %539 : vector<8x30xf32>
    %cst_199 = arith.constant 9.99999974E-6 : f32
    %541 = vector.broadcast %cst_199 : f32 to vector<8x1xf32>
    %542 = arith.addf %538, %541 : vector<8x1xf32>
    %543 = math.rsqrt %542 : vector<8x1xf32>
    %544 = vector.broadcast %543 : vector<8x1xf32> to vector<8x30xf32>
    %545 = arith.mulf %540, %544 : vector<8x30xf32>
    %546 = vector.broadcast %525 : vector<1x30xf32> to vector<8x30xf32>
    %547 = arith.mulf %545, %546 : vector<8x30xf32>
    %548 = vector.broadcast %527 : vector<1x30xf32> to vector<8x30xf32>
    %549 = arith.addf %547, %548 : vector<8x30xf32>
    %550 = arith.truncf %549 : vector<8x30xf32> to vector<8x30xbf16>
    %cst_200 = arith.constant dense<0.000000e+00> : vector<8x120xf32>
    %551 = tpu.matmul %550, %383, %cst_200 {dimension_numbers = #tpu.dot_dimension_numbers<[1], [0], [0], [1], [0, 0, 1, 1], [], []>} : vector<8x30xbf16>, vector<30x120xbf16>, vector<8x120xf32> -> vector<8x120xf32>
    %552 = vector.broadcast %385 : vector<1x120xf32> to vector<8x120xf32>
    %553 = arith.addf %551, %552 : vector<8x120xf32>
    %cst_201 = arith.constant 0.000000e+00 : f32
    %554 = vector.broadcast %cst_201 : f32 to vector<8x120xf32>
    %555 = arith.maximumf %553, %554 : vector<8x120xf32>
    %556 = arith.truncf %555 : vector<8x120xf32> to vector<8x120xbf16>
    %cst_202 = arith.constant dense<0.000000e+00> : vector<8x30xf32>
    %557 = tpu.matmul %556, %387, %cst_202 {dimension_numbers = #tpu.dot_dimension_numbers<[1], [0], [0], [1], [0, 0, 1, 1], [], []>} : vector<8x120xbf16>, vector<120x30xbf16>, vector<8x30xf32> -> vector<8x30xf32>
    %558 = arith.addf %523, %557 : vector<8x30xf32>
    %559 = vector.broadcast %389 : vector<1x30xf32> to vector<8x30xf32>
    %560 = arith.addf %558, %559 : vector<8x30xf32>
    %c0_203 = arith.constant 0 : index
    %c0_204 = arith.constant 0 : index
    %561 = vector.load %arg13[%c0_203, %c0_204] : memref<1x30xf32, #tpu.memory_space<vmem>>, vector<1x30xf32>
    %c0_205 = arith.constant 0 : index
    %c0_206 = arith.constant 0 : index
    %562 = vector.load %arg14[%c0_205, %c0_206] : memref<1x30xf32, #tpu.memory_space<vmem>>, vector<1x30xf32>
    %cst_207 = arith.constant dense<0.000000e+00> : vector<8xf32>
    %563 = vector.multi_reduction <add>, %560, %cst_207 [1] : vector<8x30xf32> to vector<8xf32>
    %564 = vector.shape_cast %563 : vector<8xf32> to vector<8x1xf32>
    %cst_208 = arith.constant 3.000000e+01 : f32
    %565 = vector.broadcast %cst_208 : f32 to vector<8x1xf32>
    %566 = arith.divf %564, %565 : vector<8x1xf32>
    %567 = vector.broadcast %566 : vector<8x1xf32> to vector<8x30xf32>
    %568 = arith.subf %560, %567 : vector<8x30xf32>
    %569 = arith.mulf %568, %568 : vector<8x30xf32>
    %cst_209 = arith.constant dense<0.000000e+00> : vector<8xf32>
    %570 = vector.multi_reduction <add>, %569, %cst_209 [1] : vector<8x30xf32> to vector<8xf32>
    %571 = vector.shape_cast %570 : vector<8xf32> to vector<8x1xf32>
    %cst_210 = arith.constant 3.000000e+01 : f32
    %572 = vector.broadcast %cst_210 : f32 to vector<8x1xf32>
    %573 = arith.divf %571, %572 : vector<8x1xf32>
    %574 = vector.broadcast %566 : vector<8x1xf32> to vector<8x30xf32>
    %575 = arith.subf %560, %574 : vector<8x30xf32>
    %cst_211 = arith.constant 9.99999974E-6 : f32
    %576 = vector.broadcast %cst_211 : f32 to vector<8x1xf32>
    %577 = arith.addf %573, %576 : vector<8x1xf32>
    %578 = math.rsqrt %577 : vector<8x1xf32>
    %579 = vector.broadcast %578 : vector<8x1xf32> to vector<8x30xf32>
    %580 = arith.mulf %575, %579 : vector<8x30xf32>
    %581 = vector.broadcast %561 : vector<1x30xf32> to vector<8x30xf32>
    %582 = arith.mulf %580, %581 : vector<8x30xf32>
    %583 = vector.broadcast %562 : vector<1x30xf32> to vector<8x30xf32>
    %584 = arith.addf %582, %583 : vector<8x30xf32>
    %585 = arith.truncf %584 : vector<8x30xf32> to vector<8x30xbf16>
    %c0_212 = arith.constant 0 : index
    %c0_213 = arith.constant 0 : index
    %586 = vector.load %arg15[%c0_212, %c0_213] : memref<30x128xbf16, #tpu.memory_space<vmem>>, vector<30x128xbf16>
    %cst_214 = arith.constant dense<0.000000e+00> : vector<8x128xf32>
    %587 = tpu.matmul %585, %586, %cst_214 {dimension_numbers = #tpu.dot_dimension_numbers<[1], [0], [0], [1], [0, 0, 1, 1], [], []>} : vector<8x30xbf16>, vector<30x128xbf16>, vector<8x128xf32> -> vector<8x128xf32>
    %c0_215 = arith.constant 0 : index
    %c0_216 = arith.constant 0 : index
    %588 = vector.load %arg16[%c0_215, %c0_216] : memref<1x128xf32, #tpu.memory_space<vmem>>, vector<1x128xf32>
    %589 = vector.broadcast %588 : vector<1x128xf32> to vector<8x128xf32>
    %590 = arith.addf %587, %589 : vector<8x128xf32>
    %591 = vector.shape_cast %590 : vector<8x128xf32> to vector<1x8x128xf32>
    %c0_217 = arith.constant 0 : index
    %c0_218 = arith.constant 0 : index
    %c0_219 = arith.constant 0 : index
    %592 = vector.load %arg17[%c0_217, %c0_218, %c0_219] : memref<1x8x128xf32, #tpu.memory_space<vmem>>, vector<1x8x128xf32>
    tpu.vector_store %arg17[%c0_217, %c0_218, %c0_219], %591 {strides = array<i32>} : memref<1x8x128xf32, #tpu.memory_space<vmem>>, vector<1x8x128xf32>,
    return
  }
  func.func @transform_0(%arg0: i32) -> (i32, i32, i32) {
    %c0_i32 = arith.constant 0 : i32
    %c0_i32_0 = arith.constant 0 : i32
    %c0_i32_1 = arith.constant 0 : i32
    return %arg0, %c0_i32, %c0_i32_0 : i32, i32, i32
  }
  func.func @transform_1(%arg0: i32) -> (i32, i32, i32) {
    %c0_i32 = arith.constant 0 : i32
    %c0_i32_0 = arith.constant 0 : i32
    %c0_i32_1 = arith.constant 0 : i32
    %c0_i32_2 = arith.constant 0 : i32
    return %c0_i32, %c0_i32_0, %c0_i32_1 : i32, i32, i32
  }
  func.func @transform_2(%arg0: i32) -> (i32, i32, i32) {
    %c0_i32 = arith.constant 0 : i32
    %c0_i32_0 = arith.constant 0 : i32
    %c0_i32_1 = arith.constant 0 : i32
    %c0_i32_2 = arith.constant 0 : i32
    return %c0_i32, %c0_i32_0, %c0_i32_1 : i32, i32, i32
  }
  func.func @transform_3(%arg0: i32) -> (i32, i32, i32) {
    %c0_i32 = arith.constant 0 : i32
    %c0_i32_0 = arith.constant 0 : i32
    %c0_i32_1 = arith.constant 0 : i32
    %c0_i32_2 = arith.constant 0 : i32
    return %c0_i32, %c0_i32_0, %c0_i32_1 : i32, i32, i32
  }
  func.func @transform_4(%arg0: i32) -> (i32, i32, i32) {
    %c0_i32 = arith.constant 0 : i32
    %c0_i32_0 = arith.constant 0 : i32
    %c0_i32_1 = arith.constant 0 : i32
    %c0_i32_2 = arith.constant 0 : i32
    return %c0_i32, %c0_i32_0, %c0_i32_1 : i32, i32, i32
  }
  func.func @transform_5(%arg0: i32) -> (i32, i32, i32) {
    %c0_i32 = arith.constant 0 : i32
    %c0_i32_0 = arith.constant 0 : i32
    %c0_i32_1 = arith.constant 0 : i32
    %c0_i32_2 = arith.constant 0 : i32
    return %c0_i32, %c0_i32_0, %c0_i32_1 : i32, i32, i32
  }
  func.func @transform_6(%arg0: i32) -> (i32, i32, i32) {
    %c0_i32 = arith.constant 0 : i32
    %c0_i32_0 = arith.constant 0 : i32
    %c0_i32_1 = arith.constant 0 : i32
    %c0_i32_2 = arith.constant 0 : i32
    return %c0_i32, %c0_i32_0, %c0_i32_1 : i32, i32, i32
  }
  func.func @transform_7(%arg0: i32) -> (i32, i32, i32) {
    %c0_i32 = arith.constant 0 : i32
    %c0_i32_0 = arith.constant 0 : i32
    %c0_i32_1 = arith.constant 0 : i32
    %c0_i32_2 = arith.constant 0 : i32
    return %c0_i32, %c0_i32_0, %c0_i32_1 : i32, i32, i32
  }
  func.func @transform_8(%arg0: i32) -> (i32, i32, i32) {
    %c0_i32 = arith.constant 0 : i32
    %c0_i32_0 = arith.constant 0 : i32
    %c0_i32_1 = arith.constant 0 : i32
    %c0_i32_2 = arith.constant 0 : i32
    return %c0_i32, %c0_i32_0, %c0_i32_1 : i32, i32, i32
  }
  func.func @transform_9(%arg0: i32) -> (i32, i32, i32) {
    %c0_i32 = arith.constant 0 : i32
    %c0_i32_0 = arith.constant 0 : i32
    %c0_i32_1 = arith.constant 0 : i32
    %c0_i32_2 = arith.constant 0 : i32
    return %c0_i32, %c0_i32_0, %c0_i32_1 : i32, i32, i32
  }
  func.func @transform_10(%arg0: i32) -> (i32, i32, i32) {
    %c0_i32 = arith.constant 0 : i32
    %c0_i32_0 = arith.constant 0 : i32
    %c0_i32_1 = arith.constant 0 : i32
    %c0_i32_2 = arith.constant 0 : i32
    return %c0_i32, %c0_i32_0, %c0_i32_1 : i32, i32, i32
  }
  func.func @transform_11(%arg0: i32) -> (i32, i32, i32) {
    %c0_i32 = arith.constant 0 : i32
    %c0_i32_0 = arith.constant 0 : i32
    %c0_i32_1 = arith.constant 0 : i32
    %c0_i32_2 = arith.constant 0 : i32
    return %c0_i32, %c0_i32_0, %c0_i32_1 : i32, i32, i32
  }
  func.func @transform_12(%arg0: i32) -> (i32, i32) {
    %c0_i32 = arith.constant 0 : i32
    %c0_i32_0 = arith.constant 0 : i32
    %c0_i32_1 = arith.constant 0 : i32
    return %c0_i32, %c0_i32_0 : i32, i32
  }
  func.func @transform_13(%arg0: i32) -> (i32, i32) {
    %c0_i32 = arith.constant 0 : i32
    %c0_i32_0 = arith.constant 0 : i32
    %c0_i32_1 = arith.constant 0 : i32
    return %c0_i32, %c0_i32_0 : i32, i32
  }
  func.func @transform_14(%arg0: i32) -> (i32, i32) {
    %c0_i32 = arith.constant 0 : i32
    %c0_i32_0 = arith.constant 0 : i32
    %c0_i32_1 = arith.constant 0 : i32
    return %c0_i32, %c0_i32_0 : i32, i32
  }
  func.func @transform_15(%arg0: i32) -> (i32, i32) {
    %c0_i32 = arith.constant 0 : i32
    %c0_i32_0 = arith.constant 0 : i32
    %c0_i32_1 = arith.constant 0 : i32
    return %c0_i32, %c0_i32_0 : i32, i32
  }
  func.func @transform_16(%arg0: i32) -> (i32, i32, i32) {
    %c0_i32 = arith.constant 0 : i32
    %c0_i32_0 = arith.constant 0 : i32
    %c0_i32_1 = arith.constant 0 : i32
    return %arg0, %c0_i32, %c0_i32_0 : i32, i32, i32
  }
}

</mosaic_0001>

<bundles_post_ra>
// kernel: decoder_forward.1
= control target key start
LH: loop header
LB: loop body
LE: loop exit
PB: predicated region body
PF: predicated region fallthrough
CT: control target
= control target key end

     0   :  { %s7572_s0 = inlined_call_operand.vmem [shape: f32[2,8,30], index: 0, kind: input, shape index: {}]   ;;  %s7573_s1 = inlined_call_operand.vmem [shape: bf16[3,30,1536], index: 1, kind: input, shape index: {}]   ;;  %s7574_s2 = inlined_call_operand.vmem [shape: bf16[3,512,30], index: 2, kind: input, shape index: {}]   ;;  %s7575_s3 = inlined_call_operand.vmem [shape: f32[3,1,30], index: 3, kind: input, shape index: {}]   ;;  %s7576_s4 = inlined_call_operand.vmem [shape: f32[3,1,30], index: 4, kind: input, shape index: {}]   ;;  %s7577_s5 = inlined_call_operand.vmem [shape: f32[3,1,30], index: 5, kind: input, shape index: {}]   ;;  %s7578_s6 = inlined_call_operand.vmem [shape: f32[3,1,30], index: 6, kind: input, shape index: {}]   ;;  %s7579_s7 = inlined_call_operand.vmem [shape: f32[3,1,30], index: 7, kind: input, shape index: {}]   ;;  %s7580_s8 = inlined_call_operand.vmem [shape: bf16[3,30,120], index: 8, kind: input, shape index: {}]   ;;  %s7581_s9 = inlined_call_operand.vmem [shape: f32[3,1,120], index: 9, kind: input, shape index: {}]   ;;  %s7582_s10 = inlined_call_operand.vmem [shape: bf16[3,120,30], index: 10, kind: input, shape index: {}]   ;;  %s7583_s11 = inlined_call_operand.vmem [shape: f32[3,1,30], index: 11, kind: input, shape index: {}]   ;;  %s7584_s12 = inlined_call_operand.vmem [shape: f32[1,30], index: 12, kind: input, shape index: {}]   ;;  %s7585_s13 = inlined_call_operand.vmem [shape: f32[1,30], index: 13, kind: input, shape index: {}]   ;;  %s7586_s14 = inlined_call_operand.vmem [shape: bf16[30,128], index: 14, kind: input, shape index: {}]   ;;  %s7587_s15 = inlined_call_operand.vmem [shape: f32[1,128], index: 15, kind: input, shape index: {}]   ;;  %s7588_s16 = inlined_call_operand.hbm [shape: f32[2,8,128], index: 16, kind: output, shape index: {}]  }
   0x1   :  { %7594 = sst [smem:[#allocation10_spill]] %s7572_s0 }
   0x2   :  { %21 = vsyncpa [#allocation3], 0 }
   0x3   :  { %23 = vsyncpa [#allocation3 + $0x1], 0  ;;  %s6442_s21 = smov 0   ;;  %s6444_s22 = smov 0  }
   0x4   :  { %s6446_s23 = smov 0   ;;  %s6448_s24 = smov 0  }
   0x5 LB: > { %7595 = sst [smem:[#allocation5_spill]] %s6339_s21  ;;  %s6463_s25 = sadd.s32 4294967295, %s6351_s24   ;;  %s6351_s24 = sphi %s6448_s24, %s7607_s24   ;;  %s6347_s23 = sphi %s6446_s23, %s7609_s23   ;;  %s6343_s22 = sphi %s6444_s22, %s7611_s22   ;;  %s6339_s21 = sphi %s6442_s21, %s7610_s21  }
   0x6   : > { %7596 = sst [smem:[#allocation6_spill]] %s6347_s23  ;;  %s4978_s26 = sadd.s32 4294967294, %s6351_s24  }
   0x7   : > { %s6467_s27 = sadd.s32 1, %s6351_s24   ;;  %s377_s28 = sadd.s32 1, %s6347_s23 }
   0x8   : > { %7597 = sst [smem:[#allocation7_spill]] %s6467_s27  ;;  %s374_s29 = ssub.s32 %s6351_s24, %s6467_s27 }
   0x9   : > { %p387_p0 = scmp.ne.s32.totalorder %s6347_s23, %s6343_s22  ;;  %p375_p1 = scmp.eq.s32.totalorder %s374_s29, 0 }
   0xa   : > { %p388_p2 = scmp.eq.s32.totalorder %s6463_s25, 1  ;;  %p393_p3 = scmp.ne.s32.totalorder %s6343_s22, %s6339_s21 }
   0xb   : > { %p394_p4 = scmp.eq.s32.totalorder %s4978_s26, 1  ;;  %p4981_p7 = scmp.ge.s32.totalorder %s6351_s24, 1 }
   0xc   : > { %s6478_s30 = scalar_select %p375_p1, %s6347_s23, %s377_s28  }
   0xd   : > { %p6480_p5 = por %p388_p2, %p387_p0  ;;  %p6484_p6 = por %p394_p4, %p393_p3 }
   0xe   : > { %7598 = sst [smem:[#allocation8_spill]] %s6478_s30  ;;  %p464_p8 = scmp.lt.s32.totalorder %s6351_s24, 3 }
   0xf   : > { %s7600_s17 = scalar_select %p6484_p6, 1, 0 }
  0x10   : > { %p465_p9 = pnand %p4981_p7, %p464_p8 }
  0x11   : > { %7601 = sst [smem:[#allocation9_spill]] %s7600_s17  ;;  %p513_p10 = scmp.lt.s32.totalorder (!%p465_p9), %s6463_s25, 1 }
  0x12   : > { %468 = sbr.rel (%p465_p9) target bundleno = 7036 (0x1b7c), region = 84  ;;  %s7602_s28 = sld [smem:[#allocation10_spill]] (!%p465_p9) }
  0x13   : > { %s510_s23 = sand.u32 (!%p465_p9), 1, %s6343_s22  }
  0x14   : > { %s4982_s30 = sshll.u32 (!%p465_p9), %s510_s23, 3 }
  0x15   : > { %s512_s21 = scalar_lea.vmem (!%p465_p9), [#allocation2], %s4982_s30 }
  0x16   : > { %s4919_s17 = sshll.u32 (!%p465_p9), %s512_s21, 4  ;;  %s7533_s17 = int_to_ptr.vmem [resolvable:$true] %s4919_s17 }
  0x17   : > { %s514_s18 = scalar_select %p513_p10, %s6463_s25, 1  ;;  %vm636_vm0 = vcmask 244736   ;;  %v5992_v7 = vld [vmem:[%s7573_s1 + $0x64] ss:$48 sps:$4 sm:$0x7f]   ;;  %vm777_vm1 = vcmask 1046528  }
  0x18   : > { %v5994_v8 = vld [vmem:[%s7573_s1 + $0x7c] ss:$48 sps:$4 sm:$0x7f]   ;;  %v5996_v9 = vld [vmem:[%s7573_s1 + $0x60] ss:$48 sps:$4 sm:$0x7f]   ;;  %5010 = vmatprep.subr.msk.bf16.mxu0 %vm777_vm1, %v5992_v7 }
  0x19   : > { %s4983_s19 = sshll.u32 %s514_s18, 3  ;;  %5016 = vmatprep.subr.msk.bf16.mxu1 %vm777_vm1, %v5994_v8  ;;  %v5997_v10 = vld [vmem:[%s7573_s1 + $0x78] ss:$48 sps:$4 sm:$0x7f]   ;;  %v779_v11 = vsel %vm777_vm1, %v5996_v9, 0  ;;  %v6353_v17 = vmov 0  }
  0x1a   : > { %s6495_s29 = scalar_lea.vmem %s7602_s28, %s4983_s19  ;;  %827 = vmatpush1.bf16.msra.mxu0 %v779_v11  ;;  %v797_v12 = vsel %vm777_vm1, %v5997_v10, 0  ;;  %v5998_v13 = vld [vmem:[%s7573_s1 + $0x4] ss:$48 sps:$4 sm:$0xff]   ;;  %v6000_v14 = vld [vmem:[%s7573_s1 + $0x1c] ss:$48 sps:$4 sm:$0xff]   ;;  %846 = vmatprep.mubr.bf16.mxu0 %v6353_v17  ;;  %v6354_v48 = vmov 0.0  }
  0x1b   : > { %v518_v0 = vld [vmem:[%s6495_s29] sm:$0xff]  ;;  %950 = vmatpush1.bf16.msra.mxu1 %v797_v12  ;;  %v6003_v16 = vld [vmem:[%s7573_s1 + $0x18] ss:$48 sps:$4 sm:$0xff]   ;;  %828 = vmatprep.subr.bf16.mxu0 %v5998_v13  ;;  %v6004_v18 = vld [vmem:[%s7573_s1 + $0x6c] ss:$48 sps:$4 sm:$0x7f]  }
  0x1c   : > { %v637_v1 = vsel %vm636_vm0, %v518_v0, 0.0  ;;  %v6002_v15 = vld [vmem:[%s7573_s1] ss:$48 sps:$4 sm:$0xff]   ;;  %951 = vmatprep.subr.bf16.mxu1 %v6000_v14  ;;  %969 = vmatprep.mubr.bf16.mxu1 %v6353_v17  ;;  %v6006_v19 = vld [vmem:[%s7573_s1 + $0x8c] ss:$48 sps:$4 sm:$0x7f]  }
  0x1d   : > { %638 = vadd.xlane.f32.xlu0 %v637_v1  ;;  %v4984_v24 = vld [vmem:[%s7576_s4] ss:$0 sm:$0xff]  ;;  %v6008_v28 = vld [vmem:[%s7573_s1 + $0x68] ss:$48 sps:$4 sm:$0x7f]   ;;  %vm6355_vm2 = vmmov 0  }
  0x1e   : > { %829 = vmatpush1.bf16.msra.mxu0 %v6002_v15  ;;  %v4985_v26 = vld [vmem:[%s7577_s5] ss:$0 sm:$0xff]  ;;  %v6009_v29 = vld [vmem:[%s7573_s1 + $0x88] ss:$48 sps:$4 sm:$0x7f]   ;;  %v785_v32 = vsel %vm777_vm1, %v6008_v28, 0 }
  0x1f   : > { %952 = vmatpush1.bf16.msra.mxu1 %v6003_v16  ;;  %5012 = vmatprep.subr.msk.bf16.mxu0 %vm777_vm1, %v6004_v18  ;;  %v809_v33 = vsel %vm777_vm1, %v6009_v29, 0  ;;  %v6012_v34 = vld [vmem:[%s7573_s1 + $0xc] ss:$48 sps:$4 sm:$0xff]   ;;  %v6010_v36 = vld [vmem:[%s7573_s1 + $0x8] ss:$48 sps:$4 sm:$0xff]   ;;  %vm1120_vm3 = vcmask 1043456  }
  0x20   : > { %5020 = vmatprep.subr.msk.bf16.mxu1 %vm777_vm1, %v6006_v19  ;;  %v6015_v35 = vld [vmem:[%s7573_s1 + $0x2c] ss:$48 sps:$4 sm:$0xff]   ;;  %v6013_v37 = vld [vmem:[%s7573_s1 + $0x28] ss:$48 sps:$4 sm:$0xff]   ;;  %v6021_v41 = vld [vmem:[%s7573_s1 + $0x14] ss:$48 sps:$4 sm:$0xff]  }
  0x21   : > { %v6016_v38 = vld [vmem:[%s7573_s1 + $0x74] ss:$48 sps:$4 sm:$0x7f]   ;;  %v6018_v39 = vld [vmem:[%s7573_s1 + $0x70] ss:$48 sps:$4 sm:$0x7f]  }
  0x22   : > { %v791_v40 = vsel %vm777_vm1, %v6018_v39, 0  ;;  %v6019_v42 = vld [vmem:[%s7573_s1 + $0x10] ss:$48 sps:$4 sm:$0xff]   ;;  %v6022_v43 = vld [vmem:[%s7573_s1 + $0x84] ss:$48 sps:$4 sm:$0x7f]  }
  0x23   : > { %v6024_v44 = vld [vmem:[%s7573_s1 + $0x80] ss:$48 sps:$4 sm:$0x7f]   ;;  %v6027_v46 = vld [vmem:[%s7573_s1 + $0x24] ss:$48 sps:$4 sm:$0xff]   ;;  %vm1103_vm5 = vcmask 64512  }
  0x24   : > { %v803_v45 = vsel %vm777_vm1, %v6024_v44, 0  ;;  %v6025_v47 = vld [vmem:[%s7573_s1 + $0x20] ss:$48 sps:$4 sm:$0xff]   ;;  %vm1893_vm6 = vcmask 982016   ;;  %s4906_s28 = scalar_lea.sflag [#allocation3], %s510_s23  ;;  %s6291_s18 = scalar_lea.vmem %s7533_s17, 128 }
  0x25   : > { %p6292_p11 = scmp.ne.s32.totalorder %s7533_s17, %s6291_s18 }
  0x27   : > { %p6293_p12 = pnand %p6292_p11, %p6480_p5 }
  0x29   : > { %p6294_p13 = pneg %p6293_p12 }
  0xa6   : > { %v639_v2 = vpop.xlane.xlu0 %638 }
  0xa7   : > { %v641_v3 = vmul.f32 0.033333335, %v639_v2 }
  0xa9   : > { %v642_v4 = vsub.f32 %v518_v0, %v641_v3 }
  0xab   : > { %v643_v5 = vmul.f32 %v642_v4, %v642_v4 }
  0xad   : > { %v644_v6 = vsel %vm636_vm0, %v643_v5, 0.0 }
  0xae   : > { %645 = vadd.xlane.f32.xlu0 %v644_v6 }
 0x137   : > { %v646_v20 = vpop.xlane.xlu0 %645 }
 0x138   : > { %v647_v21 = vmul.f32 0.033333335, %v646_v20  ;;  %v519_v20 = vlaneseq }
 0x13a   : > { %v648_v22 = vadd.f32 1e-05, %v647_v21  ;;  %v520_v21 = vshrl.u32 %v519_v20, 7 }
 0x13c   : > { %6228 = vrsqrt.f32 %v648_v22  ;;  %v522_v22 = vand.u32 127, %v519_v20 }
 0x13e   : > { %vm6625_vm4 = vcmp.ge.s32.totalorder %v520_v21, %v522_v22 }
 0x149   : > { %v6229_v23 = vpop.eup %6228 }
 0x14a   : > { %v650_v25 = vmul.f32 %v6229_v23, %v642_v4 }
 0x14c   : > { %v657_v27 = vmul.f32 %v4984_v24, %v650_v25 }
 0x14e   : > { %v664_v30 = vadd.f32 %v4985_v26, %v657_v27 }
 0x150   : > { %v665_v31 = vpack.c.bf16 %v664_v30, %v664_v30 }
 0x152   : > { %5011 = vmatmul.mubr.msk.bf16.vlgmr.msra.gmra.mxu0 %vm636_vm0, %v665_v31  ;;  %5017 = vmatmul.mubr.msk.bf16.vlgmr.msra.gmra.mxu1 %vm636_vm0, %v665_v31 }
 0x153   : > { %868 = vmatpush1.bf16.msra.mxu0 %v785_v32  ;;  %1032 = vmatpush1.bf16.msra.mxu1 %v809_v33 }
 0x154   : > { %869 = vmatprep.subr.bf16.mxu0 %v6012_v34  ;;  %1033 = vmatprep.subr.bf16.mxu1 %v6015_v35 }
 0x155   : > { %887 = vmatprep.mubr.bf16.mxu0 %v6353_v17  ;;  %1051 = vmatprep.mubr.bf16.mxu1 %v6353_v17 }
 0x157   : > { %870 = vmatpush1.bf16.msra.mxu0 %v6010_v36  ;;  %1034 = vmatpush1.bf16.msra.mxu1 %v6013_v37 }
 0x158   : > { %5014 = vmatprep.subr.msk.bf16.mxu0 %vm777_vm1, %v6016_v38  ;;  %5720 = vmatprep.subr.bf16.mxu1 %v6354_v48 }
 0x15a   : > { %5013 = vmatmul.mubr.msk.bf16.vlgmr.msra.gmra.mxu0 %vm636_vm0, %v665_v31  ;;  %5021 = vmatmul.mubr.msk.bf16.vlgmr.msra.gmra.mxu1 %vm636_vm0, %v665_v31 }
 0x15b   : > { %909 = vmatpush1.bf16.msra.mxu0 %v791_v40  ;;  %928 = vmatprep.mubr.bf16.mxu0 %v6353_v17 }
 0x15c   : > { %910 = vmatprep.subr.bf16.mxu0 %v6021_v41  ;;  %5722 = vmatprep.mubr.msk.bf16.mxu1 %vm6355_vm2, %v6354_v48 }
 0x15f   : > { %911 = vmatpush1.bf16.msra.mxu0 %v6019_v42 }
 0x160   : > { %5018 = vmatprep.subr.msk.bf16.mxu0 %vm777_vm1, %v6022_v43 }
 0x162   : > { %5015 = vmatmul.mubr.msk.bf16.vlgmr.msra.gmra.mxu0 %vm636_vm0, %v665_v31 }
 0x163   : > { %991 = vmatpush1.bf16.msra.mxu0 %v803_v45  ;;  %1010 = vmatprep.mubr.bf16.mxu0 %v6353_v17 }
 0x164   : > { %992 = vmatprep.subr.bf16.mxu0 %v6027_v46 }
 0x167   : > { %993 = vmatpush1.bf16.msra.mxu0 %v6025_v47 }
 0x168   : > { %5714 = vmatprep.subr.bf16.mxu0 %v6354_v48 }
 0x16a   : > { %5019 = vmatmul.mubr.msk.bf16.vlgmr.msra.gmra.mxu0 %vm636_vm0, %v665_v31 }
 0x16b   : > { %5716 = vmatprep.mubr.msk.bf16.mxu0 %vm6355_vm2, %v6354_v48 }
 0x212   : > { %v848_v49 = vpop.f32.mrf.mxu0  ;;  %v971_v50 = vpop.f32.mrf.mxu1 }
 0x213   : > { %v1060_v6 = vpack.c.bf16 %v848_v49, %v848_v49  ;;  %v1267_v15 = vpack.c.bf16 %v971_v50, %v971_v50 }
 0x214   : > { %v850_v51 = vpop.f32.mrf.mxu0  ;;  %v973_v52 = vpop.f32.mrf.mxu1 }
 0x215   : > { %v1164_v14 = vpack.c.bf16 %v850_v51, %v850_v51  ;;  %v1369_v18 = vpack.c.bf16 %v973_v52, %v973_v52 }
 0x216   : > { %v852_v53 = vpop.f32.mrf.mxu0  ;;  %v975_v54 = vpop.f32.mrf.mxu1 }
 0x218   : > { %v853_v55 = vpop.f32.mrf.mxu0  ;;  %v976_v56 = vpop.f32.mrf.mxu1 }
 0x21a   : > { %v889_v57 = vpop.f32.mrf.mxu0  ;;  %v6608_v58 = vpop.f32.mrf.mxu1 }
 0x21b   : > { %v1266_v16 = vpack.c.bf16 %v889_v57, %v889_v57 }
 0x21c   : > { %v891_v59 = vpop.f32.mrf.mxu0  ;;  %v6610_v60 = vpop.f32.mrf.mxu1 }
 0x21d   : > { %v1368_v19 = vpack.c.bf16 %v891_v59, %v891_v59 }
 0x21e   : > { %v893_v61 = vpop.f32.mrf.mxu0  ;;  %v1057_v62 = vpop.f32.mrf.mxu1 }
 0x220   : > { %v894_v63 = vpop.f32.mrf.mxu0  ;;  %v1058_v0 = vpop.f32.mrf.mxu1 }
 0x222   : > { %v930_v1 = vpop.f32.mrf.mxu0 }
 0x223   : > { %v1061_v2 = vpack.c.bf16 %v930_v1, %v930_v1 }
 0x224   : > { %v932_v3 = vpop.f32.mrf.mxu0 }
 0x225   : > { %5715 = vmatpush3.bf16.xpose.msra.mxu0 %v1061_v2  ;;  %v1165_v8 = vpack.c.bf16 %v932_v3, %v932_v3 }
 0x226   : > { %v934_v4 = vpop.f32.mrf.mxu0  ;;  %5726 = vmatprep.subr.bf16.mxu0 %v6354_v48 }
 0x228   : > { %v935_v5 = vpop.f32.mrf.mxu0 }
 0x22a   : > { %v1012_v7 = vpop.f32.mrf.mxu0 }
 0x22b   : > { %v1116_v9 = vpack.c.bf16 %v1012_v7, %v1012_v7  ;;  %v6028_v7 = vld [vmem:[%s7574_s2 + $0x78] sm:$0xff]  }
 0x22c   : > { %v6613_v10 = vpop.f32.mrf.mxu0  ;;  %5717 = vmatmul.mubr.bf16.vlgmr.msra.gmra.mxu0 %v1060_v6 }
 0x22d   : > { %v1122_v11 = vsel %vm1120_vm3, %v1116_v9, 0  ;;  %5727 = vmatpush3.bf16.xpose.msra.mxu0 %v1165_v8  ;;  %5728 = vmatprep.mubr.msk.bf16.mxu0 %vm6355_vm2, %v6354_v48  ;;  %v6029_v8 = vld [vmem:[%s7574_s2 + $0x38] sm:$0xff]   ;;  %v6030_v9 = vld [vmem:[%s7574_s2 + $0x70] sm:$0xff]   ;;  %v1219_v22 = vpack.c.bf16 %v6613_v10, %v6613_v10 }
 0x22e   : > { %v1016_v12 = vpop.f32.mrf.mxu0  ;;  %5721 = vmatpush3.bf16.msra.mxu1 %v1122_v11  ;;  %5738 = vmatprep.subr.bf16.mxu0 %v6354_v48  ;;  %v6031_v11 = vld [vmem:[%s7574_s2 + $0x30] sm:$0xff]  }
 0x22f   : > { %5732 = vmatprep.subr.bf16.mxu1 %v6354_v48  ;;  %v6032_v12 = vld [vmem:[%s7574_s2 + $0x68] sm:$0xff]  }
 0x230   : > { %v1017_v13 = vpop.f32.mrf.mxu0 }
 0x231   : > { %v6033_v13 = vld [vmem:[%s7574_s2 + $0x28] sm:$0xff]  }
 0x234   : > { %5729 = vmatmul.mubr.bf16.vlgmr.msra.gmra.mxu0 %v1164_v14  ;;  %v6034_v14 = vld [vmem:[%s7574_s2 + $0x60] sm:$0xff]  }
 0x235   : > { %5739 = vmatpush3.bf16.xpose.msra.mxu0 %v1267_v15  ;;  %5740 = vmatprep.mubr.msk.bf16.mxu0 %vm6355_vm2, %v6354_v48  ;;  %v6035_v15 = vld [vmem:[%s7574_s2 + $0x20] sm:$0xff]  }
 0x236   : > { %5750 = vmatprep.subr.bf16.mxu0 %v6354_v48 }
 0x23c   : > { %5741 = vmatmul.mubr.bf16.vlgmr.msra.gmra.mxu0 %v1266_v16  ;;  %v6036_v16 = vld [vmem:[%s7574_s2 + $0x58] sm:$0xff]  }
 0x23d   : > { %5751 = vmatpush3.bf16.xpose.msra.mxu0 %v1369_v18  ;;  %5752 = vmatprep.mubr.msk.bf16.mxu0 %vm6355_vm2, %v6354_v48  ;;  %v6038_v18 = vld [vmem:[%s7574_s2 + $0x18] sm:$0xff]  }
 0x23e   : > { %5511 = vmatprep.subr.bf16.mxu0 %v6028_v7 }
 0x244   : > { %5753 = vmatmul.mubr.bf16.vlgmr.msra.gmra.mxu0 %v1368_v19 }
 0x245   : > { %5512 = vmatpush3.bf16.msra.mxu0 %v6029_v8 }
 0x246   : > { %5513 = vmatprep.subr.bf16.mxu0 %v6030_v9 }
 0x249   : > { %5514 = vmatpush3.bf16.msra.mxu0 %v6031_v11 }
 0x24a   : > { %5515 = vmatprep.subr.bf16.mxu0 %v6032_v12 }
 0x24d   : > { %5516 = vmatpush3.bf16.msra.mxu0 %v6033_v13 }
 0x24e   : > { %5517 = vmatprep.subr.bf16.mxu0 %v6034_v14 }
 0x251   : > { %5518 = vmatpush3.bf16.msra.mxu0 %v6035_v15 }
 0x252   : > { %5519 = vmatprep.subr.bf16.mxu0 %v6036_v16 }
 0x255   : > { %5520 = vmatpush3.bf16.msra.mxu0 %v6038_v18 }
 0x2ec   : > { %v1096_v24 = vpop.f32.mrf.mxu0 }
 0x2ed   : > { %v1102_v25 = vsel %vm6625_vm4, %v1096_v24, -1e+30 }
 0x2ee   : > { %v5718_v26 = vpop.f32.mrf.mxu0  ;;  %v1104_v27 = vsel %vm1103_vm5, %v1102_v25, -inf }
 0x2ef   : > { %1105 = vmax.xlane.f32.xlu1 %v1104_v27  ;;  %v1224_v27 = vsel %vm1120_vm3, %v1219_v22, 0 }
 0x2f0   : > { %v1099_v28 = vpop.f32.mrf.mxu0 }
 0x2f2   : > { %v5719_v29 = vpop.f32.mrf.mxu0 }
 0x2f3   : > { %v1321_v29 = vpack.c.bf16 %v6608_v58, %v6608_v58 }
 0x2f4   : > { %v1200_v30 = vpop.f32.mrf.mxu0 }
 0x2f5   : > { %v1206_v31 = vsel %vm6625_vm4, %v1200_v30, -1e+30 }
 0x2f6   : > { %v5730_v32 = vpop.f32.mrf.mxu0  ;;  %v1207_v33 = vsel %vm1103_vm5, %v1206_v31, -inf }
 0x2f7   : > { %1208 = vmax.xlane.f32.xlu1 %v1207_v33  ;;  %v1326_v32 = vsel %vm1120_vm3, %v1321_v29, 0 }
 0x2f8   : > { %v1203_v34 = vpop.f32.mrf.mxu0 }
 0x2f9   : > { %v1423_v34 = vpack.c.bf16 %v6610_v60, %v6610_v60  ;;  %v6039_v60 = vld [vmem:[%s7574_s2 + $0xb8] sm:$0xff]  }
 0x2fa   : > { %v5731_v35 = vpop.f32.mrf.mxu0 }
 0x2fc   : > { %v1302_v36 = vpop.f32.mrf.mxu0 }
 0x2fd   : > { %v1308_v37 = vsel %vm6625_vm4, %v1302_v36, -1e+30  ;;  %v6037_v36 = vld [vmem:[%s7574_s2 + $0xf8] sm:$0xff]  }
 0x2fe   : > { %v5742_v38 = vpop.f32.mrf.mxu0  ;;  %v1309_v39 = vsel %vm1103_vm5, %v1308_v37, -inf }
 0x2ff   : > { %1310 = vmax.xlane.f32.xlu0 %v1309_v39 }
 0x300   : > { %v1305_v40 = vpop.f32.mrf.mxu0 }
 0x302   : > { %v5743_v41 = vpop.f32.mrf.mxu0 }
 0x303   : > { %v6040_v41 = vld [vmem:[%s7574_s2 + $0x50] sm:$0xff]  }
 0x304   : > { %v1404_v42 = vpop.f32.mrf.mxu0  ;;  %5521 = vmatprep.subr.bf16.mxu0 %v6040_v41  ;;  %v6060_v41 = vld [vmem:[%s7580_s8 + $0x8] sm:$0x7f]  }
 0x305   : > { %v1410_v43 = vsel %vm6625_vm4, %v1404_v42, -1e+30  ;;  %v6041_v42 = vld [vmem:[%s7574_s2 + $0xf0] sm:$0xff]  }
 0x306   : > { %v5754_v44 = vpop.f32.mrf.mxu0  ;;  %v1411_v45 = vsel %vm1103_vm5, %v1410_v43, -inf }
 0x307   : > { %1412 = vmax.xlane.f32.xlu1 %v1411_v45  ;;  %v6043_v44 = vld [vmem:[%s7574_s2 + $0xb0] sm:$0xff]   ;;  %v6044_v45 = vld [vmem:[%s7574_s2 + $0x48] sm:$0xff]  }
 0x308   : > { %v1407_v46 = vpop.f32.mrf.mxu0 }
 0x309   : > { %v6045_v46 = vld [vmem:[%s7574_s2 + $0xe8] sm:$0xff]  }
 0x30a   : > { %v5755_v47 = vpop.f32.mrf.mxu0 }
 0x30b   : > { %v6046_v47 = vld [vmem:[%s7574_s2 + $0x8] sm:$0xff]  }
 0x378   : > { %v1106_v49 = vpop.xlane.xlu1 %1105 }
 0x379   : > { %v1107_v50 = vsub.f32 %v1102_v25, %v1106_v49  ;;  %v6047_v49 = vld [vmem:[%s7574_s2 + $0xa8] sm:$0xff]  }
 0x37b   : > { %v1108_v51 = vmul.f32 1.442695, %v1107_v50  ;;  %v6048_v50 = vld [vmem:[%s7574_s2 + $0x40] sm:$0xff]  }
 0x37d   : > { %6230 = vpow2.f32 %v1108_v51  ;;  %v6049_v51 = vld [vmem:[%s7574_s2 + $0xe0] sm:$0xff]  }
 0x380   : > { %v1209_v52 = vpop.xlane.xlu1 %1208 }
 0x381   : > { %v1210_v53 = vsub.f32 %v1206_v31, %v1209_v52  ;;  %v6050_v52 = vld [vmem:[%s7574_s2] sm:$0xff]  }
 0x383   : > { %v1211_v54 = vmul.f32 1.442695, %v1210_v53  ;;  %v6051_v53 = vld [vmem:[%s7574_s2 + $0xa0] sm:$0xff]  }
 0x385   : > { %6232 = vpow2.f32 %v1211_v54  ;;  %v6052_v54 = vld [vmem:[%s7574_s2 + $0xd8] sm:$0xff]  }
 0x388   : > { %v1311_v55 = vpop.xlane.xlu0 %1310 }
 0x389   : > { %v1312_v56 = vsub.f32 %v1308_v37, %v1311_v55  ;;  %v1428_v37 = vsel %vm1120_vm3, %v1423_v34, 0  ;;  %v6053_v55 = vld [vmem:[%s7574_s2 + $0x98] sm:$0xff]  }
 0x38a   : > { %v6231_v57 = vpop.eup %6230 }
 0x38b   : > { %v1313_v59 = vmul.f32 1.442695, %v1312_v56  ;;  %v1110_v61 = vsel %vm1103_vm5, %v6231_v57, 0.0  ;;  %v6054_v56 = vld [vmem:[%s7574_s2 + $0xd0] sm:$0xff]  }
 0x38c   : > { %1111 = vadd.xlane.f32.xlu0 %v1110_v61  ;;  %v6057_v61 = vld [vmem:[%s7574_s2 + $0x88] sm:$0xff]  }
 0x38d   : > { %6234 = vpow2.f32 %v1313_v59  ;;  %v6056_v59 = vld [vmem:[%s7574_s2 + $0xc8] sm:$0xff]  }
 0x390   : > { %v1413_v62 = vpop.xlane.xlu1 %1412 }
 0x391   : > { %v1414_v63 = vsub.f32 %v1410_v43, %v1413_v62  ;;  %v6042_v43 = vld [vmem:[%s7574_s2 + $0x10] sm:$0xff]   ;;  %v6058_v62 = vld [vmem:[%s7574_s2 + $0xc0] sm:$0xff]  }
 0x392   : > { %v6233_v0 = vpop.eup %6232  ;;  %5522 = vmatpush3.bf16.msra.mxu0 %v6042_v43  ;;  %v6061_v43 = vld [vmem:[%s7580_s8] sm:$0xff]  }
 0x393   : > { %v1415_v1 = vmul.f32 1.442695, %v1414_v63  ;;  %v1213_v2 = vsel %vm1103_vm5, %v6233_v0, 0.0  ;;  %5523 = vmatprep.subr.bf16.mxu0 %v6044_v45  ;;  %v6059_v63 = vld [vmem:[%s7574_s2 + $0x80] sm:$0xff]  }
 0x394   : > { %1214 = vadd.xlane.f32.xlu1 %v1213_v2 }
 0x395   : > { %6236 = vpow2.f32 %v1415_v1 }
 0x396   : > { %5524 = vmatpush3.bf16.msra.mxu0 %v6046_v47  ;;  %v6064_v47 = vld [vmem:[%s7582_s10 + $0x28] sm:$0xff]  }
 0x397   : > { %5525 = vmatprep.subr.bf16.mxu0 %v6048_v50  ;;  %v6066_v50 = vld [vmem:[%s7582_s10 + $0x18] sm:$0xff]  }
 0x39a   : > { %v6235_v3 = vpop.eup %6234  ;;  %5526 = vmatpush3.bf16.msra.mxu0 %v6050_v52 }
 0x39b   : > { %v1315_v4 = vsel %vm1103_vm5, %v6235_v3, 0.0  ;;  %5762 = vmatprep.subr.bf16.mxu0 %v6354_v48 }
 0x39c   : > { %1316 = vadd.xlane.f32.xlu0 %v1315_v4 }
 0x3a2   : > { %v6237_v5 = vpop.eup %6236 }
 0x3a3   : > { %v1417_v6 = vsel %vm1103_vm5, %v6237_v5, 0.0 }
 0x3a4   : > { %1418 = vadd.xlane.f32.xlu1 %v1417_v6 }
 0x415   : > { %v1112_v19 = vpop.xlane.xlu0 %1111 }
 0x416   : > { %6238 = vrcp.f32 %v1112_v19 }
 0x41d   : > { %v1215_v20 = vpop.xlane.xlu1 %1214 }
 0x41e   : > { %6240 = vrcp.f32 %v1215_v20 }
 0x423   : > { %v6239_v21 = vpop.eup %6238 }
 0x424   : > { %v1114_v24 = vmul.f32 %v6239_v21, %v6231_v57  ;;  %v6055_v57 = vld [vmem:[%s7574_s2 + $0x90] sm:$0xff]  }
 0x425   : > { %v1317_v25 = vpop.xlane.xlu0 %1316 }
 0x426   : > { %6242 = vrcp.f32 %v1317_v25  ;;  %v1115_v26 = vpack.c.bf16 %v1114_v24, %v1114_v24 }
 0x428   : > { %5723 = vmatmul.mubr.msk.bf16.vlgmr.msra.gmra.mxu1 %vm1103_vm5, %v1115_v26 }
 0x429   : > { %5733 = vmatpush3.bf16.msra.mxu1 %v1224_v27  ;;  %5734 = vmatprep.mubr.msk.bf16.mxu1 %vm6355_vm2, %v6354_v48 }
 0x42a   : > { %5744 = vmatprep.subr.bf16.mxu1 %v6354_v48 }
 0x42b   : > { %v6241_v28 = vpop.eup %6240 }
 0x42c   : > { %v1217_v30 = vmul.f32 %v6241_v28, %v6233_v0  ;;  %v5026_v28 = vld [vmem:[%s7575_s3] ss:$0 sm:$0xff] }
 0x42d   : > { %v1419_v10 = vpop.xlane.xlu1 %1418 }
 0x42e   : > { %6244 = vrcp.f32 %v1419_v10  ;;  %v1218_v31 = vpack.c.bf16 %v1217_v30, %v1217_v30 }
 0x430   : > { %5735 = vmatmul.mubr.msk.bf16.vlgmr.msra.gmra.mxu1 %vm1103_vm5, %v1218_v31 }
 0x431   : > { %5745 = vmatpush3.bf16.msra.mxu1 %v1326_v32  ;;  %5746 = vmatprep.mubr.msk.bf16.mxu1 %vm6355_vm2, %v6354_v48 }
 0x432   : > { %5756 = vmatprep.subr.bf16.mxu1 %v6354_v48 }
 0x433   : > { %v6243_v33 = vpop.eup %6242 }
 0x434   : > { %v1319_v35 = vmul.f32 %v6243_v33, %v6235_v3 }
 0x436   : > { %v1320_v58 = vpack.c.bf16 %v1319_v35, %v1319_v35  ;;  %v6290_v35 = vld [vmem:[%s6495_s29] sm:$0xff]  ;;  %s5492_s29 = sshll.u32 %s6463_s25, 7  ;;  %s6356_s25 = smov [#allocation2]  }
 0x437   : > { %s7531_s27 = scalar_lea.hbm %s7588_s16, %s5492_s29  ;;  %s6295_s30 = sshll.u32 %s6356_s25, 4  ;;  %s6296_s30 = int_to_ptr.vmem [resolvable:$false] %s6295_s30 }
 0x438   : > { %5747 = vmatmul.mubr.msk.bf16.vlgmr.msra.gmra.mxu1 %vm1103_vm5, %v1320_v58  ;;  %s6297_s20 = scalar_lea.vmem %s6296_s30, 256  ;;  %p6298_p0 = scmp.lt.s32.totalorder %s7533_s17, %s6296_s30 }
 0x439   : > { %5757 = vmatpush3.bf16.msra.mxu1 %v1428_v37  ;;  %5758 = vmatprep.mubr.msk.bf16.mxu1 %vm6355_vm2, %v6354_v48  ;;  %p6299_p1 = scmp.lt.s32.totalorder %s6297_s20, %s6291_s18 }
 0x43a   : > { %5533 = vmatprep.subr.bf16.mxu1 %v6037_v36 }
 0x43b   : > { %v6245_v38 = vpop.eup %6244  ;;  %p6300_p2 = por %p6299_p1, %p6298_p0 }
 0x43c   : > { %v1421_v39 = vmul.f32 %v6245_v38, %v6237_v5 }
 0x43d   : > { %p6301_p3 = pnand %p6300_p2, %p6294_p13 }
 0x43e   : > { %v1422_v40 = vpack.c.bf16 %v1421_v39, %v1421_v39 }
 0x440   : > { %5759 = vmatmul.mubr.msk.bf16.vlgmr.msra.gmra.mxu1 %vm1103_vm5, %v1422_v40 }
 0x441   : > { %5534 = vmatpush3.bf16.msra.mxu1 %v6039_v60 }
 0x442   : > { %5535 = vmatprep.subr.bf16.mxu1 %v6041_v42  ;;  %v1804_v42 = vsel %vm777_vm1, %v6060_v41, 0 }
 0x445   : > { %5536 = vmatpush3.bf16.msra.mxu1 %v6043_v44  ;;  %v6062_v44 = vld [vmem:[%s7582_s10 + $0x38] ss:$0 sps:$4 sm:$0xff]  }
 0x446   : > { %5537 = vmatprep.subr.bf16.mxu1 %v6045_v46  ;;  %v1898_v45 = vsel %vm1120_vm3, %v6062_v44, 0  ;;  %v6063_v46 = vld [vmem:[%s7582_s10 + $0x30] sm:$0xff]  }
 0x449   : > { %5538 = vmatpush3.bf16.msra.mxu1 %v6047_v49  ;;  %v6065_v49 = vld [vmem:[%s7582_s10 + $0x20] sm:$0xff]  }
 0x44a   : > { %5539 = vmatprep.subr.bf16.mxu1 %v6049_v51  ;;  %v6067_v51 = vld [vmem:[%s7582_s10 + $0x10] sm:$0xff]  }
 0x44d   : > { %5540 = vmatpush3.bf16.msra.mxu1 %v6051_v53 }
 0x44e   : > { %5541 = vmatprep.subr.bf16.mxu1 %v6052_v54 }
 0x451   : > { %5542 = vmatpush3.bf16.msra.mxu1 %v6053_v55 }
 0x452   : > { %5543 = vmatprep.subr.bf16.mxu1 %v6054_v56  ;;  %v5059_v56 = vld [vmem:[%s7578_s6] ss:$0 sm:$0xff] }
 0x455   : > { %5544 = vmatpush3.bf16.msra.mxu1 %v6055_v57 }
 0x456   : > { %5545 = vmatprep.subr.bf16.mxu1 %v6056_v59  ;;  %v5060_v59 = vld [vmem:[%s7579_s7] ss:$0 sm:$0xff] }
 0x459   : > { %5546 = vmatpush3.bf16.msra.mxu1 %v6057_v61 }
 0x45a   : > { %5547 = vmatprep.subr.bf16.mxu1 %v6058_v62 }
 0x45d   : > { %5548 = vmatpush3.bf16.msra.mxu1 %v6059_v63 }
 0x45e   : > { %5770 = vmatprep.subr.bf16.mxu1 %v6354_v48 }
 0x4e8   : > { %v1158_v0 = vpop.f32.mrf.mxu1 }
 0x4e9   : > { %v1470_v6 = vpack.c.bf16 %v1158_v0, %v1158_v0  ;;  %v6068_v0 = vld [vmem:[%s7582_s10 + $0x8] sm:$0xff]  }
 0x4ea   : > { %v5724_v1 = vpop.f32.mrf.mxu1 }
 0x4eb   : > { %v6069_v1 = vld [vmem:[%s7582_s10] sm:$0xff]  }
 0x4ec   : > { %v1161_v2 = vpop.f32.mrf.mxu1 }
 0x4ed   : > { %v5061_v2 = vld [vmem:[%s7581_s9] ss:$0 sm:$0xff] }
 0x4ee   : > { %v5725_v3 = vpop.f32.mrf.mxu1 }
 0x4f0   : > { %v1260_v4 = vpop.f32.mrf.mxu1 }
 0x4f1   : > { %v1471_v5 = vpack.c.bf16 %v1260_v4, %v1260_v4 }
 0x4f2   : > { %v5736_v7 = vpop.f32.mrf.mxu1 }
 0x4f3   : > { %1704 = vmatprep.mubr.bf16.mxu0 %v1471_v5 }
 0x4f4   : > { %v1263_v8 = vpop.f32.mrf.mxu1  ;;  %1705 = vmatmul.mubr.bf16.vlgmr.msra.gmra.mxu0 %v1470_v6 }
 0x4f5   : > { %5766 = vmatprep.mubr.msk.bf16.mxu0 %vm6355_vm2, %v6354_v48  ;;  %5763 = vmatpush3.bf16.msra.mxu0 %v1804_v42  ;;  %v6084_v42 = vld [vmem:[%s7573_s1 + $0x128] ss:$48 sps:$4 sm:$0x7f]  }
 0x4f6   : > { %v5737_v9 = vpop.f32.mrf.mxu1  ;;  %5764 = vmatprep.subr.bf16.mxu0 %v6354_v48 }
 0x4f8   : > { %v1362_v11 = vpop.f32.mrf.mxu1 }
 0x4f9   : > { %v1472_v18 = vpack.c.bf16 %v1362_v11, %v1362_v11  ;;  %5765 = vmatpush3.bf16.msra.mxu0 %v6061_v43  ;;  %v5074_v11 = vld [vmem:[%s7583_s11] ss:$0 sm:$0xff] }
 0x4fa   : > { %v5748_v12 = vpop.f32.mrf.mxu1 }
 0x4fc   : > { %v1365_v13 = vpop.f32.mrf.mxu1 }
 0x4fe   : > { %v5749_v14 = vpop.f32.mrf.mxu1 }
 0x500   : > { %v1464_v15 = vpop.f32.mrf.mxu1 }
 0x501   : > { %v1473_v16 = vpack.c.bf16 %v1464_v15, %v1464_v15 }
 0x502   : > { %v5760_v19 = vpop.f32.mrf.mxu1 }
 0x503   : > { %1744 = vmatprep.mubr.bf16.mxu1 %v1473_v16 }
 0x504   : > { %v1467_v20 = vpop.f32.mrf.mxu1  ;;  %1745 = vmatmul.mubr.bf16.vlgmr.msra.gmra.mxu1 %v1472_v18 }
 0x505   : > { %5786 = vmatprep.mubr.msk.bf16.mxu1 %vm6355_vm2, %v6354_v48  ;;  %5771 = vmatpush3.bf16.msra.mxu1 %v1898_v45  ;;  %v2215_v45 = vsel %vm777_vm1, %v6084_v42, 0 }
 0x506   : > { %v5761_v21 = vpop.f32.mrf.mxu1  ;;  %5772 = vmatprep.subr.bf16.mxu1 %v6354_v48 }
 0x509   : > { %5773 = vmatpush3.bf16.msra.mxu1 %v6063_v46  ;;  %v6087_v46 = vld [vmem:[%s7573_s1 + $0xcc] ss:$48 sps:$4 sm:$0xff]  }
 0x50a   : > { %5774 = vmatprep.subr.bf16.mxu1 %v6354_v48 }
 0x50d   : > { %5775 = vmatpush3.bf16.msra.mxu1 %v6064_v47  ;;  %v6085_v47 = vld [vmem:[%s7573_s1 + $0xc8] ss:$48 sps:$4 sm:$0xff]  }
 0x50e   : > { %5776 = vmatprep.subr.bf16.mxu1 %v6354_v48 }
 0x511   : > { %5777 = vmatpush3.bf16.msra.mxu1 %v6065_v49  ;;  %v6088_v49 = vld [vmem:[%s7573_s1 + $0x134] ss:$48 sps:$4 sm:$0x7f]  }
 0x512   : > { %5778 = vmatprep.subr.bf16.mxu1 %v6354_v48 }
 0x515   : > { %5779 = vmatpush3.bf16.msra.mxu1 %v6066_v50  ;;  %v6090_v50 = vld [vmem:[%s7573_s1 + $0x130] ss:$48 sps:$4 sm:$0x7f]  }
 0x516   : > { %5780 = vmatprep.subr.bf16.mxu1 %v6354_v48 }
 0x519   : > { %5781 = vmatpush3.bf16.msra.mxu1 %v6067_v51  ;;  %v2221_v51 = vsel %vm777_vm1, %v6090_v50, 0 }
 0x51a   : > { %5782 = vmatprep.subr.bf16.mxu1 %v6354_v48 }
 0x51d   : > { %5783 = vmatpush3.bf16.msra.mxu1 %v6068_v0  ;;  %v6105_v0 = vld [vmem:[%s7573_s1 + $0xec] ss:$48 sps:$4 sm:$0xff]  }
 0x51e   : > { %5784 = vmatprep.subr.bf16.mxu1 %v6354_v48 }
 0x521   : > { %5785 = vmatpush3.bf16.msra.mxu1 %v6069_v1  ;;  %v6103_v1 = vld [vmem:[%s7573_s1 + $0xe8] ss:$48 sps:$4 sm:$0xff]  }
 0x5b4   : > { %v5527_v22 = vpop.f32.mrf.mxu0 }
 0x5b6   : > { %v5528_v24 = vpop.f32.mrf.mxu0 }
 0x5b7   : > { %v5529_v27 = vadd.f32 %v5528_v24, %v5527_v22 }
 0x5b8   : > { %v5530_v25 = vpop.f32.mrf.mxu0 }
 0x5b9   : > { %v1707_v10 = vadd.f32 %v5529_v27, %v5026_v28  ;;  %v6072_v27 = vld [vmem:[%s7573_s1 + $0x144] ss:$48 sps:$4 sm:$0x7f]   ;;  %v6074_v28 = vld [vmem:[%s7573_s1 + $0x120] ss:$48 sps:$4 sm:$0x7f]  }
 0x5ba   : > { %v5531_v26 = vpop.f32.mrf.mxu0  ;;  %5221 = vmatprep.subr.msk.bf16.mxu1 %vm777_vm1, %v6072_v27 }
 0x5bb   : > { %v6070_v26 = vld [vmem:[%s7573_s1 + $0x124] ss:$48 sps:$4 sm:$0x7f]  }
 0x5bc   : > { %5213 = vmatprep.subr.msk.bf16.mxu0 %vm777_vm1, %v6070_v26 }
 0x5c4   : > { %v5549_v29 = vpop.f32.mrf.mxu1 }
 0x5c6   : > { %v5550_v30 = vpop.f32.mrf.mxu1 }
 0x5c7   : > { %v5551_v31 = vadd.f32 %v5550_v30, %v5549_v29  ;;  %v6075_v29 = vld [vmem:[%s7573_s1 + $0x140] ss:$48 sps:$4 sm:$0x7f]   ;;  %v2209_v30 = vsel %vm777_vm1, %v6074_v28, 0 }
 0x5c8   : > { %v5552_v32 = vpop.f32.mrf.mxu1 }
 0x5c9   : > { %v1747_v33 = vadd.f32 %v5551_v31, %v1707_v10  ;;  %v2233_v10 = vsel %vm777_vm1, %v6075_v29, 0  ;;  %v6078_v31 = vld [vmem:[%s7573_s1 + $0xc4] ss:$48 sps:$4 sm:$0xff]   ;;  %v6076_v32 = vld [vmem:[%s7573_s1 + $0xc0] ss:$48 sps:$4 sm:$0xff]  }
 0x5ca   : > { %v5553_v34 = vpop.f32.mrf.mxu1 }
 0x5cb   : > { %v6772_v58 = vadd.f32 %v6290_v35, %v1747_v33  ;;  %v6079_v33 = vld [vmem:[%s7573_s1 + $0xe0] ss:$48 sps:$4 sm:$0xff]   ;;  %v6081_v34 = vld [vmem:[%s7573_s1 + $0xe4] ss:$48 sps:$4 sm:$0xff]  }
 0x5cc   : > { %v6082_v35 = vld [vmem:[%s7573_s1 + $0x12c] ss:$48 sps:$4 sm:$0x7f]  }
 0x5cd   : > { %v1755_v36 = vsel %vm636_vm0, %v6772_v58, 0.0 }
 0x5ce   : > { %1756 = vadd.xlane.f32.xlu0 %v1755_v36 }
 0x657   : > { %v1757_v37 = vpop.xlane.xlu0 %1756 }
 0x658   : > { %v1758_v38 = vmul.f32 0.033333335, %v1757_v37 }
 0x65a   : > { %v1759_v39 = vsub.f32 %v6772_v58, %v1758_v38 }
 0x65c   : > { %v1760_v60 = vmul.f32 %v1759_v39, %v1759_v39 }
 0x65e   : > { %v1761_v40 = vsel %vm636_vm0, %v1760_v60, 0.0 }
 0x65f   : > { %1762 = vadd.xlane.f32.xlu1 %v1761_v40  ;;  %v5188_v40 = vld [vmem:[%s7577_s5 + $0x1] ss:$0 sm:$0xff] }
 0x6e8   : > { %v1763_v52 = vpop.xlane.xlu1 %1762 }
 0x6e9   : > { %v1764_v53 = vmul.f32 0.033333335, %v1763_v52  ;;  %v6093_v52 = vld [vmem:[%s7573_s1 + $0xd4] ss:$48 sps:$4 sm:$0xff]  }
 0x6eb   : > { %v1765_v54 = vadd.f32 1e-05, %v1764_v53  ;;  %v6091_v53 = vld [vmem:[%s7573_s1 + $0xd0] ss:$48 sps:$4 sm:$0xff]  }
 0x6ed   : > { %6246 = vrsqrt.f32 %v1765_v54  ;;  %v6094_v54 = vld [vmem:[%s7573_s1 + $0x13c] ss:$48 sps:$4 sm:$0x7f]  }
 0x6fa   : > { %v6247_v55 = vpop.eup %6246 }
 0x6fb   : > { %v1767_v57 = vmul.f32 %v6247_v55, %v1759_v39  ;;  %v5187_v39 = vld [vmem:[%s7576_s4 + $0x1] ss:$0 sm:$0xff]  ;;  %v6096_v55 = vld [vmem:[%s7573_s1 + $0x138] ss:$48 sps:$4 sm:$0x7f]  }
 0x6fd   : > { %v1774_v61 = vmul.f32 %v5059_v56, %v1767_v57  ;;  %v2227_v56 = vsel %vm777_vm1, %v6096_v55, 0  ;;  %v6099_v57 = vld [vmem:[%s7573_s1 + $0xdc] ss:$48 sps:$4 sm:$0xff]  }
 0x6ff   : > { %v1781_v62 = vadd.f32 %v5060_v59, %v1774_v61  ;;  %v6097_v59 = vld [vmem:[%s7573_s1 + $0xd8] ss:$48 sps:$4 sm:$0xff]   ;;  %v6100_v61 = vld [vmem:[%s7573_s1 + $0x14c] ss:$48 sps:$4 sm:$0x7f]  }
 0x701   : > { %v1782_v63 = vpack.c.bf16 %v1781_v62, %v1781_v62  ;;  %v6102_v62 = vld [vmem:[%s7573_s1 + $0x148] ss:$48 sps:$4 sm:$0x7f]  }
 0x703   : > { %5767 = vmatmul.mubr.msk.bf16.vlgmr.msra.gmra.mxu0 %vm636_vm0, %v1782_v63  ;;  %v2239_v63 = vsel %vm777_vm1, %v6102_v62, 0 }
 0x704   : > { %2276 = vmatprep.mubr.bf16.mxu0 %v6353_v17  ;;  %2257 = vmatpush1.bf16.msra.mxu0 %v2209_v30 }
 0x705   : > { %2258 = vmatprep.subr.bf16.mxu0 %v6078_v31 }
 0x708   : > { %2259 = vmatpush1.bf16.msra.mxu0 %v6076_v32 }
 0x709   : > { %5215 = vmatprep.subr.msk.bf16.mxu0 %vm777_vm1, %v6082_v35 }
 0x7c3   : > { %v1840_v3 = vpop.f32.mrf.mxu0 }
 0x7c4   : > { %v1841_v4 = vadd.f32 %v5061_v2, %v1840_v3 }
 0x7c5   : > { %v5768_v5 = vpop.f32.mrf.mxu0 }
 0x7c6   : > { %v1846_v6 = vmax.f32 %v1841_v4, 0.0 }
 0x7c7   : > { %v1843_v7 = vpop.f32.mrf.mxu0 }
 0x7c8   : > { %v1847_v8 = vpack.c.bf16 %v1846_v6, %v1846_v6 }
 0x7c9   : > { %v5769_v9 = vpop.f32.mrf.mxu0 }
 0x7ca   : > { %5787 = vmatmul.mubr.msk.bf16.vlgmr.msra.gmra.mxu1 %vm1893_vm6, %v1847_v8 }
 0x7cb   : > { %2440 = vmatprep.mubr.bf16.mxu1 %v6353_v17  ;;  %2421 = vmatpush1.bf16.msra.mxu1 %v2233_v10 }
 0x7cc   : > { %2422 = vmatprep.subr.bf16.mxu1 %v6081_v34 }
 0x7cf   : > { %2423 = vmatpush1.bf16.msra.mxu1 %v6079_v33 }
 0x7d0   : > { %5790 = vmatprep.subr.bf16.mxu1 %v6354_v48 }
 0x88a   : > { %v1934_v12 = vpop.f32.mrf.mxu1 }
 0x88b   : > { %v1940_v13 = vadd.f32 %v1934_v12, %v6772_v58 }
 0x88c   : > { %v5788_v14 = vpop.f32.mrf.mxu1 }
 0x88d   : > { %v6835_v15 = vadd.f32 %v5074_v11, %v1940_v13 }
 0x88e   : > { %v1937_v16 = vpop.f32.mrf.mxu1 }
 0x88f   : > { %v2069_v18 = vsel %vm636_vm0, %v6835_v15, 0.0 }
 0x890   : > { %2070 = vadd.xlane.f32.xlu0 %v2069_v18  ;;  %v5789_v19 = vpop.f32.mrf.mxu1 }
 0x919   : > { %v2071_v20 = vpop.xlane.xlu0 %2070 }
 0x91a   : > { %v2072_v21 = vmul.f32 0.033333335, %v2071_v20 }
 0x91c   : > { %v2073_v22 = vsub.f32 %v6835_v15, %v2072_v21 }
 0x91e   : > { %v2074_v24 = vmul.f32 %v2073_v22, %v2073_v22 }
 0x920   : > { %v2075_v25 = vsel %vm636_vm0, %v2074_v24, 0.0 }
 0x921   : > { %2076 = vadd.xlane.f32.xlu1 %v2075_v25 }
 0x9aa   : > { %v2077_v58 = vpop.xlane.xlu1 %2076 }
 0x9ab   : > { %v2078_v36 = vmul.f32 0.033333335, %v2077_v58 }
 0x9ad   : > { %v2079_v37 = vadd.f32 1e-05, %v2078_v36 }
 0x9af   : > { %6248 = vrsqrt.f32 %v2079_v37 }
 0x9bc   : > { %v6249_v38 = vpop.eup %6248 }
 0x9bd   : > { %v2081_v60 = vmul.f32 %v6249_v38, %v2073_v22 }
 0x9bf   : > { %v2088_v41 = vmul.f32 %v5187_v39, %v2081_v60 }
 0x9c1   : > { %v2095_v43 = vadd.f32 %v5188_v40, %v2088_v41 }
 0x9c3   : > { %v2096_v44 = vpack.c.bf16 %v2095_v43, %v2095_v43 }
 0x9c5   : > { %5214 = vmatmul.mubr.msk.bf16.vlgmr.msra.gmra.mxu0 %vm636_vm0, %v2096_v44  ;;  %5222 = vmatmul.mubr.msk.bf16.vlgmr.msra.gmra.mxu1 %vm636_vm0, %v2096_v44 }
 0x9c6   : > { %2298 = vmatpush1.bf16.msra.mxu0 %v2215_v45  ;;  %2317 = vmatprep.mubr.bf16.mxu0 %v6353_v17 }
 0x9c7   : > { %2299 = vmatprep.subr.bf16.mxu0 %v6087_v46  ;;  %5792 = vmatprep.mubr.msk.bf16.mxu1 %vm6355_vm2, %v6354_v48 }
 0x9ca   : > { %2300 = vmatpush1.bf16.msra.mxu0 %v6085_v47 }
 0x9cb   : > { %5217 = vmatprep.subr.msk.bf16.mxu0 %vm777_vm1, %v6088_v49 }
 0x9cd   : > { %5216 = vmatmul.mubr.msk.bf16.vlgmr.msra.gmra.mxu0 %vm636_vm0, %v2096_v44 }
 0x9ce   : > { %2339 = vmatpush1.bf16.msra.mxu0 %v2221_v51  ;;  %2358 = vmatprep.mubr.bf16.mxu0 %v6353_v17 }
 0x9cf   : > { %2340 = vmatprep.subr.bf16.mxu0 %v6093_v52 }
 0x9d2   : > { %2341 = vmatpush1.bf16.msra.mxu0 %v6091_v53 }
 0x9d3   : > { %5219 = vmatprep.subr.msk.bf16.mxu0 %vm777_vm1, %v6094_v54 }
 0x9d5   : > { %5218 = vmatmul.mubr.msk.bf16.vlgmr.msra.gmra.mxu0 %vm636_vm0, %v2096_v44 }
 0x9d6   : > { %2380 = vmatpush1.bf16.msra.mxu0 %v2227_v56  ;;  %2399 = vmatprep.mubr.bf16.mxu0 %v6353_v17 }
 0x9d7   : > { %2381 = vmatprep.subr.bf16.mxu0 %v6099_v57 }
 0x9da   : > { %2382 = vmatpush1.bf16.msra.mxu0 %v6097_v59 }
 0x9db   : > { %5223 = vmatprep.subr.msk.bf16.mxu0 %vm777_vm1, %v6100_v61 }
 0x9dd   : > { %5220 = vmatmul.mubr.msk.bf16.vlgmr.msra.gmra.mxu0 %vm636_vm0, %v2096_v44 }
 0x9de   : > { %2462 = vmatpush1.bf16.msra.mxu0 %v2239_v63  ;;  %2481 = vmatprep.mubr.bf16.mxu0 %v6353_v17 }
 0x9df   : > { %2463 = vmatprep.subr.bf16.mxu0 %v6105_v0 }
 0x9e2   : > { %2464 = vmatpush1.bf16.msra.mxu0 %v6103_v1 }
 0x9e3   : > { %5796 = vmatprep.subr.bf16.mxu0 %v6354_v48 }
 0x9e5   : > { %5224 = vmatmul.mubr.msk.bf16.vlgmr.msra.gmra.mxu0 %vm636_vm0, %v2096_v44 }
 0x9e6   : > { %5798 = vmatprep.mubr.msk.bf16.mxu0 %vm6355_vm2, %v6354_v48 }
 0xa85   : > { %v2278_v2 = vpop.f32.mrf.mxu0  ;;  %v2442_v3 = vpop.f32.mrf.mxu1 }
 0xa86   : > { %v2545_v4 = vpack.c.bf16 %v2442_v3, %v2442_v3  ;;  %v2490_v25 = vpack.c.bf16 %v2278_v2, %v2278_v2 }
 0xa87   : > { %v2280_v5 = vpop.f32.mrf.mxu0  ;;  %v6947_v6 = vpop.f32.mrf.mxu1 }
 0xa88   : > { %v2550_v7 = vsel %vm1120_vm3, %v2545_v4, 0  ;;  %v2592_v10 = vpack.c.bf16 %v2280_v5, %v2280_v5 }
 0xa89   : > { %v2282_v8 = vpop.f32.mrf.mxu0  ;;  %v2446_v9 = vpop.f32.mrf.mxu1  ;;  %5797 = vmatpush3.bf16.msra.mxu0 %v2550_v7 }
 0xa8a   : > { %5808 = vmatprep.subr.bf16.mxu0 %v6354_v48 }
 0xa8b   : > { %v2283_v11 = vpop.f32.mrf.mxu0  ;;  %v2447_v12 = vpop.f32.mrf.mxu1 }
 0xa8d   : > { %v2319_v13 = vpop.f32.mrf.mxu0 }
 0xa8e   : > { %v2694_v58 = vpack.c.bf16 %v2319_v13, %v2319_v13 }
 0xa8f   : > { %v2321_v14 = vpop.f32.mrf.mxu0 }
 0xa90   : > { %v2796_v37 = vpack.c.bf16 %v2321_v14, %v2321_v14 }
 0xa91   : > { %v2323_v16 = vpop.f32.mrf.mxu0 }
 0xa93   : > { %v2324_v18 = vpop.f32.mrf.mxu0 }
 0xa95   : > { %v2360_v19 = vpop.f32.mrf.mxu0 }
 0xa96   : > { %v2491_v20 = vpack.c.bf16 %v2360_v19, %v2360_v19 }
 0xa97   : > { %v2362_v21 = vpop.f32.mrf.mxu0 }
 0xa98   : > { %5791 = vmatpush3.bf16.xpose.msra.mxu1 %v2491_v20  ;;  %v2593_v27 = vpack.c.bf16 %v2362_v21, %v2362_v21 }
 0xa99   : > { %v2364_v22 = vpop.f32.mrf.mxu0  ;;  %5802 = vmatprep.subr.bf16.mxu1 %v6354_v48 }
 0xa9b   : > { %v2365_v24 = vpop.f32.mrf.mxu0 }
 0xa9d   : > { %v2401_v26 = vpop.f32.mrf.mxu0 }
 0xa9e   : > { %v2695_v32 = vpack.c.bf16 %v2401_v26, %v2401_v26  ;;  %v6107_v26 = vld [vmem:[%s7574_s2 + $0x138] sm:$0xff]  }
 0xa9f   : > { %v2403_v28 = vpop.f32.mrf.mxu0  ;;  %5793 = vmatmul.mubr.bf16.vlgmr.msra.gmra.mxu1 %v2490_v25  ;;  %v6106_v25 = vld [vmem:[%s7574_s2 + $0x178] sm:$0xff]  }
 0xaa0   : > { %5803 = vmatpush3.bf16.xpose.msra.mxu1 %v2593_v27  ;;  %5804 = vmatprep.mubr.msk.bf16.mxu1 %vm6355_vm2, %v6354_v48  ;;  %v2797_v36 = vpack.c.bf16 %v2403_v28, %v2403_v28  ;;  %v6108_v27 = vld [vmem:[%s7574_s2 + $0x170] sm:$0xff]  }
 0xaa1   : > { %v2405_v29 = vpop.f32.mrf.mxu0  ;;  %5814 = vmatprep.subr.bf16.mxu1 %v6354_v48  ;;  %v6109_v28 = vld [vmem:[%s7574_s2 + $0x130] sm:$0xff]  }
 0xaa2   : > { %v6110_v29 = vld [vmem:[%s7574_s2 + $0x168] sm:$0xff]  }
 0xaa3   : > { %v2406_v30 = vpop.f32.mrf.mxu0 }
 0xaa4   : > { %v6111_v30 = vld [vmem:[%s7574_s2 + $0x128] sm:$0xff]  }
 0xaa5   : > { %v6955_v31 = vpop.f32.mrf.mxu0 }
 0xaa7   : > { %v6957_v33 = vpop.f32.mrf.mxu0  ;;  %5805 = vmatmul.mubr.bf16.vlgmr.msra.gmra.mxu1 %v2592_v10  ;;  %v6112_v10 = vld [vmem:[%s7574_s2 + $0x160] sm:$0xff]  }
 0xaa8   : > { %5815 = vmatpush3.bf16.xpose.msra.mxu1 %v2695_v32  ;;  %5816 = vmatprep.mubr.msk.bf16.mxu1 %vm6355_vm2, %v6354_v48  ;;  %v6113_v32 = vld [vmem:[%s7574_s2 + $0x120] sm:$0xff]  }
 0xaa9   : > { %v2487_v34 = vpop.f32.mrf.mxu0  ;;  %5826 = vmatprep.subr.bf16.mxu1 %v6354_v48 }
 0xaaa   : > { %v6114_v34 = vld [vmem:[%s7574_s2 + $0x158] sm:$0xff]  }
 0xaab   : > { %v2488_v35 = vpop.f32.mrf.mxu0 }
 0xaac   : > { %v6116_v35 = vld [vmem:[%s7574_s2 + $0x118] sm:$0xff]  }
 0xaaf   : > { %5817 = vmatmul.mubr.bf16.vlgmr.msra.gmra.mxu1 %v2694_v58 }
 0xab0   : > { %5827 = vmatpush3.bf16.xpose.msra.mxu1 %v2797_v36  ;;  %5828 = vmatprep.mubr.msk.bf16.mxu1 %vm6355_vm2, %v6354_v48 }
 0xab1   : > { %5583 = vmatprep.subr.bf16.mxu1 %v6106_v25 }
 0xab7   : > { %5829 = vmatmul.mubr.bf16.vlgmr.msra.gmra.mxu1 %v2796_v37 }
 0xab8   : > { %5584 = vmatpush3.bf16.msra.mxu1 %v6107_v26 }
 0xab9   : > { %5585 = vmatprep.subr.bf16.mxu1 %v6108_v27 }
 0xabc   : > { %5586 = vmatpush3.bf16.msra.mxu1 %v6109_v28 }
 0xabd   : > { %5587 = vmatprep.subr.bf16.mxu1 %v6110_v29 }
 0xac0   : > { %5588 = vmatpush3.bf16.msra.mxu1 %v6111_v30 }
 0xac1   : > { %5589 = vmatprep.subr.bf16.mxu1 %v6112_v10 }
 0xac4   : > { %5590 = vmatpush3.bf16.msra.mxu1 %v6113_v32 }
 0xac5   : > { %5591 = vmatprep.subr.bf16.mxu1 %v6114_v34 }
 0xac8   : > { %5592 = vmatpush3.bf16.msra.mxu1 %v6116_v35 }
 0xb5f   : > { %v2526_v38 = vpop.f32.mrf.mxu1 }
 0xb60   : > { %v2532_v39 = vsel %vm6625_vm4, %v2526_v38, -1e+30  ;;  %v2647_v38 = vpack.c.bf16 %v6947_v6, %v6947_v6 }
 0xb61   : > { %v5794_v60 = vpop.f32.mrf.mxu1  ;;  %v2533_v40 = vsel %vm1103_vm5, %v2532_v39, -inf }
 0xb62   : > { %2534 = vmax.xlane.f32.xlu0 %v2533_v40 }
 0xb63   : > { %v2529_v41 = vpop.f32.mrf.mxu1 }
 0xb64   : > { %v2652_v41 = vsel %vm1120_vm3, %v2647_v38, 0 }
 0xb65   : > { %v5795_v42 = vpop.f32.mrf.mxu1 }
 0xb67   : > { %v2628_v43 = vpop.f32.mrf.mxu1 }
 0xb68   : > { %v2634_v44 = vsel %vm6625_vm4, %v2628_v43, -1e+30  ;;  %v2749_v43 = vpack.c.bf16 %v6955_v31, %v6955_v31 }
 0xb69   : > { %v5806_v45 = vpop.f32.mrf.mxu1  ;;  %v2635_v46 = vsel %vm1103_vm5, %v2634_v44, -inf }
 0xb6a   : > { %2636 = vmax.xlane.f32.xlu1 %v2635_v46  ;;  %v2754_v46 = vsel %vm1120_vm3, %v2749_v43, 0  ;;  %v5229_v43 = vld [vmem:[%s7575_s3 + $0x1] ss:$0 sm:$0xff] }
 0xb6b   : > { %v2631_v47 = vpop.f32.mrf.mxu1 }
 0xb6d   : > { %v5807_v49 = vpop.f32.mrf.mxu1 }
 0xb6e   : > { %v2851_v49 = vpack.c.bf16 %v6957_v33, %v6957_v33  ;;  %v6117_v33 = vld [vmem:[%s7574_s2 + $0x1b8] sm:$0xff]  }
 0xb6f   : > { %v2730_v50 = vpop.f32.mrf.mxu1 }
 0xb70   : > { %v2736_v51 = vsel %vm6625_vm4, %v2730_v50, -1e+30 }
 0xb71   : > { %v5818_v52 = vpop.f32.mrf.mxu1  ;;  %v2737_v53 = vsel %vm1103_vm5, %v2736_v51, -inf }
 0xb72   : > { %2738 = vmax.xlane.f32.xlu0 %v2737_v53  ;;  %v2856_v52 = vsel %vm1120_vm3, %v2851_v49, 0 }
 0xb73   : > { %v2733_v54 = vpop.f32.mrf.mxu1 }
 0xb75   : > { %v5819_v55 = vpop.f32.mrf.mxu1 }
 0xb77   : > { %v2832_v56 = vpop.f32.mrf.mxu1 }
 0xb78   : > { %v2838_v57 = vsel %vm6625_vm4, %v2832_v56, -1e+30  ;;  %v6118_v56 = vld [vmem:[%s7574_s2 + $0x150] sm:$0xff]  }
 0xb79   : > { %v5830_v59 = vpop.f32.mrf.mxu1  ;;  %v2839_v61 = vsel %vm1103_vm5, %v2838_v57, -inf  ;;  %5593 = vmatprep.subr.bf16.mxu1 %v6118_v56  ;;  %v6138_v56 = vld [vmem:[%s7580_s8 + $0x18] sm:$0x7f]  }
 0xb7a   : > { %2840 = vmax.xlane.f32.xlu1 %v2839_v61  ;;  %v6120_v59 = vld [vmem:[%s7574_s2 + $0x110] sm:$0xff]  }
 0xb7b   : > { %v2835_v62 = vpop.f32.mrf.mxu1  ;;  %v6121_v61 = vld [vmem:[%s7574_s2 + $0x1b0] sm:$0xff]   ;;  %5594 = vmatpush3.bf16.msra.mxu1 %v6120_v59 }
 0xb7c   : > { %v6122_v62 = vld [vmem:[%s7574_s2 + $0x148] sm:$0xff]   ;;  %v6140_v59 = vld [vmem:[%s7582_s10 + $0x74] ss:$0 sps:$4 sm:$0xff]  }
 0xb7d   : > { %v5831_v63 = vpop.f32.mrf.mxu1  ;;  %5595 = vmatprep.subr.bf16.mxu1 %v6122_v62  ;;  %v6141_v62 = vld [vmem:[%s7582_s10 + $0x6c] sm:$0xff]  }
 0xb7e   : > { %v6123_v63 = vld [vmem:[%s7574_s2 + $0x1e8] sm:$0xff]  }
 0xbeb   : > { %v2535_v0 = vpop.xlane.xlu0 %2534 }
 0xbec   : > { %v2536_v1 = vsub.f32 %v2532_v39, %v2535_v0  ;;  %v6124_v0 = vld [vmem:[%s7574_s2 + $0x108] sm:$0xff]  }
 0xbed   : > { %5596 = vmatpush3.bf16.msra.mxu1 %v6124_v0  ;;  %v6143_v0 = vld [vmem:[%s7582_s10 + $0x5c] sm:$0xff]  }
 0xbee   : > { %v2537_v2 = vmul.f32 1.442695, %v2536_v1  ;;  %v6125_v1 = vld [vmem:[%s7574_s2 + $0x1a8] sm:$0xff]  }
 0xbf0   : > { %6250 = vpow2.f32 %v2537_v2  ;;  %v6126_v2 = vld [vmem:[%s7574_s2 + $0x140] sm:$0xff]  }
 0xbf1   : > { %5597 = vmatprep.subr.bf16.mxu1 %v6126_v2  ;;  %v6145_v2 = vld [vmem:[%s7582_s10 + $0x4c] sm:$0xff]  }
 0xbf3   : > { %v2637_v3 = vpop.xlane.xlu1 %2636 }
 0xbf4   : > { %v2638_v4 = vsub.f32 %v2634_v44, %v2637_v3  ;;  %v6127_v3 = vld [vmem:[%s7574_s2 + $0x1e0] sm:$0xff]  }
 0xbf6   : > { %v2639_v5 = vmul.f32 1.442695, %v2638_v4  ;;  %v6128_v4 = vld [vmem:[%s7574_s2 + $0x100] sm:$0xff]  }
 0xbf7   : > { %5598 = vmatpush3.bf16.msra.mxu1 %v6128_v4 }
 0xbf8   : > { %6252 = vpow2.f32 %v2639_v5  ;;  %v6129_v5 = vld [vmem:[%s7574_s2 + $0x1a0] sm:$0xff]   ;;  %5838 = vmatprep.subr.bf16.mxu1 %v6354_v48 }
 0xbfb   : > { %v2739_v7 = vpop.xlane.xlu0 %2738 }
 0xbfc   : > { %v2740_v8 = vsub.f32 %v2736_v51, %v2739_v7  ;;  %v6115_v51 = vld [vmem:[%s7574_s2 + $0x1f8] sm:$0xff]  }
 0xbfd   : > { %v6251_v9 = vpop.eup %6250  ;;  %v6130_v7 = vld [vmem:[%s7574_s2 + $0x1d8] sm:$0xff]  }
 0xbfe   : > { %v2741_v11 = vmul.f32 1.442695, %v2740_v8  ;;  %v2539_v12 = vsel %vm1103_vm5, %v6251_v9, 0.0  ;;  %v6131_v8 = vld [vmem:[%s7574_s2 + $0x198] sm:$0xff]  }
 0xbff   : > { %2540 = vadd.xlane.f32.xlu0 %v2539_v12  ;;  %v6134_v12 = vld [vmem:[%s7574_s2 + $0x1c8] sm:$0xff]  }
 0xc00   : > { %6254 = vpow2.f32 %v2741_v11  ;;  %v6133_v11 = vld [vmem:[%s7574_s2 + $0x190] sm:$0xff]  }
 0xc03   : > { %v2841_v13 = vpop.xlane.xlu1 %2840 }
 0xc04   : > { %v2842_v14 = vsub.f32 %v2838_v57, %v2841_v13  ;;  %v6119_v57 = vld [vmem:[%s7574_s2 + $0x1f0] sm:$0xff]   ;;  %v6135_v13 = vld [vmem:[%s7574_s2 + $0x188] sm:$0xff]  }
 0xc05   : > { %v6253_v16 = vpop.eup %6252 }
 0xc06   : > { %v2843_v18 = vmul.f32 1.442695, %v2842_v14  ;;  %v2641_v19 = vsel %vm1103_vm5, %v6253_v16, 0.0  ;;  %v6136_v14 = vld [vmem:[%s7574_s2 + $0x1c0] sm:$0xff]  }
 0xc07   : > { %2642 = vadd.xlane.f32.xlu1 %v2641_v19 }
 0xc08   : > { %6256 = vpow2.f32 %v2843_v18 }
 0xc0d   : > { %v6255_v20 = vpop.eup %6254 }
 0xc0e   : > { %v2743_v21 = vsel %vm1103_vm5, %v6255_v20, 0.0 }
 0xc0f   : > { %2744 = vadd.xlane.f32.xlu0 %v2743_v21 }
 0xc15   : > { %v6257_v22 = vpop.eup %6256 }
 0xc16   : > { %v2845_v24 = vsel %vm1103_vm5, %v6257_v22, 0.0 }
 0xc17   : > { %2846 = vadd.xlane.f32.xlu1 %v2845_v24 }
 0xc88   : > { %v2541_v58 = vpop.xlane.xlu0 %2540 }
 0xc89   : > { %6258 = vrcp.f32 %v2541_v58 }
 0xc90   : > { %v2643_v36 = vpop.xlane.xlu1 %2642 }
 0xc91   : > { %6260 = vrcp.f32 %v2643_v36 }
 0xc96   : > { %v6259_v37 = vpop.eup %6258 }
 0xc97   : > { %v2543_v39 = vmul.f32 %v6259_v37, %v6251_v9  ;;  %v6132_v9 = vld [vmem:[%s7574_s2 + $0x1d0] sm:$0xff]  }
 0xc98   : > { %v2745_v60 = vpop.xlane.xlu0 %2744 }
 0xc99   : > { %6262 = vrcp.f32 %v2745_v60  ;;  %v2544_v40 = vpack.c.bf16 %v2543_v39, %v2543_v39 }
 0xc9b   : > { %5799 = vmatmul.mubr.msk.bf16.vlgmr.msra.gmra.mxu0 %vm1103_vm5, %v2544_v40 }
 0xc9c   : > { %5809 = vmatpush3.bf16.msra.mxu0 %v2652_v41  ;;  %5810 = vmatprep.mubr.msk.bf16.mxu0 %vm6355_vm2, %v6354_v48 }
 0xc9d   : > { %5820 = vmatprep.subr.bf16.mxu0 %v6354_v48 }
 0xc9e   : > { %v6261_v42 = vpop.eup %6260 }
 0xc9f   : > { %v2645_v44 = vmul.f32 %v6261_v42, %v6253_v16  ;;  %v6137_v16 = vld [vmem:[%s7574_s2 + $0x180] sm:$0xff]  }
 0xca0   : > { %v2847_v6 = vpop.xlane.xlu1 %2846 }
 0xca1   : > { %6264 = vrcp.f32 %v2847_v6  ;;  %v2646_v45 = vpack.c.bf16 %v2645_v44, %v2645_v44 }
 0xca3   : > { %5811 = vmatmul.mubr.msk.bf16.vlgmr.msra.gmra.mxu0 %vm1103_vm5, %v2646_v45 }
 0xca4   : > { %5821 = vmatpush3.bf16.msra.mxu0 %v2754_v46  ;;  %5822 = vmatprep.mubr.msk.bf16.mxu0 %vm6355_vm2, %v6354_v48 }
 0xca5   : > { %5832 = vmatprep.subr.bf16.mxu0 %v6354_v48 }
 0xca6   : > { %v6263_v47 = vpop.eup %6262 }
 0xca7   : > { %v2747_v50 = vmul.f32 %v6263_v47, %v6255_v20 }
 0xca9   : > { %v2748_v31 = vpack.c.bf16 %v2747_v50, %v2747_v50 }
 0xcab   : > { %5823 = vmatmul.mubr.msk.bf16.vlgmr.msra.gmra.mxu0 %vm1103_vm5, %v2748_v31 }
 0xcac   : > { %5833 = vmatpush3.bf16.msra.mxu0 %v2856_v52  ;;  %5834 = vmatprep.mubr.msk.bf16.mxu0 %vm6355_vm2, %v6354_v48 }
 0xcad   : > { %5605 = vmatprep.subr.bf16.mxu0 %v6115_v51 }
 0xcae   : > { %v6265_v53 = vpop.eup %6264 }
 0xcaf   : > { %v2849_v54 = vmul.f32 %v6265_v53, %v6257_v22 }
 0xcb1   : > { %v2850_v55 = vpack.c.bf16 %v2849_v54, %v2849_v54 }
 0xcb3   : > { %5835 = vmatmul.mubr.msk.bf16.vlgmr.msra.gmra.mxu0 %vm1103_vm5, %v2850_v55 }
 0xcb4   : > { %5606 = vmatpush3.bf16.msra.mxu0 %v6117_v33 }
 0xcb5   : > { %5607 = vmatprep.subr.bf16.mxu0 %v6119_v57  ;;  %v3234_v57 = vsel %vm777_vm1, %v6138_v56, 0 }
 0xcb8   : > { %5608 = vmatpush3.bf16.msra.mxu0 %v6121_v61  ;;  %v3327_v61 = vsel %vm1120_vm3, %v6140_v59, 0 }
 0xcb9   : > { %5609 = vmatprep.subr.bf16.mxu0 %v6123_v63  ;;  %v6142_v63 = vld [vmem:[%s7582_s10 + $0x64] sm:$0xff]  }
 0xcbc   : > { %5610 = vmatpush3.bf16.msra.mxu0 %v6125_v1  ;;  %v6144_v1 = vld [vmem:[%s7582_s10 + $0x54] sm:$0xff]  }
 0xcbd   : > { %5611 = vmatprep.subr.bf16.mxu0 %v6127_v3 }
 0xcc0   : > { %5612 = vmatpush3.bf16.msra.mxu0 %v6129_v5 }
 0xcc1   : > { %5613 = vmatprep.subr.bf16.mxu0 %v6130_v7 }
 0xcc4   : > { %5614 = vmatpush3.bf16.msra.mxu0 %v6131_v8  ;;  %v5264_v8 = vld [vmem:[%s7578_s6 + $0x1] ss:$0 sm:$0xff] }
 0xcc5   : > { %5615 = vmatprep.subr.bf16.mxu0 %v6132_v9 }
 0xcc8   : > { %5616 = vmatpush3.bf16.msra.mxu0 %v6133_v11  ;;  %v5265_v11 = vld [vmem:[%s7579_s7 + $0x1] ss:$0 sm:$0xff] }
 0xcc9   : > { %5617 = vmatprep.subr.bf16.mxu0 %v6134_v12 }
 0xccc   : > { %5618 = vmatpush3.bf16.msra.mxu0 %v6135_v13 }
 0xccd   : > { %5619 = vmatprep.subr.bf16.mxu0 %v6136_v14 }
 0xcd0   : > { %5620 = vmatpush3.bf16.msra.mxu0 %v6137_v16  ;;  %v6146_v16 = vld [vmem:[%s7582_s10 + $0x44] sm:$0xff]  }
 0xcd1   : > { %5846 = vmatprep.subr.bf16.mxu0 %v6354_v48 }
 0xd5b   : > { %v2586_v18 = vpop.f32.mrf.mxu0 }
 0xd5c   : > { %v2898_v25 = vpack.c.bf16 %v2586_v18, %v2586_v18  ;;  %v6147_v18 = vld [vmem:[%s7582_s10 + $0x3c] sm:$0xff]  }
 0xd5d   : > { %v5800_v19 = vpop.f32.mrf.mxu0 }
 0xd5e   : > { %v5266_v19 = vld [vmem:[%s7581_s9 + $0x1] ss:$0 sm:$0xff] }
 0xd5f   : > { %v2589_v20 = vpop.f32.mrf.mxu0 }
 0xd61   : > { %v5801_v21 = vpop.f32.mrf.mxu0 }
 0xd63   : > { %v2688_v22 = vpop.f32.mrf.mxu0 }
 0xd64   : > { %v2899_v24 = vpack.c.bf16 %v2688_v22, %v2688_v22 }
 0xd65   : > { %v5812_v26 = vpop.f32.mrf.mxu0 }
 0xd66   : > { %3132 = vmatprep.mubr.bf16.mxu1 %v2899_v24 }
 0xd67   : > { %v2691_v27 = vpop.f32.mrf.mxu0  ;;  %3133 = vmatmul.mubr.bf16.vlgmr.msra.gmra.mxu1 %v2898_v25 }
 0xd68   : > { %5842 = vmatprep.mubr.msk.bf16.mxu1 %vm6355_vm2, %v6354_v48  ;;  %5839 = vmatpush3.bf16.msra.mxu1 %v3234_v57  ;;  %v6162_v57 = vld [vmem:[%s7573_s1 + $0x1e8] ss:$48 sps:$4 sm:$0x7f]  }
 0xd69   : > { %v5813_v28 = vpop.f32.mrf.mxu0  ;;  %5840 = vmatprep.subr.bf16.mxu1 %v6354_v48 }
 0xd6a   : > { %v5279_v28 = vld [vmem:[%s7583_s11 + $0x1] ss:$0 sm:$0xff] }
 0xd6b   : > { %v2790_v29 = vpop.f32.mrf.mxu0 }
 0xd6c   : > { %v2900_v58 = vpack.c.bf16 %v2790_v29, %v2790_v29 }
 0xd6d   : > { %v5824_v30 = vpop.f32.mrf.mxu0 }
 0xd6f   : > { %v2793_v10 = vpop.f32.mrf.mxu0 }
 0xd71   : > { %v5825_v32 = vpop.f32.mrf.mxu0 }
 0xd73   : > { %v2892_v34 = vpop.f32.mrf.mxu0 }
 0xd74   : > { %v2901_v35 = vpack.c.bf16 %v2892_v34, %v2892_v34 }
 0xd75   : > { %v5836_v36 = vpop.f32.mrf.mxu0 }
 0xd76   : > { %3172 = vmatprep.mubr.bf16.mxu0 %v2901_v35 }
 0xd77   : > { %v2895_v37 = vpop.f32.mrf.mxu0  ;;  %3173 = vmatmul.mubr.bf16.vlgmr.msra.gmra.mxu0 %v2900_v58 }
 0xd78   : > { %5862 = vmatprep.mubr.msk.bf16.mxu0 %vm6355_vm2, %v6354_v48  ;;  %5847 = vmatpush3.bf16.msra.mxu0 %v3327_v61  ;;  %v3644_v61 = vsel %vm777_vm1, %v6162_v57, 0 }
 0xd79   : > { %v5837_v38 = vpop.f32.mrf.mxu0  ;;  %5848 = vmatprep.subr.bf16.mxu0 %v6354_v48 }
 0xd7c   : > { %5849 = vmatpush3.bf16.msra.mxu0 %v6141_v62  ;;  %v6165_v62 = vld [vmem:[%s7573_s1 + $0x18c] ss:$48 sps:$4 sm:$0xff]  }
 0xd7d   : > { %5850 = vmatprep.subr.bf16.mxu0 %v6354_v48 }
 0xd80   : > { %5851 = vmatpush3.bf16.msra.mxu0 %v6142_v63  ;;  %v6163_v63 = vld [vmem:[%s7573_s1 + $0x188] ss:$48 sps:$4 sm:$0xff]  }
 0xd81   : > { %5852 = vmatprep.subr.bf16.mxu0 %v6354_v48 }
 0xd84   : > { %5853 = vmatpush3.bf16.msra.mxu0 %v6143_v0  ;;  %v6166_v0 = vld [vmem:[%s7573_s1 + $0x1f4] ss:$48 sps:$4 sm:$0x7f]  }
 0xd85   : > { %5854 = vmatprep.subr.bf16.mxu0 %v6354_v48 }
 0xd88   : > { %5855 = vmatpush3.bf16.msra.mxu0 %v6144_v1  ;;  %v6168_v1 = vld [vmem:[%s7573_s1 + $0x1f0] ss:$48 sps:$4 sm:$0x7f]  }
 0xd89   : > { %5856 = vmatprep.subr.bf16.mxu0 %v6354_v48 }
 0xd8c   : > { %5857 = vmatpush3.bf16.msra.mxu0 %v6145_v2  ;;  %v3650_v2 = vsel %vm777_vm1, %v6168_v1, 0 }
 0xd8d   : > { %5858 = vmatprep.subr.bf16.mxu0 %v6354_v48 }
 0xd90   : > { %5859 = vmatpush3.bf16.msra.mxu0 %v6146_v16  ;;  %v6183_v16 = vld [vmem:[%s7573_s1 + $0x1ac] ss:$48 sps:$4 sm:$0xff]  }
 0xd91   : > { %5860 = vmatprep.subr.bf16.mxu0 %v6354_v48 }
 0xd94   : > { %5861 = vmatpush3.bf16.msra.mxu0 %v6147_v18  ;;  %v6181_v18 = vld [vmem:[%s7573_s1 + $0x1a8] ss:$48 sps:$4 sm:$0xff]  }
 0xe27   : > { %v5599_v39 = vpop.f32.mrf.mxu1 }
 0xe29   : > { %v5600_v60 = vpop.f32.mrf.mxu1 }
 0xe2a   : > { %v5601_v42 = vadd.f32 %v5600_v60, %v5599_v39 }
 0xe2b   : > { %v5602_v40 = vpop.f32.mrf.mxu1 }
 0xe2c   : > { %v3135_v45 = vadd.f32 %v5601_v42, %v5229_v43  ;;  %v6148_v40 = vld [vmem:[%s7573_s1 + $0x1e4] ss:$48 sps:$4 sm:$0x7f]   ;;  %v6152_v42 = vld [vmem:[%s7573_s1 + $0x1e0] ss:$48 sps:$4 sm:$0x7f]  }
 0xe2d   : > { %v5603_v41 = vpop.f32.mrf.mxu1  ;;  %v6153_v43 = vld [vmem:[%s7573_s1 + $0x200] ss:$48 sps:$4 sm:$0x7f]  }
 0xe2e   : > { %v6150_v41 = vld [vmem:[%s7573_s1 + $0x204] ss:$48 sps:$4 sm:$0x7f]  }
 0xe2f   : > { %5426 = vmatprep.subr.msk.bf16.mxu0 %vm777_vm1, %v6150_v41 }
 0xe37   : > { %v5621_v44 = vpop.f32.mrf.mxu0 }
 0xe39   : > { %v5622_v6 = vpop.f32.mrf.mxu0 }
 0xe3a   : > { %v5623_v46 = vadd.f32 %v5622_v6, %v5621_v44  ;;  %v3638_v44 = vsel %vm777_vm1, %v6152_v42, 0  ;;  %v3662_v6 = vsel %vm777_vm1, %v6153_v43, 0 }
 0xe3b   : > { %v5624_v47 = vpop.f32.mrf.mxu0 }
 0xe3c   : > { %v3175_v49 = vadd.f32 %v5623_v46, %v3135_v45  ;;  %v6156_v45 = vld [vmem:[%s7573_s1 + $0x184] ss:$48 sps:$4 sm:$0xff]   ;;  %v6154_v46 = vld [vmem:[%s7573_s1 + $0x180] ss:$48 sps:$4 sm:$0xff]  }
 0xe3d   : > { %v5625_v50 = vpop.f32.mrf.mxu0  ;;  %v6157_v47 = vld [vmem:[%s7573_s1 + $0x1a0] ss:$48 sps:$4 sm:$0xff]  }
 0xe3e   : > { %v7107_v31 = vadd.f32 %v3175_v49, %v6835_v15  ;;  %v6139_v15 = vld [vmem:[%s7580_s8 + $0x10] sm:$0xff]   ;;  %v6160_v50 = vld [vmem:[%s7573_s1 + $0x1ec] ss:$48 sps:$4 sm:$0x7f]  }
 0xe3f   : > { %5841 = vmatpush3.bf16.msra.mxu1 %v6139_v15  ;;  %v6159_v49 = vld [vmem:[%s7573_s1 + $0x1a4] ss:$48 sps:$4 sm:$0xff]  }
 0xe40   : > { %v3185_v51 = vsel %vm636_vm0, %v7107_v31, 0.0  ;;  %5418 = vmatprep.subr.msk.bf16.mxu1 %vm777_vm1, %v6148_v40 }
 0xe41   : > { %3186 = vadd.xlane.f32.xlu0 %v3185_v51 }
 0xeca   : > { %v3187_v52 = vpop.xlane.xlu0 %3186 }
 0xecb   : > { %v3188_v53 = vmul.f32 0.033333335, %v3187_v52 }
 0xecd   : > { %v3189_v54 = vsub.f32 %v7107_v31, %v3188_v53 }
 0xecf   : > { %v3190_v33 = vmul.f32 %v3189_v54, %v3189_v54 }
 0xed1   : > { %v3191_v55 = vsel %vm636_vm0, %v3190_v33, 0.0 }
 0xed2   : > { %3192 = vadd.xlane.f32.xlu1 %v3191_v55  ;;  %v5393_v55 = vld [vmem:[%s7577_s5 + $0x2] ss:$0 sm:$0xff] }
 0xf5b   : > { %v3193_v3 = vpop.xlane.xlu1 %3192 }
 0xf5c   : > { %v3194_v4 = vmul.f32 0.033333335, %v3193_v3  ;;  %v6171_v3 = vld [vmem:[%s7573_s1 + $0x194] ss:$48 sps:$4 sm:$0xff]  }
 0xf5e   : > { %v3195_v5 = vadd.f32 1e-05, %v3194_v4  ;;  %v6169_v4 = vld [vmem:[%s7573_s1 + $0x190] ss:$48 sps:$4 sm:$0xff]  }
 0xf60   : > { %6266 = vrsqrt.f32 %v3195_v5  ;;  %v6172_v5 = vld [vmem:[%s7573_s1 + $0x1fc] ss:$48 sps:$4 sm:$0x7f]  }
 0xf6d   : > { %v6267_v7 = vpop.eup %6266 }
 0xf6e   : > { %v3197_v9 = vmul.f32 %v6267_v7, %v3189_v54  ;;  %v5392_v54 = vld [vmem:[%s7576_s4 + $0x2] ss:$0 sm:$0xff]  ;;  %v6174_v7 = vld [vmem:[%s7573_s1 + $0x1f8] ss:$48 sps:$4 sm:$0x7f]  }
 0xf70   : > { %v3204_v12 = vmul.f32 %v5264_v8, %v3197_v9  ;;  %v3656_v8 = vsel %vm777_vm1, %v6174_v7, 0  ;;  %v6177_v9 = vld [vmem:[%s7573_s1 + $0x19c] ss:$48 sps:$4 sm:$0xff]  }
 0xf72   : > { %v3211_v13 = vadd.f32 %v5265_v11, %v3204_v12  ;;  %v6175_v11 = vld [vmem:[%s7573_s1 + $0x198] ss:$48 sps:$4 sm:$0xff]   ;;  %v6178_v12 = vld [vmem:[%s7573_s1 + $0x20c] ss:$48 sps:$4 sm:$0x7f]  }
 0xf74   : > { %v3212_v14 = vpack.c.bf16 %v3211_v13, %v3211_v13  ;;  %v6180_v13 = vld [vmem:[%s7573_s1 + $0x208] ss:$48 sps:$4 sm:$0x7f]  }
 0xf76   : > { %5843 = vmatmul.mubr.msk.bf16.vlgmr.msra.gmra.mxu1 %vm636_vm0, %v3212_v14  ;;  %v3668_v14 = vsel %vm777_vm1, %v6180_v13, 0 }
 0xf77   : > { %3705 = vmatprep.mubr.bf16.mxu1 %v6353_v17  ;;  %3686 = vmatpush1.bf16.msra.mxu1 %v3638_v44 }
 0xf78   : > { %3687 = vmatprep.subr.bf16.mxu1 %v6156_v45 }
 0xf7b   : > { %3688 = vmatpush1.bf16.msra.mxu1 %v6154_v46 }
 0xf7c   : > { %5420 = vmatprep.subr.msk.bf16.mxu1 %vm777_vm1, %v6160_v50 }
0x1036   : > { %v3270_v20 = vpop.f32.mrf.mxu1 }
0x1037   : > { %v3271_v21 = vadd.f32 %v5266_v19, %v3270_v20 }
0x1038   : > { %v5844_v22 = vpop.f32.mrf.mxu1 }
0x1039   : > { %v3276_v24 = vmax.f32 %v3271_v21, 0.0 }
0x103a   : > { %v3273_v25 = vpop.f32.mrf.mxu1 }
0x103b   : > { %v3277_v26 = vpack.c.bf16 %v3276_v24, %v3276_v24 }
0x103c   : > { %v5845_v27 = vpop.f32.mrf.mxu1 }
0x103d   : > { %5863 = vmatmul.mubr.msk.bf16.vlgmr.msra.gmra.mxu0 %vm1893_vm6, %v3277_v26 }
0x103e   : > { %3869 = vmatprep.mubr.bf16.mxu0 %v6353_v17  ;;  %3850 = vmatpush1.bf16.msra.mxu0 %v3662_v6 }
0x103f   : > { %3851 = vmatprep.subr.bf16.mxu0 %v6159_v49 }
0x1042   : > { %3852 = vmatpush1.bf16.msra.mxu0 %v6157_v47 }
0x1043   : > { %5866 = vmatprep.subr.bf16.mxu0 %v6354_v48 }
0x10fd   : > { %v3363_v29 = vpop.f32.mrf.mxu0 }
0x10fe   : > { %v3369_v30 = vadd.f32 %v3363_v29, %v7107_v31 }
0x10ff   : > { %v5864_v10 = vpop.f32.mrf.mxu0 }
0x1100   : > { %v7170_v32 = vadd.f32 %v5279_v28, %v3369_v30 }
0x1101   : > { %v3366_v34 = vpop.f32.mrf.mxu0 }
0x1102   : > { %v3498_v35 = vsel %vm636_vm0, %v7170_v32, 0.0 }
0x1103   : > { %3499 = vadd.xlane.f32.xlu0 %v3498_v35  ;;  %v5865_v58 = vpop.f32.mrf.mxu0 }
0x118c   : > { %v3500_v36 = vpop.xlane.xlu0 %3499 }
0x118d   : > { %v3501_v37 = vmul.f32 0.033333335, %v3500_v36 }
0x118f   : > { %v3502_v38 = vsub.f32 %v7170_v32, %v3501_v37 }
0x1191   : > { %v3503_v39 = vmul.f32 %v3502_v38, %v3502_v38 }
0x1193   : > { %v3504_v60 = vsel %vm636_vm0, %v3503_v39, 0.0 }
0x1194   : > { %3505 = vadd.xlane.f32.xlu1 %v3504_v60 }
0x121d   : > { %v3506_v31 = vpop.xlane.xlu1 %3505 }
0x121e   : > { %v3507_v51 = vmul.f32 0.033333335, %v3506_v31 }
0x1220   : > { %v3508_v52 = vadd.f32 1e-05, %v3507_v51 }
0x1222   : > { %6268 = vrsqrt.f32 %v3508_v52 }
0x122f   : > { %v6269_v53 = vpop.eup %6268 }
0x1230   : > { %v3510_v33 = vmul.f32 %v6269_v53, %v3502_v38 }
0x1232   : > { %v3517_v56 = vmul.f32 %v5392_v54, %v3510_v33 }
0x1234   : > { %v3524_v15 = vadd.f32 %v5393_v55, %v3517_v56 }
0x1236   : > { %v3525_v59 = vpack.c.bf16 %v3524_v15, %v3524_v15 }
0x1238   : > { %5419 = vmatmul.mubr.msk.bf16.vlgmr.msra.gmra.mxu1 %vm636_vm0, %v3525_v59  ;;  %5427 = vmatmul.mubr.msk.bf16.vlgmr.msra.gmra.mxu0 %vm636_vm0, %v3525_v59 }
0x1239   : > { %3727 = vmatpush1.bf16.msra.mxu1 %v3644_v61  ;;  %3746 = vmatprep.mubr.bf16.mxu1 %v6353_v17 }
0x123a   : > { %3728 = vmatprep.subr.bf16.mxu1 %v6165_v62  ;;  %5868 = vmatprep.mubr.msk.bf16.mxu0 %vm6355_vm2, %v6354_v48 }
0x123d   : > { %3729 = vmatpush1.bf16.msra.mxu1 %v6163_v63 }
0x123e   : > { %5422 = vmatprep.subr.msk.bf16.mxu1 %vm777_vm1, %v6166_v0 }
0x1240   : > { %5421 = vmatmul.mubr.msk.bf16.vlgmr.msra.gmra.mxu1 %vm636_vm0, %v3525_v59 }
0x1241   : > { %3768 = vmatpush1.bf16.msra.mxu1 %v3650_v2  ;;  %3787 = vmatprep.mubr.bf16.mxu1 %v6353_v17 }
0x1242   : > { %3769 = vmatprep.subr.bf16.mxu1 %v6171_v3 }
0x1245   : > { %3770 = vmatpush1.bf16.msra.mxu1 %v6169_v4 }
0x1246   : > { %5424 = vmatprep.subr.msk.bf16.mxu1 %vm777_vm1, %v6172_v5 }
0x1248   : > { %5423 = vmatmul.mubr.msk.bf16.vlgmr.msra.gmra.mxu1 %vm636_vm0, %v3525_v59 }
0x1249   : > { %3809 = vmatpush1.bf16.msra.mxu1 %v3656_v8  ;;  %3828 = vmatprep.mubr.bf16.mxu1 %v6353_v17 }
0x124a   : > { %3810 = vmatprep.subr.bf16.mxu1 %v6177_v9 }
0x124d   : > { %3811 = vmatpush1.bf16.msra.mxu1 %v6175_v11 }
0x124e   : > { %5428 = vmatprep.subr.msk.bf16.mxu1 %vm777_vm1, %v6178_v12 }
0x1250   : > { %5425 = vmatmul.mubr.msk.bf16.vlgmr.msra.gmra.mxu1 %vm636_vm0, %v3525_v59 }
0x1251   : > { %3891 = vmatpush1.bf16.msra.mxu1 %v3668_v14  ;;  %3910 = vmatprep.mubr.bf16.mxu1 %v6353_v17 }
0x1252   : > { %3892 = vmatprep.subr.bf16.mxu1 %v6183_v16 }
0x1255   : > { %3893 = vmatpush1.bf16.msra.mxu1 %v6181_v18 }
0x1256   : > { %5872 = vmatprep.subr.bf16.mxu1 %v6354_v48 }
0x1258   : > { %5429 = vmatmul.mubr.msk.bf16.vlgmr.msra.gmra.mxu1 %vm636_vm0, %v3525_v59 }
0x1259   : > { %5874 = vmatprep.mubr.msk.bf16.mxu1 %vm6355_vm2, %v6354_v48 }
0x12f8   : > { %v3707_v19 = vpop.f32.mrf.mxu1  ;;  %v3871_v20 = vpop.f32.mrf.mxu0 }
0x12f9   : > { %v3974_v21 = vpack.c.bf16 %v3871_v20, %v3871_v20  ;;  %v3919_v39 = vpack.c.bf16 %v3707_v19, %v3707_v19 }
0x12fa   : > { %v3709_v22 = vpop.f32.mrf.mxu1  ;;  %v7282_v24 = vpop.f32.mrf.mxu0 }
0x12fb   : > { %v3979_v25 = vsel %vm1120_vm3, %v3974_v21, 0  ;;  %v4021_v44 = vpack.c.bf16 %v3709_v22, %v3709_v22 }
0x12fc   : > { %v3711_v26 = vpop.f32.mrf.mxu1  ;;  %v3875_v27 = vpop.f32.mrf.mxu0  ;;  %5873 = vmatpush3.bf16.msra.mxu1 %v3979_v25 }
0x12fd   : > { %5884 = vmatprep.subr.bf16.mxu1 %v6354_v48 }
0x12fe   : > { %v3712_v17 = vpop.f32.mrf.mxu1  ;;  %v3876_v28 = vpop.f32.mrf.mxu0 }
0x1300   : > { %v3748_v29 = vpop.f32.mrf.mxu1 }
0x1301   : > { %v4123_v50 = vpack.c.bf16 %v3748_v29, %v3748_v29 }
0x1302   : > { %v3750_v30 = vpop.f32.mrf.mxu1 }
0x1303   : > { %v4225_v51 = vpack.c.bf16 %v3750_v30, %v3750_v30 }
0x1304   : > { %v3752_v10 = vpop.f32.mrf.mxu1 }
0x1306   : > { %v3753_v34 = vpop.f32.mrf.mxu1 }
0x1308   : > { %v3789_v35 = vpop.f32.mrf.mxu1 }
0x1309   : > { %v3920_v58 = vpack.c.bf16 %v3789_v35, %v3789_v35 }
0x130a   : > { %v3791_v36 = vpop.f32.mrf.mxu1 }
0x130b   : > { %5867 = vmatpush3.bf16.xpose.msra.mxu0 %v3920_v58  ;;  %v4022_v40 = vpack.c.bf16 %v3791_v36, %v3791_v36 }
0x130c   : > { %v3793_v37 = vpop.f32.mrf.mxu1  ;;  %5878 = vmatprep.subr.bf16.mxu0 %v6354_v48 }
0x130d   : > { %v6184_v37 = vld [vmem:[%s7574_s2 + $0x278] sm:$0xff]  }
0x130e   : > { %v3794_v38 = vpop.f32.mrf.mxu1 }
0x130f   : > { %v6185_v38 = vld [vmem:[%s7574_s2 + $0x238] sm:$0xff]  }
0x1310   : > { %v3830_v60 = vpop.f32.mrf.mxu1 }
0x1311   : > { %v4124_v45 = vpack.c.bf16 %v3830_v60, %v3830_v60  ;;  %v6187_v60 = vld [vmem:[%s7574_s2 + $0x230] sm:$0xff]  }
0x1312   : > { %v3832_v41 = vpop.f32.mrf.mxu1  ;;  %5869 = vmatmul.mubr.bf16.vlgmr.msra.gmra.mxu0 %v3919_v39  ;;  %v6186_v39 = vld [vmem:[%s7574_s2 + $0x270] sm:$0xff]  }
0x1313   : > { %5879 = vmatpush3.bf16.xpose.msra.mxu0 %v4022_v40  ;;  %5880 = vmatprep.mubr.msk.bf16.mxu0 %vm6355_vm2, %v6354_v48  ;;  %v4226_v31 = vpack.c.bf16 %v3832_v41, %v3832_v41  ;;  %v6188_v40 = vld [vmem:[%s7574_s2 + $0x268] sm:$0xff]  }
0x1314   : > { %v3834_v42 = vpop.f32.mrf.mxu1  ;;  %5890 = vmatprep.subr.bf16.mxu0 %v6354_v48  ;;  %v6189_v41 = vld [vmem:[%s7574_s2 + $0x228] sm:$0xff]  }
0x1315   : > { %v6190_v42 = vld [vmem:[%s7574_s2 + $0x260] sm:$0xff]  }
0x1316   : > { %v3835_v43 = vpop.f32.mrf.mxu1 }
0x1317   : > { %v6191_v43 = vld [vmem:[%s7574_s2 + $0x220] sm:$0xff]  }
0x1318   : > { %v7290_v6 = vpop.f32.mrf.mxu1 }
0x131a   : > { %v7292_v46 = vpop.f32.mrf.mxu1  ;;  %5881 = vmatmul.mubr.bf16.vlgmr.msra.gmra.mxu0 %v4021_v44  ;;  %v6192_v44 = vld [vmem:[%s7574_s2 + $0x258] sm:$0xff]  }
0x131b   : > { %5891 = vmatpush3.bf16.xpose.msra.mxu0 %v4124_v45  ;;  %5892 = vmatprep.mubr.msk.bf16.mxu0 %vm6355_vm2, %v6354_v48  ;;  %v6194_v45 = vld [vmem:[%s7574_s2 + $0x218] sm:$0xff]  }
0x131c   : > { %v3916_v47 = vpop.f32.mrf.mxu1  ;;  %5902 = vmatprep.subr.bf16.mxu0 %v6354_v48 }
0x131e   : > { %v3917_v49 = vpop.f32.mrf.mxu1 }
0x1322   : > { %5893 = vmatmul.mubr.bf16.vlgmr.msra.gmra.mxu0 %v4123_v50 }
0x1323   : > { %5903 = vmatpush3.bf16.xpose.msra.mxu0 %v4226_v31  ;;  %5904 = vmatprep.mubr.msk.bf16.mxu0 %vm6355_vm2, %v6354_v48  ;;  %v4076_v31 = vpack.c.bf16 %v7282_v24, %v7282_v24 }
0x1324   : > { %5655 = vmatprep.subr.bf16.mxu0 %v6184_v37 }
0x132a   : > { %5905 = vmatmul.mubr.bf16.vlgmr.msra.gmra.mxu0 %v4225_v51 }
0x132b   : > { %5656 = vmatpush3.bf16.msra.mxu0 %v6185_v38 }
0x132c   : > { %5657 = vmatprep.subr.bf16.mxu0 %v6186_v39 }
0x132f   : > { %5658 = vmatpush3.bf16.msra.mxu0 %v6187_v60 }
0x1330   : > { %5659 = vmatprep.subr.bf16.mxu0 %v6188_v40 }
0x1333   : > { %5660 = vmatpush3.bf16.msra.mxu0 %v6189_v41 }
0x1334   : > { %5661 = vmatprep.subr.bf16.mxu0 %v6190_v42 }
0x1337   : > { %5662 = vmatpush3.bf16.msra.mxu0 %v6191_v43 }
0x1338   : > { %5663 = vmatprep.subr.bf16.mxu0 %v6192_v44 }
0x133b   : > { %5664 = vmatpush3.bf16.msra.mxu0 %v6194_v45 }
0x13d2   : > { %v3955_v52 = vpop.f32.mrf.mxu0 }
0x13d3   : > { %v3961_v53 = vsel %vm6625_vm4, %v3955_v52, -1e+30 }
0x13d4   : > { %v5870_v54 = vpop.f32.mrf.mxu0  ;;  %v3962_v33 = vsel %vm1103_vm5, %v3961_v53, -inf }
0x13d5   : > { %3963 = vmax.xlane.f32.xlu0 %v3962_v33  ;;  %v4081_v54 = vsel %vm1120_vm3, %v4076_v31, 0 }
0x13d6   : > { %v3958_v55 = vpop.f32.mrf.mxu0 }
0x13d7   : > { %v4178_v55 = vpack.c.bf16 %v7290_v6, %v7290_v6 }
0x13d8   : > { %v5871_v56 = vpop.f32.mrf.mxu0 }
0x13da   : > { %v4057_v57 = vpop.f32.mrf.mxu0 }
0x13db   : > { %v4063_v15 = vsel %vm6625_vm4, %v4057_v57, -1e+30 }
0x13dc   : > { %v5882_v59 = vpop.f32.mrf.mxu0  ;;  %v4064_v61 = vsel %vm1103_vm5, %v4063_v15, -inf }
0x13dd   : > { %4065 = vmax.xlane.f32.xlu1 %v4064_v61  ;;  %v4280_v61 = vpack.c.bf16 %v7292_v46, %v7292_v46  ;;  %v6195_v46 = vld [vmem:[%s7574_s2 + $0x2b8] sm:$0xff]  }
0x13de   : > { %v4060_v62 = vpop.f32.mrf.mxu0 }
0x13e0   : > { %v5883_v63 = vpop.f32.mrf.mxu0 }
0x13e1   : > { %v6193_v63 = vld [vmem:[%s7574_s2 + $0x2f8] sm:$0xff]  }
0x13e2   : > { %v4159_v0 = vpop.f32.mrf.mxu0 }
0x13e3   : > { %v4165_v1 = vsel %vm6625_vm4, %v4159_v0, -1e+30  ;;  %v4285_v0 = vsel %vm1120_vm3, %v4280_v61, 0 }
0x13e4   : > { %v5894_v2 = vpop.f32.mrf.mxu0  ;;  %v4166_v3 = vsel %vm1103_vm5, %v4165_v1, -inf }
0x13e5   : > { %4167 = vmax.xlane.f32.xlu0 %v4166_v3 }
0x13e6   : > { %v4162_v4 = vpop.f32.mrf.mxu0 }
0x13e7   : > { %v6196_v4 = vld [vmem:[%s7574_s2 + $0x250] sm:$0xff]  }
0x13e8   : > { %v5895_v5 = vpop.f32.mrf.mxu0  ;;  %5665 = vmatprep.subr.bf16.mxu0 %v6196_v4  ;;  %v6218_v4 = vld [vmem:[%s7582_s10 + $0xb0] ss:$0 sps:$4 sm:$0xff]  }
0x13e9   : > { %v6197_v5 = vld [vmem:[%s7574_s2 + $0x2f0] sm:$0xff]  }
0x13ea   : > { %v4261_v7 = vpop.f32.mrf.mxu0 }
0x13eb   : > { %v4267_v8 = vsel %vm6625_vm4, %v4261_v7, -1e+30  ;;  %v6198_v7 = vld [vmem:[%s7574_s2 + $0x210] sm:$0xff]  }
0x13ec   : > { %v5906_v9 = vpop.f32.mrf.mxu0  ;;  %v4268_v11 = vsel %vm1103_vm5, %v4267_v8, -inf  ;;  %5666 = vmatpush3.bf16.msra.mxu0 %v6198_v7  ;;  %v6219_v7 = vld [vmem:[%s7582_s10 + $0xa8] sm:$0xff]  }
0x13ed   : > { %4269 = vmax.xlane.f32.xlu1 %v4268_v11  ;;  %v6200_v9 = vld [vmem:[%s7574_s2 + $0x248] sm:$0xff]  }
0x13ee   : > { %v4264_v12 = vpop.f32.mrf.mxu0  ;;  %v6201_v11 = vld [vmem:[%s7574_s2 + $0x2e8] sm:$0xff]   ;;  %5667 = vmatprep.subr.bf16.mxu0 %v6200_v9  ;;  %v6221_v9 = vld [vmem:[%s7582_s10 + $0x98] sm:$0xff]  }
0x13ef   : > { %v6202_v12 = vld [vmem:[%s7574_s2 + $0x208] sm:$0xff]  }
0x13f0   : > { %v5907_v13 = vpop.f32.mrf.mxu0  ;;  %5668 = vmatpush3.bf16.msra.mxu0 %v6202_v12  ;;  %v6223_v12 = vld [vmem:[%s7582_s10 + $0x88] sm:$0xff]  }
0x13f1   : > { %v6203_v13 = vld [vmem:[%s7574_s2 + $0x2a8] sm:$0xff]  }
0x145e   : > { %v3964_v14 = vpop.xlane.xlu0 %3963 }
0x145f   : > { %v3965_v16 = vsub.f32 %v3961_v53, %v3964_v14  ;;  %v6204_v14 = vld [vmem:[%s7574_s2 + $0x240] sm:$0xff]  }
0x1460   : > { %5669 = vmatprep.subr.bf16.mxu0 %v6204_v14 }
0x1461   : > { %v3966_v18 = vmul.f32 1.442695, %v3965_v16  ;;  %v6205_v16 = vld [vmem:[%s7574_s2 + $0x2e0] sm:$0xff]  }
0x1463   : > { %6270 = vpow2.f32 %v3966_v18  ;;  %v6206_v18 = vld [vmem:[%s7574_s2 + $0x200] sm:$0xff]  }
0x1464   : > { %5670 = vmatpush3.bf16.msra.mxu0 %v6206_v18 }
0x1465   : > { %5914 = vmatprep.subr.bf16.mxu0 %v6354_v48 }
0x1466   : > { %v4066_v19 = vpop.xlane.xlu1 %4065 }
0x1467   : > { %v4067_v20 = vsub.f32 %v4063_v15, %v4066_v19  ;;  %v4183_v15 = vsel %vm1120_vm3, %v4178_v55, 0  ;;  %v6207_v19 = vld [vmem:[%s7574_s2 + $0x2a0] sm:$0xff]  }
0x1469   : > { %v4068_v21 = vmul.f32 1.442695, %v4067_v20  ;;  %v6208_v20 = vld [vmem:[%s7574_s2 + $0x2d8] sm:$0xff]  }
0x146b   : > { %6272 = vpow2.f32 %v4068_v21  ;;  %v6209_v21 = vld [vmem:[%s7574_s2 + $0x298] sm:$0xff]  }
0x146e   : > { %v4168_v22 = vpop.xlane.xlu0 %4167 }
0x146f   : > { %v4169_v25 = vsub.f32 %v4165_v1, %v4168_v22  ;;  %v6210_v22 = vld [vmem:[%s7574_s2 + $0x2d0] sm:$0xff]  }
0x1470   : > { %v6271_v26 = vpop.eup %6270 }
0x1471   : > { %v4170_v27 = vmul.f32 1.442695, %v4169_v25  ;;  %v3968_v23 = vsel %vm1103_vm5, %v6271_v26, 0.0  ;;  %v6211_v25 = vld [vmem:[%s7574_s2 + $0x290] sm:$0xff]  }
0x1472   : > { %3969 = vadd.xlane.f32.xlu0 %v3968_v23  ;;  %v6214_v23 = vld [vmem:[%s7574_s2 + $0x2c0] sm:$0xff]  }
0x1473   : > { %6274 = vpow2.f32 %v4170_v27  ;;  %v6213_v27 = vld [vmem:[%s7574_s2 + $0x288] sm:$0xff]  }
0x1476   : > { %v4270_v17 = vpop.xlane.xlu1 %4269 }
0x1477   : > { %v4271_v28 = vsub.f32 %v4267_v8, %v4270_v17  ;;  %v6199_v8 = vld [vmem:[%s7574_s2 + $0x2b0] sm:$0xff]   ;;  %v6215_v17 = vld [vmem:[%s7574_s2 + $0x280] sm:$0xff]  }
0x1478   : > { %v6273_v29 = vpop.eup %6272 }
0x1479   : > { %v4272_v30 = vmul.f32 1.442695, %v4271_v28  ;;  %v4070_v10 = vsel %vm1103_vm5, %v6273_v29, 0.0 }
0x147a   : > { %4071 = vadd.xlane.f32.xlu1 %v4070_v10 }
0x147b   : > { %6276 = vpow2.f32 %v4272_v30 }
0x1480   : > { %v6275_v34 = vpop.eup %6274 }
0x1481   : > { %v4172_v35 = vsel %vm1103_vm5, %v6275_v34, 0.0 }
0x1482   : > { %4173 = vadd.xlane.f32.xlu0 %v4172_v35 }
0x1488   : > { %v6277_v58 = vpop.eup %6276 }
0x1489   : > { %v4274_v36 = vsel %vm1103_vm5, %v6277_v58, 0.0 }
0x148a   : > { %4275 = vadd.xlane.f32.xlu1 %v4274_v36 }
0x14fb   : > { %v3970_v47 = vpop.xlane.xlu0 %3969 }
0x14fc   : > { %6278 = vrcp.f32 %v3970_v47 }
0x1503   : > { %v4072_v49 = vpop.xlane.xlu1 %4071 }
0x1504   : > { %6280 = vrcp.f32 %v4072_v49 }
0x1509   : > { %v6279_v50 = vpop.eup %6278 }
0x150a   : > { %v3972_v51 = vmul.f32 %v6279_v50, %v6271_v26  ;;  %v6212_v26 = vld [vmem:[%s7574_s2 + $0x2c8] sm:$0xff]  }
0x150b   : > { %v4174_v52 = vpop.xlane.xlu0 %4173 }
0x150c   : > { %6282 = vrcp.f32 %v4174_v52  ;;  %v3973_v53 = vpack.c.bf16 %v3972_v51, %v3972_v51 }
0x150e   : > { %5875 = vmatmul.mubr.msk.bf16.vlgmr.msra.gmra.mxu1 %vm1103_vm5, %v3973_v53 }
0x150f   : > { %5885 = vmatpush3.bf16.msra.mxu1 %v4081_v54  ;;  %5886 = vmatprep.mubr.msk.bf16.mxu1 %vm6355_vm2, %v6354_v48  ;;  %v5434_v54 = vld [vmem:[%s7575_s3 + $0x2] ss:$0 sm:$0xff] }
0x1510   : > { %5896 = vmatprep.subr.bf16.mxu1 %v6354_v48 }
0x1511   : > { %v6281_v33 = vpop.eup %6280 }
0x1512   : > { %v4074_v56 = vmul.f32 %v6281_v33, %v6273_v29 }
0x1513   : > { %v4276_v24 = vpop.xlane.xlu1 %4275 }
0x1514   : > { %6284 = vrcp.f32 %v4276_v24  ;;  %v4075_v57 = vpack.c.bf16 %v4074_v56, %v4074_v56 }
0x1516   : > { %5887 = vmatmul.mubr.msk.bf16.vlgmr.msra.gmra.mxu1 %vm1103_vm5, %v4075_v57 }
0x1517   : > { %5897 = vmatpush3.bf16.msra.mxu1 %v4183_v15  ;;  %5898 = vmatprep.mubr.msk.bf16.mxu1 %vm6355_vm2, %v6354_v48 }
0x1518   : > { %5908 = vmatprep.subr.bf16.mxu1 %v6354_v48 }
0x1519   : > { %v6283_v59 = vpop.eup %6282 }
0x151a   : > { %v4176_v62 = vmul.f32 %v6283_v59, %v6275_v34 }
0x151c   : > { %v4177_v6 = vpack.c.bf16 %v4176_v62, %v4176_v62 }
0x151e   : > { %5899 = vmatmul.mubr.msk.bf16.vlgmr.msra.gmra.mxu1 %vm1103_vm5, %v4177_v6 }
0x151f   : > { %5909 = vmatpush3.bf16.msra.mxu1 %v4285_v0  ;;  %5910 = vmatprep.mubr.msk.bf16.mxu1 %vm6355_vm2, %v6354_v48 }
0x1520   : > { %5677 = vmatprep.subr.bf16.mxu1 %v6193_v63 }
0x1521   : > { %v6285_v1 = vpop.eup %6284 }
0x1522   : > { %v4278_v2 = vmul.f32 %v6285_v1, %v6277_v58 }
0x1524   : > { %v4279_v3 = vpack.c.bf16 %v4278_v2, %v4278_v2 }
0x1526   : > { %5911 = vmatmul.mubr.msk.bf16.vlgmr.msra.gmra.mxu1 %vm1103_vm5, %v4279_v3 }
0x1527   : > { %5678 = vmatpush3.bf16.msra.mxu1 %v6195_v46  ;;  %v6216_v46 = vld [vmem:[%s7580_s8 + $0x28] sm:$0x7f]  }
0x1528   : > { %5679 = vmatprep.subr.bf16.mxu1 %v6197_v5  ;;  %v4663_v3 = vsel %vm777_vm1, %v6216_v46, 0  ;;  %v4756_v5 = vsel %vm1120_vm3, %v6218_v4, 0 }
0x152b   : > { %5680 = vmatpush3.bf16.msra.mxu1 %v6199_v8  ;;  %v6220_v8 = vld [vmem:[%s7582_s10 + $0xa0] sm:$0xff]  }
0x152c   : > { %5681 = vmatprep.subr.bf16.mxu1 %v6201_v11  ;;  %v6222_v11 = vld [vmem:[%s7582_s10 + $0x90] sm:$0xff]  }
0x152f   : > { %5682 = vmatpush3.bf16.msra.mxu1 %v6203_v13 }
0x1530   : > { %5683 = vmatprep.subr.bf16.mxu1 %v6205_v16 }
0x1533   : > { %5684 = vmatpush3.bf16.msra.mxu1 %v6207_v19  ;;  %v5469_v19 = vld [vmem:[%s7578_s6 + $0x2] ss:$0 sm:$0xff] }
0x1534   : > { %5685 = vmatprep.subr.bf16.mxu1 %v6208_v20 }
0x1537   : > { %5686 = vmatpush3.bf16.msra.mxu1 %v6209_v21  ;;  %v5470_v21 = vld [vmem:[%s7579_s7 + $0x2] ss:$0 sm:$0xff] }
0x1538   : > { %5687 = vmatprep.subr.bf16.mxu1 %v6210_v22 }
0x153b   : > { %5688 = vmatpush3.bf16.msra.mxu1 %v6211_v25 }
0x153c   : > { %5689 = vmatprep.subr.bf16.mxu1 %v6212_v26 }
0x153f   : > { %5690 = vmatpush3.bf16.msra.mxu1 %v6213_v27  ;;  %v6224_v27 = vld [vmem:[%s7582_s10 + $0x80] sm:$0xff]  }
0x1540   : > { %5691 = vmatprep.subr.bf16.mxu1 %v6214_v23  ;;  %v6225_v23 = vld [vmem:[%s7582_s10 + $0x78] sm:$0xff]  }
0x1543   : > { %5692 = vmatpush3.bf16.msra.mxu1 %v6215_v17  ;;  %v5471_v17 = vld [vmem:[%s7581_s9 + $0x2] ss:$0 sm:$0xff] }
0x1544   : > { %5922 = vmatprep.subr.bf16.mxu1 %v6354_v48 }
0x15ce   : > { %v4015_v28 = vpop.f32.mrf.mxu1 }
0x15cf   : > { %v4327_v58 = vpack.c.bf16 %v4015_v28, %v4015_v28 }
0x15d0   : > { %v5876_v29 = vpop.f32.mrf.mxu1 }
0x15d2   : > { %v4018_v30 = vpop.f32.mrf.mxu1 }
0x15d4   : > { %v5877_v10 = vpop.f32.mrf.mxu1 }
0x15d6   : > { %v4117_v34 = vpop.f32.mrf.mxu1 }
0x15d7   : > { %v4328_v35 = vpack.c.bf16 %v4117_v34, %v4117_v34 }
0x15d8   : > { %v5888_v36 = vpop.f32.mrf.mxu1 }
0x15d9   : > { %4561 = vmatprep.mubr.bf16.mxu0 %v4328_v35 }
0x15da   : > { %v4120_v37 = vpop.f32.mrf.mxu1  ;;  %4562 = vmatmul.mubr.bf16.vlgmr.msra.gmra.mxu0 %v4327_v58 }
0x15db   : > { %5918 = vmatprep.mubr.msk.bf16.mxu0 %vm6355_vm2, %v6354_v48  ;;  %5915 = vmatpush3.bf16.msra.mxu0 %v4663_v3  ;;  %v5484_v37 = vld [vmem:[%s7583_s11 + $0x2] ss:$0 sm:$0xff] }
0x15dc   : > { %v5889_v38 = vpop.f32.mrf.mxu1  ;;  %5916 = vmatprep.subr.bf16.mxu0 %v6354_v48 }
0x15de   : > { %v4219_v39 = vpop.f32.mrf.mxu1 }
0x15df   : > { %v4329_v44 = vpack.c.bf16 %v4219_v39, %v4219_v39 }
0x15e0   : > { %v5900_v60 = vpop.f32.mrf.mxu1 }
0x15e2   : > { %v4222_v40 = vpop.f32.mrf.mxu1 }
0x15e4   : > { %v5901_v41 = vpop.f32.mrf.mxu1 }
0x15e6   : > { %v4321_v42 = vpop.f32.mrf.mxu1 }
0x15e7   : > { %v4330_v43 = vpack.c.bf16 %v4321_v42, %v4321_v42 }
0x15e8   : > { %v5912_v45 = vpop.f32.mrf.mxu1 }
0x15e9   : > { %4601 = vmatprep.mubr.bf16.mxu1 %v4330_v43 }
0x15ea   : > { %v4324_v47 = vpop.f32.mrf.mxu1  ;;  %4602 = vmatmul.mubr.bf16.vlgmr.msra.gmra.mxu1 %v4329_v44 }
0x15eb   : > { %5938 = vmatprep.mubr.msk.bf16.mxu1 %vm6355_vm2, %v6354_v48  ;;  %5923 = vmatpush3.bf16.msra.mxu1 %v4756_v5 }
0x15ec   : > { %v5913_v49 = vpop.f32.mrf.mxu1  ;;  %5924 = vmatprep.subr.bf16.mxu1 %v6354_v48 }
0x15ef   : > { %5925 = vmatpush3.bf16.msra.mxu1 %v6219_v7 }
0x15f0   : > { %5926 = vmatprep.subr.bf16.mxu1 %v6354_v48 }
0x15f3   : > { %5927 = vmatpush3.bf16.msra.mxu1 %v6220_v8 }
0x15f4   : > { %5928 = vmatprep.subr.bf16.mxu1 %v6354_v48 }
0x15f7   : > { %5929 = vmatpush3.bf16.msra.mxu1 %v6221_v9 }
0x15f8   : > { %5930 = vmatprep.subr.bf16.mxu1 %v6354_v48 }
0x15fb   : > { %5931 = vmatpush3.bf16.msra.mxu1 %v6222_v11 }
0x15fc   : > { %5932 = vmatprep.subr.bf16.mxu1 %v6354_v48 }
0x15ff   : > { %5933 = vmatpush3.bf16.msra.mxu1 %v6223_v12 }
0x1600   : > { %5934 = vmatprep.subr.bf16.mxu1 %v6354_v48 }
0x1603   : > { %5935 = vmatpush3.bf16.msra.mxu1 %v6224_v27 }
0x1604   : > { %5936 = vmatprep.subr.bf16.mxu1 %v6354_v48 }
0x1607   : > { %5937 = vmatpush3.bf16.msra.mxu1 %v6225_v23 }
0x169a   : > { %v5671_v50 = vpop.f32.mrf.mxu0 }
0x169c   : > { %v5672_v31 = vpop.f32.mrf.mxu0 }
0x169d   : > { %v5673_v53 = vadd.f32 %v5672_v31, %v5671_v50  ;;  %v6226_v50 = vld [vmem:[%s7586_s14 + $0x8] sm:$0x7f]  }
0x169e   : > { %v5674_v51 = vpop.f32.mrf.mxu0  ;;  %v4862_v31 = vsel %vm777_vm1, %v6226_v50, 0 }
0x169f   : > { %v4564_v56 = vadd.f32 %v5673_v53, %v5434_v54  ;;  %v6227_v51 = vld [vmem:[%s7586_s14] sm:$0xff]  }
0x16a0   : > { %v5675_v52 = vpop.f32.mrf.mxu0 }
0x16aa   : > { %v5693_v33 = vpop.f32.mrf.mxu1 }
0x16ac   : > { %v5694_v55 = vpop.f32.mrf.mxu1 }
0x16ad   : > { %v5695_v24 = vadd.f32 %v5694_v55, %v5693_v33  ;;  %v5485_v55 = vld [vmem:[%s7584_s12] ss:$0 sm:$0xff] }
0x16ae   : > { %v5696_v57 = vpop.f32.mrf.mxu1 }
0x16af   : > { %v4604_v15 = vadd.f32 %v5695_v24, %v4564_v56  ;;  %v5486_v24 = vld [vmem:[%s7585_s13] ss:$0 sm:$0xff] }
0x16b0   : > { %v5697_v59 = vpop.f32.mrf.mxu1 }
0x16b1   : > { %v7442_v61 = vadd.f32 %v4604_v15, %v7170_v32  ;;  %v6217_v32 = vld [vmem:[%s7580_s8 + $0x20] sm:$0xff]  }
0x16b2   : > { %5917 = vmatpush3.bf16.msra.mxu0 %v6217_v32 }
0x16b3   : > { %v4614_v62 = vsel %vm636_vm0, %v7442_v61, 0.0  ;;  %5942 = vmatprep.subr.bf16.mxu0 %v6354_v48 }
0x16b4   : > { %4615 = vadd.xlane.f32.xlu0 %v4614_v62 }
0x173d   : > { %v4616_v6 = vpop.xlane.xlu0 %4615 }
0x173e   : > { %v4617_v63 = vmul.f32 0.033333335, %v4616_v6 }
0x1740   : > { %v4618_v0 = vsub.f32 %v7442_v61, %v4617_v63 }
0x1742   : > { %v4619_v1 = vmul.f32 %v4618_v0, %v4618_v0 }
0x1744   : > { %v4620_v2 = vsel %vm636_vm0, %v4619_v1, 0.0 }
0x1745   : > { %4621 = vadd.xlane.f32.xlu1 %v4620_v2 }
0x17ce   : > { %v4622_v13 = vpop.xlane.xlu1 %4621 }
0x17cf   : > { %v4623_v14 = vmul.f32 0.033333335, %v4622_v13 }
0x17d1   : > { %v4624_v16 = vadd.f32 1e-05, %v4623_v14 }
0x17d3   : > { %6286 = vrsqrt.f32 %v4624_v16 }
0x17e0   : > { %v6287_v18 = vpop.eup %6286 }
0x17e1   : > { %v4626_v20 = vmul.f32 %v6287_v18, %v4618_v0 }
0x17e3   : > { %v4633_v22 = vmul.f32 %v5469_v19, %v4626_v20 }
0x17e5   : > { %v4640_v25 = vadd.f32 %v5470_v21, %v4633_v22 }
0x17e7   : > { %v4641_v26 = vpack.c.bf16 %v4640_v25, %v4640_v25 }
0x17e9   : > { %5919 = vmatmul.mubr.msk.bf16.vlgmr.msra.gmra.mxu0 %vm636_vm0, %v4641_v26 }
0x17ea   : > { %5946 = vmatprep.mubr.msk.bf16.mxu0 %vm6355_vm2, %v6354_v48  ;;  %5943 = vmatpush3.bf16.msra.mxu0 %v4862_v31 }
0x17eb   : > { %5944 = vmatprep.subr.bf16.mxu0 %v6354_v48  ;;  %v5487_v48 = vld [vmem:[%s7587_s15] ss:$0 sm:$0xff] }
0x17ee   : > { %5945 = vmatpush3.bf16.msra.mxu0 %v6227_v51 }
0x18a9   : > { %v4699_v28 = vpop.f32.mrf.mxu0 }
0x18aa   : > { %v4700_v29 = vadd.f32 %v5471_v17, %v4699_v28 }
0x18ab   : > { %v5920_v30 = vpop.f32.mrf.mxu0 }
0x18ac   : > { %v4705_v10 = vmax.f32 %v4700_v29, 0.0 }
0x18ad   : > { %v4702_v34 = vpop.f32.mrf.mxu0 }
0x18ae   : > { %v4706_v35 = vpack.c.bf16 %v4705_v10, %v4705_v10 }
0x18af   : > { %v5921_v58 = vpop.f32.mrf.mxu0 }
0x18b0   : > { %5939 = vmatmul.mubr.msk.bf16.vlgmr.msra.gmra.mxu1 %vm1893_vm6, %v4706_v35 }
0x1970   : > { %v4792_v36 = vpop.f32.mrf.mxu1 }
0x1971   : > { %v4798_v38 = vadd.f32 %v4792_v36, %v7442_v61 }
0x1972   : > { %v5940_v39 = vpop.f32.mrf.mxu1 }
0x1973   : > { %v4805_v60 = vadd.f32 %v5484_v37, %v4798_v38 }
0x1974   : > { %v4795_v40 = vpop.f32.mrf.mxu1 }
0x1975   : > { %v4808_v41 = vsel %vm636_vm0, %v4805_v60, 0.0 }
0x1976   : > { %4809 = vadd.xlane.f32.xlu0 %v4808_v41  ;;  %v5941_v42 = vpop.f32.mrf.mxu1 }
0x19ff   : > { %v4810_v43 = vpop.xlane.xlu0 %4809 }
0x1a00   : > { %v4811_v44 = vmul.f32 0.033333335, %v4810_v43 }
0x1a02   : > { %v4812_v45 = vsub.f32 %v4805_v60, %v4811_v44 }
0x1a04   : > { %v4813_v47 = vmul.f32 %v4812_v45, %v4812_v45 }
0x1a06   : > { %v4814_v49 = vsel %vm636_vm0, %v4813_v47, 0.0 }
0x1a07   : > { %4815 = vadd.xlane.f32.xlu1 %v4814_v49 }
0x1a90   : > { %v4816_v52 = vpop.xlane.xlu1 %4815 }
0x1a91   : > { %v4817_v53 = vmul.f32 0.033333335, %v4816_v52 }
0x1a93   : > { %v4818_v54 = vadd.f32 1e-05, %v4817_v53 }
0x1a95   : > { %6288 = vrsqrt.f32 %v4818_v54 }
0x1aa2   : > { %v6289_v33 = vpop.eup %6288 }
0x1aa3   : > { %v4820_v56 = vmul.f32 %v6289_v33, %v4812_v45 }
0x1aa5   : > { %v4827_v57 = vmul.f32 %v5485_v55, %v4820_v56 }
0x1aa7   : > { %v4834_v15 = vadd.f32 %v5486_v24, %v4827_v57 }
0x1aa9   : > { %v4835_v59 = vpack.c.bf16 %v4834_v15, %v4834_v15 }
0x1aab   : > { %5947 = vmatmul.mubr.msk.bf16.vlgmr.msra.gmra.mxu0 %vm636_vm0, %v4835_v59 }
0x1b6b   : > { %v4898_v61 = vpop.f32.mrf.mxu0 }
0x1b6c   : > { %v4899_v62 = vadd.f32 %v5487_v48, %v4898_v61 }
0x1b6d   : > { %v5948_v6 = vpop.f32.mrf.mxu0 }
0x1b6e   : > { %4904 = vst [vmem:[%s512_s21] sm:$0xff] %v4899_v62 }
0x1b6f   : > { %v4901_v63 = vpop.f32.mrf.mxu0 }
0x1b70   : > { %6304 = shalt.err (!%p6301_p3)
}
0x1b71   : > { %s6305_s29 = scalar_lea.hbm %s7531_s27, 128  ;;  %s6309_s19 = scalar_lea.hbm %s7588_s16, 256 }
0x1b72   : > { %p6306_p4 = scmp.ne.s32.totalorder %s7531_s27, %s6305_s29  ;;  %p6310_p9 = scmp.lt.s32.totalorder %s7531_s27, %s7588_s16 }
0x1b73   : > { %p6311_p10 = scmp.lt.s32.totalorder %s6309_s19, %s6305_s29 }
0x1b74   : > { %p6307_p7 = pnand %p6306_p4, %p6480_p5 }
0x1b75   : > { %p6312_p11 = por %p6311_p10, %p6310_p9 }
0x1b76   : > { %p6308_p8 = pneg %p6307_p7 }
0x1b78   : > { %p6313_p12 = pnand %p6312_p11, %p6308_p8 }
0x1b7a   : > { %6316 = shalt.err (!%p6313_p12)
}
0x1b7b   : > { %5950 = dma.vmem_to_hbm [thread:$0]  (%p6480_p5), %s7533_s17, 128, %s7531_s27, %s4906_s28   ;;  %v5949_v0 = vpop.f32.mrf.mxu0 }
0x1b7c PF: > { %s7605_s18 = sld [smem:[#allocation5_spill]]  ;;  %p5956_p13 = scmp.ge.s32.totalorder %s6351_s24, 2 }
0x1b7e   : > { %p5953_p0 = pnand %p5956_p13, %p6484_p6 }
0x1b80   : > { %p5954_p1 = pneg %p5953_p0 }
0x1b82   : > { %s4931_s20 = sand.u32 1, %s7605_s18  }
0x1b83   : > { %s4932_s23 = scalar_lea.sflag [#allocation3], %s4931_s20 }
0x1b84   : > { %6334 = dma.done.wait (%p5954_p1), %s4932_s23, 128  }
0x1b85   : > { %6336 = vsyncadd (%p5954_p1), %s4932_s23, 4294967168  ;;  %s7607_s24 = sld [smem:[#allocation7_spill]]  ;;  %s7610_s21 = smov %s6343_s22 }
0x1b86   : > { %s7608_s29 = sld [smem:[#allocation6_spill]] }
0x1b87   : > { %s7609_s23 = sld [smem:[#allocation8_spill]] }
0x1b8b   : > { %p26_p2 = scmp.ge.s32.totalorder %s7607_s24, 4  }
0x1b8c   : > { %s7611_s22 = smov %s7608_s29 }
0x1b8d   :  { %28 = sbr.rel (!%p26_p2) target bundleno = 5 (0x5), region = 141 }
0x1b92   :  { %4937 = vsyncpa [#allocation3], 1 }
0x1b93   :  { %4939 = vsyncpa [#allocation3 + $0x1], 1 }

</bundles_post_ra>
